<compile_context>
chip_gen: v7x
topology: tpu7x:2x2x1
jax: 0.10.0
libtpu: 0.0.40
codegen_flags: <defaults>
</compile_context>

<pallas_src>
import math
import functools

import jax
import jax.numpy as jnp
import numpy as np
from jax import lax
from jax.experimental import pallas as pl
from jax.experimental.pallas import tpu as pltpu
from jax.scipy.special import gammaln, xlogy


# ---------------------------------------------------------------------------
# Positional features (pure-JAX glue; identical math to the torch helpers)
# ---------------------------------------------------------------------------
def get_positional_embed(seq_len, feature_size):
    distances = jnp.arange(-seq_len + 1, seq_len)           # (2n-1,)
    num_basis = feature_size // 6
    pos_abs = jnp.abs(distances).astype(jnp.float32)[:, None]

    # exponential
    max_range = math.log(seq_len) / math.log(2.0)
    half_life = 2.0 ** jnp.linspace(3.0, max_range, num_basis)
    exp_feat = jnp.exp(-math.log(2.0) / half_life[None, :] * pos_abs)

    # central mask
    center_widths = 2.0 ** jnp.arange(1, num_basis + 1, dtype=jnp.float32) - 1.0
    cm_feat = (center_widths[None, :] > pos_abs).astype(jnp.float32)

    # gamma
    stddev = seq_len / (2 * num_basis)
    start_mean = seq_len / num_basis
    mean = jnp.linspace(start_mean, float(seq_len), num_basis)
    concentration = (mean / stddev) ** 2
    rate = mean / stddev ** 2
    log_unnorm = xlogy(concentration - 1.0, pos_abs) - rate * pos_abs
    log_norm = gammaln(concentration) - concentration * jnp.log(rate)
    prob = jnp.exp(log_unnorm - log_norm) + 1e-8
    gamma_feat = prob / jnp.max(prob, axis=-1, keepdims=True)

    emb = jnp.concatenate([exp_feat, cm_feat, gamma_feat], axis=-1)     # (2n-1, 33)
    sgn = jnp.sign(distances).astype(jnp.float32)[:, None]
    emb = jnp.concatenate([emb, sgn * emb], axis=-1)                    # (2n-1, 66)
    return emb


# ---------------------------------------------------------------------------
# Pallas kernel: one batch element per grid point, heads fused / unrolled.
# ---------------------------------------------------------------------------
def _attention_kernel(x_ref, wqkv_ref, relk_ref, cb_ref, relb_ref, wo_ref,
                      bo_ref, out_ref, rel_scr, ctx_scr,
                      *, heads, dim_key, dim_value):
    n = x_ref.shape[1]                      # sequence length
    hk = heads * dim_key
    hv = heads * dim_value
    x = x_ref[0]                            # (n, dim) bf16

    # Single fused QKV projection (W_q was pre-scaled by dim_key**-0.5).
    qkv = jnp.dot(x, wqkv_ref[...], preferred_element_type=jnp.float32)  # (n, 2hk+hv)

    # Content-biased scaled query, one fused add + one bf16 cast for all heads.
    qc_all = (qkv[:, :hk] + cb_ref[...]).astype(jnp.bfloat16)            # (n, hk)
    k_all = qkv[:, hk:2 * hk].astype(jnp.bfloat16)                       # (n, hk)
    v_all = qkv[:, 2 * hk:2 * hk + hv].astype(jnp.bfloat16)              # (n, hv)

    nt = (((1,), (1,)), ((), ()))           # contract last dims: A @ B^T

    for h in range(heads):
        ks_ = slice(h * dim_key, (h + 1) * dim_key)
        vs_ = slice(h * dim_value, (h + 1) * dim_value)
        qc = qc_all[:, ks_]                                              # (n, dk) bf16

        # content logits: (q*s + cb) @ k^T
        content = lax.dot_general(qc, k_all[:, ks_], nt,
                                  preferred_element_type=jnp.float32)    # (n, n)

        # rel logits before the shift:
        #   (q*s + pb) @ rk^T = (q*s + cb) @ rk^T + (pb - cb) @ rk^T
        # The second term is batch-invariant and was hoisted into relb_ref.
        raw = lax.dot_general(qc, relk_ref[h], nt,
                              preferred_element_type=jnp.float32)        # (n, 2n-1)
        raw = raw + relb_ref[h]

        # relative_shift: rel[i, j] = raw[i, (n - 1) + j - i]
        # Static per-row band extraction: O(n^2), no transposes, no large
        # intermediates.
        # TODO(synk): at Enformer-scale n, replace the unrolled per-row slices
        # with a strided band extraction + flash-style KV tiling of the softmax.
        for i in range(n):
            rel_scr[i:i + 1, :] = raw[i:i + 1, (n - 1 - i):(2 * n - 1 - i)]

        # Numerically-stable softmax (f32), EUP reciprocal for the normalizer.
        logits = content + rel_scr[...]
        m = jnp.max(logits, axis=-1, keepdims=True)
        e = jnp.exp(logits - m)
        denom = jnp.sum(e, axis=-1, keepdims=True)
        attn = (e * pl.reciprocal(denom, approx=True)).astype(jnp.bfloat16)

        o = jnp.dot(attn, v_all[:, vs_], preferred_element_type=jnp.float32)  # (n, dv)
        ctx_scr[:, vs_] = o.astype(jnp.bfloat16)

    # Single fused output projection over all heads (K = heads*dv).
    out = jnp.dot(ctx_scr[...], wo_ref[...], preferred_element_type=jnp.float32)
    out_ref[0] = out + bo_ref[...]


# ---------------------------------------------------------------------------
# Wrapper
# ---------------------------------------------------------------------------
def attention_pallas(x, params, pos, *, heads, dim_key, dim_value):
    b, n, dim = x.shape
    L = pos.shape[0]                        # 2n - 1
    scale = dim_key ** -0.5
    hk, hv = heads * dim_key, heads * dim_value
    hp = lax.Precision.HIGHEST

    xb = x.astype(jnp.bfloat16)

    # Fused QKV weight; fold the query scale into W_q (scale is a power of two,
    # so bf16 rounding of the weight is unchanged).
    wqkv = jnp.concatenate(
        [params["wq"] * scale, params["wk"], params["wv"]], axis=1
    ).astype(jnp.bfloat16)                                               # (dim, 2hk+hv)
    wo = params["wo"].astype(jnp.bfloat16)                               # (hv, dim)
    bo = params["bo"].reshape(1, dim).astype(jnp.float32)
    cb_flat = params["rel_content_bias"].reshape(1, hk).astype(jnp.float32)

    cbh = params["rel_content_bias"].reshape(heads, dim_key)
    pbh = params["rel_pos_bias"].reshape(heads, dim_key)

    # Batch-invariant pieces hoisted out of the kernel (computed once, f32):
    rel_k = jnp.matmul(pos, params["wrk"], precision=hp)                 # (L, hk)
    rel_k = rel_k.reshape(L, heads, dim_key).transpose(1, 0, 2)          # (h, L, dk)
    relb = jnp.einsum('hd,hld->hl', pbh - cbh, rel_k, precision=hp)      # (h, L)
    relb = relb.reshape(heads, 1, L).astype(jnp.float32)
    rel_k = rel_k.astype(jnp.bfloat16)

    kernel = functools.partial(_attention_kernel, heads=heads,
                               dim_key=dim_key, dim_value=dim_value)

    grid_spec = pltpu.PrefetchScalarGridSpec(
        num_scalar_prefetch=0,
        grid=(b,),
        in_specs=[
            pl.BlockSpec((1, n, dim), lambda bi: (bi, 0, 0)),            # x
            pl.BlockSpec((dim, 2 * hk + hv), lambda bi: (0, 0)),         # wqkv (fused)
            pl.BlockSpec((heads, L, dim_key), lambda bi: (0, 0, 0)),     # rel_k
            pl.BlockSpec((1, hk), lambda bi: (0, 0)),                    # rel_content_bias
            pl.BlockSpec((heads, 1, L), lambda bi: (0, 0, 0)),           # hoisted rel bias
            pl.BlockSpec((hv, dim), lambda bi: (0, 0)),                  # wo
            pl.BlockSpec((1, dim), lambda bi: (0, 0)),                   # bo
        ],
        out_specs=pl.BlockSpec((1, n, dim), lambda bi: (bi, 0, 0)),
        scratch_shapes=[
            pltpu.VMEM((n, n), jnp.float32),       # shifted rel logits
            pltpu.VMEM((n, hv), jnp.bfloat16),     # fused per-head context
        ],
    )

    return pl.pallas_call(
        kernel,
        grid_spec=grid_spec,
        out_shape=jax.ShapeDtypeStruct((b, n, dim), jnp.float32),
        compiler_params=pltpu.CompilerParams(
            dimension_semantics=("parallel",),
            vmem_limit_bytes=64 * 1024 * 1024),
    )(xb, wqkv, rel_k, cb_flat, relb, wo, bo)


# ---------------------------------------------------------------------------
# Pure-JAX reference (literal port of the torch forward) for verification
# ---------------------------------------------------------------------------
def _relative_shift_ref(x):
    b, h, t1, t2 = x.shape
    x = jnp.concatenate([jnp.zeros_like(x[..., :1]), x], axis=-1)
    x = x.reshape(b, h, t2 + 1, t1)
    x = x[:, :, 1:, :]
    x = x.reshape(b, h, t1, t2)
    return x[..., :(t2 + 2) // 2]


def attention_ref(x, params, pos, *, heads, dim_key, dim_value):
    b, n, dim = x.shape
    hp = lax.Precision.HIGHEST
    q = jnp.matmul(x, params["wq"], precision=hp)
    k = jnp.matmul(x, params["wk"], precision=hp)
    v = jnp.matmul(x, params["wv"], precision=hp)

    def split(t, d):
        return t.reshape(b, n, heads, d).transpose(0, 2, 1, 3)

    q, k, v = split(q, dim_key), split(k, dim_key), split(v, dim_value)
    q = q * dim_key ** -0.5
    cb = params["rel_content_bias"]
    pb = params["rel_pos_bias"]
    content = jnp.einsum('bhid,bhjd->bhij', q + cb, k, precision=hp)
    rel_k = jnp.matmul(pos, params["wrk"], precision=hp)
    rel_k = rel_k.reshape(pos.shape[0], heads, dim_key).transpose(1, 0, 2)
    rel_logits = jnp.einsum('bhid,hjd->bhij', q + pb, rel_k, precision=hp)
    rel_logits = _relative_shift_ref(rel_logits)
    attn = jax.nn.softmax(content + rel_logits, axis=-1)
    out = jnp.einsum('bhij,bhjd->bhid', attn, v, precision=hp)
    out = out.transpose(0, 2, 1, 3).reshape(b, n, heads * dim_value)
    return jnp.matmul(out, params["wo"], precision=hp) + params["bo"]


# ---------------------------------------------------------------------------
if __name__ == "__main__":
    key = jax.random.PRNGKey(0)
    b, n, dim = 2, 8, 32
    heads, dim_key, dim_value = 8, 64, 64
    nrpf = 66  # self.num_rel_pos_features

    ks = jax.random.split(key, 9)
    x = jax.random.normal(ks[0], (b, n, dim), jnp.float32)
    params = dict(
        wq=jax.random.normal(ks[1], (dim, heads * dim_key), jnp.float32) * 0.05,
        wk=jax.random.normal(ks[2], (dim, heads * dim_key), jnp.float32) * 0.05,
        wv=jax.random.normal(ks[3], (dim, heads * dim_value), jnp.float32) * 0.05,
        wrk=jax.random.normal(ks[4], (nrpf, heads * dim_key), jnp.float32) * 0.05,
        # reference module zero-inits to_out; random here so the kernel is non-trivial
        wo=jax.random.normal(ks[5], (heads * dim_value, dim), jnp.float32) * 0.05,
        bo=jax.random.normal(ks[6], (dim,), jnp.float32) * 0.05,
        rel_content_bias=jax.random.normal(ks[7], (1, heads, 1, dim_key), jnp.float32),
        rel_pos_bias=jax.random.normal(ks[8], (1, heads, 1, dim_key), jnp.float32),
    )

    pos = get_positional_embed(n, nrpf)          # (2n-1, 66)

    out = attention_pallas(x, params, pos,
                           heads=heads, dim_key=dim_key, dim_value=dim_value)
    out = jax.block_until_ready(out)

    ref = attention_ref(x, params, pos,
                        heads=heads, dim_key=dim_key, dim_value=dim_value)
    # Kernel uses bf16 MXU operands with f32 accumulation; reference is full f32
    # HIGHEST precision, so the tolerance is bf16-appropriate.
    np.testing.assert_allclose(np.asarray(out), np.asarray(ref),
                               rtol=2e-2, atol=3e-2)
    print("KERNEL_OK")
</pallas_src>

<mosaic_0001>
module attributes {stable_mosaic.version = 11 : i64} {
  func.func @_attention_kernel(%arg0: i32, %arg1: memref<1x8x32xbf16, #tpu.memory_space<vmem>>, %arg2: memref<32x1536xbf16, #tpu.memory_space<vmem>>, %arg3: memref<8x15x64xbf16, #tpu.memory_space<vmem>>, %arg4: memref<1x512xf32, #tpu.memory_space<vmem>>, %arg5: memref<8x1x15xf32, #tpu.memory_space<vmem>>, %arg6: memref<512x32xbf16, #tpu.memory_space<vmem>>, %arg7: memref<1x32xf32, #tpu.memory_space<vmem>>, %arg8: memref<1x8x32xf32, #tpu.memory_space<vmem>>, %arg9: memref<8x8xf32, #tpu.memory_space<vmem>>, %arg10: memref<8x512xbf16, #tpu.memory_space<vmem>>) attributes {dimension_semantics = [#tpu.dimension_semantics<parallel>], iteration_bounds = array<i64: 2>, scalar_prefetch = 0 : i64, scratch_operands = 2 : i64, tpu.core_type = #tpu.core_type<tc>, window_params = [{transform_indices = @transform_0, window_bounds = array<i64: 1, 8, 32>}, {pipeline_mode = #tpu.pipeline_mode<synchronous>, transform_indices = @transform_1, window_bounds = array<i64: 32, 1536>}, {pipeline_mode = #tpu.pipeline_mode<synchronous>, transform_indices = @transform_2, window_bounds = array<i64: 8, 15, 64>}, {pipeline_mode = #tpu.pipeline_mode<synchronous>, transform_indices = @transform_3, window_bounds = array<i64: 1, 512>}, {pipeline_mode = #tpu.pipeline_mode<synchronous>, transform_indices = @transform_4, window_bounds = array<i64: 8, 1, 15>}, {pipeline_mode = #tpu.pipeline_mode<synchronous>, transform_indices = @transform_5, window_bounds = array<i64: 512, 32>}, {pipeline_mode = #tpu.pipeline_mode<synchronous>, transform_indices = @transform_6, window_bounds = array<i64: 1, 32>}, {transform_indices = @transform_7, window_bounds = array<i64: 1, 8, 32>}]} {
    %c0 = arith.constant 0 : index
    %c0_0 = arith.constant 0 : index
    %c0_1 = arith.constant 0 : index
    %0 = vector.load %arg1[%c0, %c0_0, %c0_1] : memref<1x8x32xbf16, #tpu.memory_space<vmem>>, vector<1x8x32xbf16>
    %1 = vector.shape_cast %0 : vector<1x8x32xbf16> to vector<8x32xbf16>
    %c0_2 = arith.constant 0 : index
    %c0_3 = arith.constant 0 : index
    %2 = vector.load %arg2[%c0_2, %c0_3] : memref<32x1536xbf16, #tpu.memory_space<vmem>>, vector<32x1536xbf16>
    %cst = arith.constant dense<0.000000e+00> : vector<8x1536xf32>
    %3 = tpu.matmul %1, %2, %cst {dimension_numbers = #tpu.dot_dimension_numbers<[1], [0], [0], [1], [0, 0, 1, 1], [], []>} : vector<8x32xbf16>, vector<32x1536xbf16>, vector<8x1536xf32> -> vector<8x1536xf32>
    %4 = vector.extract_strided_slice %3 {offsets = [0, 0], sizes = [8, 512], strides = [1, 1]} : vector<8x1536xf32> to vector<8x512xf32>
    %c0_4 = arith.constant 0 : index
    %c0_5 = arith.constant 0 : index
    %5 = vector.load %arg4[%c0_4, %c0_5] : memref<1x512xf32, #tpu.memory_space<vmem>>, vector<1x512xf32>
    %6 = vector.broadcast %5 : vector<1x512xf32> to vector<8x512xf32>
    %7 = arith.addf %4, %6 : vector<8x512xf32>
    %8 = arith.truncf %7 : vector<8x512xf32> to vector<8x512xbf16>
    %9 = vector.extract_strided_slice %3 {offsets = [0, 512], sizes = [8, 512], strides = [1, 1]} : vector<8x1536xf32> to vector<8x512xf32>
    %10 = arith.truncf %9 : vector<8x512xf32> to vector<8x512xbf16>
    %11 = vector.extract_strided_slice %3 {offsets = [0, 1024], sizes = [8, 512], strides = [1, 1]} : vector<8x1536xf32> to vector<8x512xf32>
    %12 = arith.truncf %11 : vector<8x512xf32> to vector<8x512xbf16>
    %13 = vector.extract_strided_slice %8 {offsets = [0, 0], sizes = [8, 64], strides = [1, 1]} : vector<8x512xbf16> to vector<8x64xbf16>
    %14 = vector.extract_strided_slice %10 {offsets = [0, 0], sizes = [8, 64], strides = [1, 1]} : vector<8x512xbf16> to vector<8x64xbf16>
    %cst_6 = arith.constant dense<0.000000e+00> : vector<8x8xf32>
    %15 = tpu.matmul %13, %14, %cst_6 {dimension_numbers = #tpu.dot_dimension_numbers<[1], [1], [0], [0], [0, 0, 1, 0], [], []>} : vector<8x64xbf16>, vector<8x64xbf16>, vector<8x8xf32> -> vector<8x8xf32>
    %c0_7 = arith.constant 0 : index
    %c0_8 = arith.constant 0 : index
    %c0_9 = arith.constant 0 : index
    %16 = vector.load %arg3[%c0_7, %c0_8, %c0_9] : memref<8x15x64xbf16, #tpu.memory_space<vmem>>, vector<1x15x64xbf16>
    %17 = vector.shape_cast %16 : vector<1x15x64xbf16> to vector<15x64xbf16>
    %cst_10 = arith.constant dense<0.000000e+00> : vector<8x15xf32>
    %18 = tpu.matmul %13, %17, %cst_10 {dimension_numbers = #tpu.dot_dimension_numbers<[1], [1], [0], [0], [0, 0, 1, 0], [], []>} : vector<8x64xbf16>, vector<15x64xbf16>, vector<8x15xf32> -> vector<8x15xf32>
    %c0_11 = arith.constant 0 : index
    %c0_12 = arith.constant 0 : index
    %c0_13 = arith.constant 0 : index
    %19 = vector.load %arg5[%c0_11, %c0_12, %c0_13] : memref<8x1x15xf32, #tpu.memory_space<vmem>>, vector<1x1x15xf32>
    %20 = vector.shape_cast %19 : vector<1x1x15xf32> to vector<1x15xf32>
    %21 = vector.broadcast %20 : vector<1x15xf32> to vector<8x15xf32>
    %22 = arith.addf %18, %21 : vector<8x15xf32>
    %23 = vector.extract_strided_slice %22 {offsets = [0, 7], sizes = [1, 8], strides = [1, 1]} : vector<8x15xf32> to vector<1x8xf32>
    %c0_14 = arith.constant 0 : index
    %c0_15 = arith.constant 0 : index
    %24 = vector.load %arg9[%c0_14, %c0_15] : memref<8x8xf32, #tpu.memory_space<vmem>>, vector<1x8xf32>
    tpu.vector_store %arg9[%c0_14, %c0_15], %23 {strides = array<i32>} : memref<8x8xf32, #tpu.memory_space<vmem>>, vector<1x8xf32>,
    %25 = vector.extract_strided_slice %22 {offsets = [1, 6], sizes = [1, 8], strides = [1, 1]} : vector<8x15xf32> to vector<1x8xf32>
    %c1 = arith.constant 1 : index
    %c0_16 = arith.constant 0 : index
    %26 = vector.load %arg9[%c1, %c0_16] : memref<8x8xf32, #tpu.memory_space<vmem>>, vector<1x8xf32>
    tpu.vector_store %arg9[%c1, %c0_16], %25 {strides = array<i32>} : memref<8x8xf32, #tpu.memory_space<vmem>>, vector<1x8xf32>,
    %27 = vector.extract_strided_slice %22 {offsets = [2, 5], sizes = [1, 8], strides = [1, 1]} : vector<8x15xf32> to vector<1x8xf32>
    %c2 = arith.constant 2 : index
    %c0_17 = arith.constant 0 : index
    %28 = vector.load %arg9[%c2, %c0_17] : memref<8x8xf32, #tpu.memory_space<vmem>>, vector<1x8xf32>
    tpu.vector_store %arg9[%c2, %c0_17], %27 {strides = array<i32>} : memref<8x8xf32, #tpu.memory_space<vmem>>, vector<1x8xf32>,
    %29 = vector.extract_strided_slice %22 {offsets = [3, 4], sizes = [1, 8], strides = [1, 1]} : vector<8x15xf32> to vector<1x8xf32>
    %c3 = arith.constant 3 : index
    %c0_18 = arith.constant 0 : index
    %30 = vector.load %arg9[%c3, %c0_18] : memref<8x8xf32, #tpu.memory_space<vmem>>, vector<1x8xf32>
    tpu.vector_store %arg9[%c3, %c0_18], %29 {strides = array<i32>} : memref<8x8xf32, #tpu.memory_space<vmem>>, vector<1x8xf32>,
    %31 = vector.extract_strided_slice %22 {offsets = [4, 3], sizes = [1, 8], strides = [1, 1]} : vector<8x15xf32> to vector<1x8xf32>
    %c4 = arith.constant 4 : index
    %c0_19 = arith.constant 0 : index
    %32 = vector.load %arg9[%c4, %c0_19] : memref<8x8xf32, #tpu.memory_space<vmem>>, vector<1x8xf32>
    tpu.vector_store %arg9[%c4, %c0_19], %31 {strides = array<i32>} : memref<8x8xf32, #tpu.memory_space<vmem>>, vector<1x8xf32>,
    %33 = vector.extract_strided_slice %22 {offsets = [5, 2], sizes = [1, 8], strides = [1, 1]} : vector<8x15xf32> to vector<1x8xf32>
    %c5 = arith.constant 5 : index
    %c0_20 = arith.constant 0 : index
    %34 = vector.load %arg9[%c5, %c0_20] : memref<8x8xf32, #tpu.memory_space<vmem>>, vector<1x8xf32>
    tpu.vector_store %arg9[%c5, %c0_20], %33 {strides = array<i32>} : memref<8x8xf32, #tpu.memory_space<vmem>>, vector<1x8xf32>,
    %35 = vector.extract_strided_slice %22 {offsets = [6, 1], sizes = [1, 8], strides = [1, 1]} : vector<8x15xf32> to vector<1x8xf32>
    %c6 = arith.constant 6 : index
    %c0_21 = arith.constant 0 : index
    %36 = vector.load %arg9[%c6, %c0_21] : memref<8x8xf32, #tpu.memory_space<vmem>>, vector<1x8xf32>
    tpu.vector_store %arg9[%c6, %c0_21], %35 {strides = array<i32>} : memref<8x8xf32, #tpu.memory_space<vmem>>, vector<1x8xf32>,
    %37 = vector.extract_strided_slice %22 {offsets = [7, 0], sizes = [1, 8], strides = [1, 1]} : vector<8x15xf32> to vector<1x8xf32>
    %c7 = arith.constant 7 : index
    %c0_22 = arith.constant 0 : index
    %38 = vector.load %arg9[%c7, %c0_22] : memref<8x8xf32, #tpu.memory_space<vmem>>, vector<1x8xf32>
    tpu.vector_store %arg9[%c7, %c0_22], %37 {strides = array<i32>} : memref<8x8xf32, #tpu.memory_space<vmem>>, vector<1x8xf32>,
    %c0_23 = arith.constant 0 : index
    %c0_24 = arith.constant 0 : index
    %39 = vector.load %arg9[%c0_23, %c0_24] : memref<8x8xf32, #tpu.memory_space<vmem>>, vector<8x8xf32>
    %40 = arith.addf %15, %39 : vector<8x8xf32>
    %cst_25 = arith.constant dense<0xFF800000> : vector<8xf32>
    %41 = vector.multi_reduction <maximumf>, %40, %cst_25 [1] : vector<8x8xf32> to vector<8xf32>
    %42 = vector.shape_cast %41 : vector<8xf32> to vector<8x1xf32>
    %43 = vector.broadcast %42 : vector<8x1xf32> to vector<8x8xf32>
    %44 = arith.subf %40, %43 : vector<8x8xf32>
    %45 = math.exp %44 : vector<8x8xf32>
    %cst_26 = arith.constant dense<0.000000e+00> : vector<8xf32>
    %46 = vector.multi_reduction <add>, %45, %cst_26 [1] : vector<8x8xf32> to vector<8xf32>
    %47 = vector.shape_cast %46 : vector<8xf32> to vector<8x1xf32>
    %48 = tpu.reciprocal %47 {approx = true} : vector<8x1xf32> -> vector<8x1xf32>
    %49 = vector.broadcast %48 : vector<8x1xf32> to vector<8x8xf32>
    %50 = arith.mulf %45, %49 : vector<8x8xf32>
    %51 = arith.truncf %50 : vector<8x8xf32> to vector<8x8xbf16>
    %52 = vector.extract_strided_slice %12 {offsets = [0, 0], sizes = [8, 64], strides = [1, 1]} : vector<8x512xbf16> to vector<8x64xbf16>
    %cst_27 = arith.constant dense<0.000000e+00> : vector<8x64xf32>
    %53 = tpu.matmul %51, %52, %cst_27 {dimension_numbers = #tpu.dot_dimension_numbers<[1], [0], [0], [1], [0, 0, 1, 1], [], []>} : vector<8x8xbf16>, vector<8x64xbf16>, vector<8x64xf32> -> vector<8x64xf32>
    %54 = arith.truncf %53 : vector<8x64xf32> to vector<8x64xbf16>
    %c0_28 = arith.constant 0 : index
    %c0_29 = arith.constant 0 : index
    %55 = vector.load %arg10[%c0_28, %c0_29] : memref<8x512xbf16, #tpu.memory_space<vmem>>, vector<8x64xbf16>
    tpu.vector_store %arg10[%c0_28, %c0_29], %54 {strides = array<i32>} : memref<8x512xbf16, #tpu.memory_space<vmem>>, vector<8x64xbf16>,
    %56 = vector.extract_strided_slice %8 {offsets = [0, 64], sizes = [8, 64], strides = [1, 1]} : vector<8x512xbf16> to vector<8x64xbf16>
    %57 = vector.extract_strided_slice %10 {offsets = [0, 64], sizes = [8, 64], strides = [1, 1]} : vector<8x512xbf16> to vector<8x64xbf16>
    %cst_30 = arith.constant dense<0.000000e+00> : vector<8x8xf32>
    %58 = tpu.matmul %56, %57, %cst_30 {dimension_numbers = #tpu.dot_dimension_numbers<[1], [1], [0], [0], [0, 0, 1, 0], [], []>} : vector<8x64xbf16>, vector<8x64xbf16>, vector<8x8xf32> -> vector<8x8xf32>
    %c1_31 = arith.constant 1 : index
    %c0_32 = arith.constant 0 : index
    %c0_33 = arith.constant 0 : index
    %59 = vector.load %arg3[%c1_31, %c0_32, %c0_33] : memref<8x15x64xbf16, #tpu.memory_space<vmem>>, vector<1x15x64xbf16>
    %60 = vector.shape_cast %59 : vector<1x15x64xbf16> to vector<15x64xbf16>
    %cst_34 = arith.constant dense<0.000000e+00> : vector<8x15xf32>
    %61 = tpu.matmul %56, %60, %cst_34 {dimension_numbers = #tpu.dot_dimension_numbers<[1], [1], [0], [0], [0, 0, 1, 0], [], []>} : vector<8x64xbf16>, vector<15x64xbf16>, vector<8x15xf32> -> vector<8x15xf32>
    %c1_35 = arith.constant 1 : index
    %c0_36 = arith.constant 0 : index
    %c0_37 = arith.constant 0 : index
    %62 = vector.load %arg5[%c1_35, %c0_36, %c0_37] : memref<8x1x15xf32, #tpu.memory_space<vmem>>, vector<1x1x15xf32>
    %63 = vector.shape_cast %62 : vector<1x1x15xf32> to vector<1x15xf32>
    %64 = vector.broadcast %63 : vector<1x15xf32> to vector<8x15xf32>
    %65 = arith.addf %61, %64 : vector<8x15xf32>
    %66 = vector.extract_strided_slice %65 {offsets = [0, 7], sizes = [1, 8], strides = [1, 1]} : vector<8x15xf32> to vector<1x8xf32>
    %c0_38 = arith.constant 0 : index
    %c0_39 = arith.constant 0 : index
    %67 = vector.load %arg9[%c0_38, %c0_39] : memref<8x8xf32, #tpu.memory_space<vmem>>, vector<1x8xf32>
    tpu.vector_store %arg9[%c0_38, %c0_39], %66 {strides = array<i32>} : memref<8x8xf32, #tpu.memory_space<vmem>>, vector<1x8xf32>,
    %68 = vector.extract_strided_slice %65 {offsets = [1, 6], sizes = [1, 8], strides = [1, 1]} : vector<8x15xf32> to vector<1x8xf32>
    %c1_40 = arith.constant 1 : index
    %c0_41 = arith.constant 0 : index
    %69 = vector.load %arg9[%c1_40, %c0_41] : memref<8x8xf32, #tpu.memory_space<vmem>>, vector<1x8xf32>
    tpu.vector_store %arg9[%c1_40, %c0_41], %68 {strides = array<i32>} : memref<8x8xf32, #tpu.memory_space<vmem>>, vector<1x8xf32>,
    %70 = vector.extract_strided_slice %65 {offsets = [2, 5], sizes = [1, 8], strides = [1, 1]} : vector<8x15xf32> to vector<1x8xf32>
    %c2_42 = arith.constant 2 : index
    %c0_43 = arith.constant 0 : index
    %71 = vector.load %arg9[%c2_42, %c0_43] : memref<8x8xf32, #tpu.memory_space<vmem>>, vector<1x8xf32>
    tpu.vector_store %arg9[%c2_42, %c0_43], %70 {strides = array<i32>} : memref<8x8xf32, #tpu.memory_space<vmem>>, vector<1x8xf32>,
    %72 = vector.extract_strided_slice %65 {offsets = [3, 4], sizes = [1, 8], strides = [1, 1]} : vector<8x15xf32> to vector<1x8xf32>
    %c3_44 = arith.constant 3 : index
    %c0_45 = arith.constant 0 : index
    %73 = vector.load %arg9[%c3_44, %c0_45] : memref<8x8xf32, #tpu.memory_space<vmem>>, vector<1x8xf32>
    tpu.vector_store %arg9[%c3_44, %c0_45], %72 {strides = array<i32>} : memref<8x8xf32, #tpu.memory_space<vmem>>, vector<1x8xf32>,
    %74 = vector.extract_strided_slice %65 {offsets = [4, 3], sizes = [1, 8], strides = [1, 1]} : vector<8x15xf32> to vector<1x8xf32>
    %c4_46 = arith.constant 4 : index
    %c0_47 = arith.constant 0 : index
    %75 = vector.load %arg9[%c4_46, %c0_47] : memref<8x8xf32, #tpu.memory_space<vmem>>, vector<1x8xf32>
    tpu.vector_store %arg9[%c4_46, %c0_47], %74 {strides = array<i32>} : memref<8x8xf32, #tpu.memory_space<vmem>>, vector<1x8xf32>,
    %76 = vector.extract_strided_slice %65 {offsets = [5, 2], sizes = [1, 8], strides = [1, 1]} : vector<8x15xf32> to vector<1x8xf32>
    %c5_48 = arith.constant 5 : index
    %c0_49 = arith.constant 0 : index
    %77 = vector.load %arg9[%c5_48, %c0_49] : memref<8x8xf32, #tpu.memory_space<vmem>>, vector<1x8xf32>
    tpu.vector_store %arg9[%c5_48, %c0_49], %76 {strides = array<i32>} : memref<8x8xf32, #tpu.memory_space<vmem>>, vector<1x8xf32>,
    %78 = vector.extract_strided_slice %65 {offsets = [6, 1], sizes = [1, 8], strides = [1, 1]} : vector<8x15xf32> to vector<1x8xf32>
    %c6_50 = arith.constant 6 : index
    %c0_51 = arith.constant 0 : index
    %79 = vector.load %arg9[%c6_50, %c0_51] : memref<8x8xf32, #tpu.memory_space<vmem>>, vector<1x8xf32>
    tpu.vector_store %arg9[%c6_50, %c0_51], %78 {strides = array<i32>} : memref<8x8xf32, #tpu.memory_space<vmem>>, vector<1x8xf32>,
    %80 = vector.extract_strided_slice %65 {offsets = [7, 0], sizes = [1, 8], strides = [1, 1]} : vector<8x15xf32> to vector<1x8xf32>
    %c7_52 = arith.constant 7 : index
    %c0_53 = arith.constant 0 : index
    %81 = vector.load %arg9[%c7_52, %c0_53] : memref<8x8xf32, #tpu.memory_space<vmem>>, vector<1x8xf32>
    tpu.vector_store %arg9[%c7_52, %c0_53], %80 {strides = array<i32>} : memref<8x8xf32, #tpu.memory_space<vmem>>, vector<1x8xf32>,
    %c0_54 = arith.constant 0 : index
    %c0_55 = arith.constant 0 : index
    %82 = vector.load %arg9[%c0_54, %c0_55] : memref<8x8xf32, #tpu.memory_space<vmem>>, vector<8x8xf32>
    %83 = arith.addf %58, %82 : vector<8x8xf32>
    %cst_56 = arith.constant dense<0xFF800000> : vector<8xf32>
    %84 = vector.multi_reduction <maximumf>, %83, %cst_56 [1] : vector<8x8xf32> to vector<8xf32>
    %85 = vector.shape_cast %84 : vector<8xf32> to vector<8x1xf32>
    %86 = vector.broadcast %85 : vector<8x1xf32> to vector<8x8xf32>
    %87 = arith.subf %83, %86 : vector<8x8xf32>
    %88 = math.exp %87 : vector<8x8xf32>
    %cst_57 = arith.constant dense<0.000000e+00> : vector<8xf32>
    %89 = vector.multi_reduction <add>, %88, %cst_57 [1] : vector<8x8xf32> to vector<8xf32>
    %90 = vector.shape_cast %89 : vector<8xf32> to vector<8x1xf32>
    %91 = tpu.reciprocal %90 {approx = true} : vector<8x1xf32> -> vector<8x1xf32>
    %92 = vector.broadcast %91 : vector<8x1xf32> to vector<8x8xf32>
    %93 = arith.mulf %88, %92 : vector<8x8xf32>
    %94 = arith.truncf %93 : vector<8x8xf32> to vector<8x8xbf16>
    %95 = vector.extract_strided_slice %12 {offsets = [0, 64], sizes = [8, 64], strides = [1, 1]} : vector<8x512xbf16> to vector<8x64xbf16>
    %cst_58 = arith.constant dense<0.000000e+00> : vector<8x64xf32>
    %96 = tpu.matmul %94, %95, %cst_58 {dimension_numbers = #tpu.dot_dimension_numbers<[1], [0], [0], [1], [0, 0, 1, 1], [], []>} : vector<8x8xbf16>, vector<8x64xbf16>, vector<8x64xf32> -> vector<8x64xf32>
    %97 = arith.truncf %96 : vector<8x64xf32> to vector<8x64xbf16>
    %c0_59 = arith.constant 0 : index
    %c64 = arith.constant 64 : index
    %98 = vector.load %arg10[%c0_59, %c64] : memref<8x512xbf16, #tpu.memory_space<vmem>>, vector<8x64xbf16>
    tpu.vector_store %arg10[%c0_59, %c64], %97 {strides = array<i32>} : memref<8x512xbf16, #tpu.memory_space<vmem>>, vector<8x64xbf16>,
    %99 = vector.extract_strided_slice %8 {offsets = [0, 128], sizes = [8, 64], strides = [1, 1]} : vector<8x512xbf16> to vector<8x64xbf16>
    %100 = vector.extract_strided_slice %10 {offsets = [0, 128], sizes = [8, 64], strides = [1, 1]} : vector<8x512xbf16> to vector<8x64xbf16>
    %cst_60 = arith.constant dense<0.000000e+00> : vector<8x8xf32>
    %101 = tpu.matmul %99, %100, %cst_60 {dimension_numbers = #tpu.dot_dimension_numbers<[1], [1], [0], [0], [0, 0, 1, 0], [], []>} : vector<8x64xbf16>, vector<8x64xbf16>, vector<8x8xf32> -> vector<8x8xf32>
    %c2_61 = arith.constant 2 : index
    %c0_62 = arith.constant 0 : index
    %c0_63 = arith.constant 0 : index
    %102 = vector.load %arg3[%c2_61, %c0_62, %c0_63] : memref<8x15x64xbf16, #tpu.memory_space<vmem>>, vector<1x15x64xbf16>
    %103 = vector.shape_cast %102 : vector<1x15x64xbf16> to vector<15x64xbf16>
    %cst_64 = arith.constant dense<0.000000e+00> : vector<8x15xf32>
    %104 = tpu.matmul %99, %103, %cst_64 {dimension_numbers = #tpu.dot_dimension_numbers<[1], [1], [0], [0], [0, 0, 1, 0], [], []>} : vector<8x64xbf16>, vector<15x64xbf16>, vector<8x15xf32> -> vector<8x15xf32>
    %c2_65 = arith.constant 2 : index
    %c0_66 = arith.constant 0 : index
    %c0_67 = arith.constant 0 : index
    %105 = vector.load %arg5[%c2_65, %c0_66, %c0_67] : memref<8x1x15xf32, #tpu.memory_space<vmem>>, vector<1x1x15xf32>
    %106 = vector.shape_cast %105 : vector<1x1x15xf32> to vector<1x15xf32>
    %107 = vector.broadcast %106 : vector<1x15xf32> to vector<8x15xf32>
    %108 = arith.addf %104, %107 : vector<8x15xf32>
    %109 = vector.extract_strided_slice %108 {offsets = [0, 7], sizes = [1, 8], strides = [1, 1]} : vector<8x15xf32> to vector<1x8xf32>
    %c0_68 = arith.constant 0 : index
    %c0_69 = arith.constant 0 : index
    %110 = vector.load %arg9[%c0_68, %c0_69] : memref<8x8xf32, #tpu.memory_space<vmem>>, vector<1x8xf32>
    tpu.vector_store %arg9[%c0_68, %c0_69], %109 {strides = array<i32>} : memref<8x8xf32, #tpu.memory_space<vmem>>, vector<1x8xf32>,
    %111 = vector.extract_strided_slice %108 {offsets = [1, 6], sizes = [1, 8], strides = [1, 1]} : vector<8x15xf32> to vector<1x8xf32>
    %c1_70 = arith.constant 1 : index
    %c0_71 = arith.constant 0 : index
    %112 = vector.load %arg9[%c1_70, %c0_71] : memref<8x8xf32, #tpu.memory_space<vmem>>, vector<1x8xf32>
    tpu.vector_store %arg9[%c1_70, %c0_71], %111 {strides = array<i32>} : memref<8x8xf32, #tpu.memory_space<vmem>>, vector<1x8xf32>,
    %113 = vector.extract_strided_slice %108 {offsets = [2, 5], sizes = [1, 8], strides = [1, 1]} : vector<8x15xf32> to vector<1x8xf32>
    %c2_72 = arith.constant 2 : index
    %c0_73 = arith.constant 0 : index
    %114 = vector.load %arg9[%c2_72, %c0_73] : memref<8x8xf32, #tpu.memory_space<vmem>>, vector<1x8xf32>
    tpu.vector_store %arg9[%c2_72, %c0_73], %113 {strides = array<i32>} : memref<8x8xf32, #tpu.memory_space<vmem>>, vector<1x8xf32>,
    %115 = vector.extract_strided_slice %108 {offsets = [3, 4], sizes = [1, 8], strides = [1, 1]} : vector<8x15xf32> to vector<1x8xf32>
    %c3_74 = arith.constant 3 : index
    %c0_75 = arith.constant 0 : index
    %116 = vector.load %arg9[%c3_74, %c0_75] : memref<8x8xf32, #tpu.memory_space<vmem>>, vector<1x8xf32>
    tpu.vector_store %arg9[%c3_74, %c0_75], %115 {strides = array<i32>} : memref<8x8xf32, #tpu.memory_space<vmem>>, vector<1x8xf32>,
    %117 = vector.extract_strided_slice %108 {offsets = [4, 3], sizes = [1, 8], strides = [1, 1]} : vector<8x15xf32> to vector<1x8xf32>
    %c4_76 = arith.constant 4 : index
    %c0_77 = arith.constant 0 : index
    %118 = vector.load %arg9[%c4_76, %c0_77] : memref<8x8xf32, #tpu.memory_space<vmem>>, vector<1x8xf32>
    tpu.vector_store %arg9[%c4_76, %c0_77], %117 {strides = array<i32>} : memref<8x8xf32, #tpu.memory_space<vmem>>, vector<1x8xf32>,
    %119 = vector.extract_strided_slice %108 {offsets = [5, 2], sizes = [1, 8], strides = [1, 1]} : vector<8x15xf32> to vector<1x8xf32>
    %c5_78 = arith.constant 5 : index
    %c0_79 = arith.constant 0 : index
    %120 = vector.load %arg9[%c5_78, %c0_79] : memref<8x8xf32, #tpu.memory_space<vmem>>, vector<1x8xf32>
    tpu.vector_store %arg9[%c5_78, %c0_79], %119 {strides = array<i32>} : memref<8x8xf32, #tpu.memory_space<vmem>>, vector<1x8xf32>,
    %121 = vector.extract_strided_slice %108 {offsets = [6, 1], sizes = [1, 8], strides = [1, 1]} : vector<8x15xf32> to vector<1x8xf32>
    %c6_80 = arith.constant 6 : index
    %c0_81 = arith.constant 0 : index
    %122 = vector.load %arg9[%c6_80, %c0_81] : memref<8x8xf32, #tpu.memory_space<vmem>>, vector<1x8xf32>
    tpu.vector_store %arg9[%c6_80, %c0_81], %121 {strides = array<i32>} : memref<8x8xf32, #tpu.memory_space<vmem>>, vector<1x8xf32>,
    %123 = vector.extract_strided_slice %108 {offsets = [7, 0], sizes = [1, 8], strides = [1, 1]} : vector<8x15xf32> to vector<1x8xf32>
    %c7_82 = arith.constant 7 : index
    %c0_83 = arith.constant 0 : index
    %124 = vector.load %arg9[%c7_82, %c0_83] : memref<8x8xf32, #tpu.memory_space<vmem>>, vector<1x8xf32>
    tpu.vector_store %arg9[%c7_82, %c0_83], %123 {strides = array<i32>} : memref<8x8xf32, #tpu.memory_space<vmem>>, vector<1x8xf32>,
    %c0_84 = arith.constant 0 : index
    %c0_85 = arith.constant 0 : index
    %125 = vector.load %arg9[%c0_84, %c0_85] : memref<8x8xf32, #tpu.memory_space<vmem>>, vector<8x8xf32>
    %126 = arith.addf %101, %125 : vector<8x8xf32>
    %cst_86 = arith.constant dense<0xFF800000> : vector<8xf32>
    %127 = vector.multi_reduction <maximumf>, %126, %cst_86 [1] : vector<8x8xf32> to vector<8xf32>
    %128 = vector.shape_cast %127 : vector<8xf32> to vector<8x1xf32>
    %129 = vector.broadcast %128 : vector<8x1xf32> to vector<8x8xf32>
    %130 = arith.subf %126, %129 : vector<8x8xf32>
    %131 = math.exp %130 : vector<8x8xf32>
    %cst_87 = arith.constant dense<0.000000e+00> : vector<8xf32>
    %132 = vector.multi_reduction <add>, %131, %cst_87 [1] : vector<8x8xf32> to vector<8xf32>
    %133 = vector.shape_cast %132 : vector<8xf32> to vector<8x1xf32>
    %134 = tpu.reciprocal %133 {approx = true} : vector<8x1xf32> -> vector<8x1xf32>
    %135 = vector.broadcast %134 : vector<8x1xf32> to vector<8x8xf32>
    %136 = arith.mulf %131, %135 : vector<8x8xf32>
    %137 = arith.truncf %136 : vector<8x8xf32> to vector<8x8xbf16>
    %138 = vector.extract_strided_slice %12 {offsets = [0, 128], sizes = [8, 64], strides = [1, 1]} : vector<8x512xbf16> to vector<8x64xbf16>
    %cst_88 = arith.constant dense<0.000000e+00> : vector<8x64xf32>
    %139 = tpu.matmul %137, %138, %cst_88 {dimension_numbers = #tpu.dot_dimension_numbers<[1], [0], [0], [1], [0, 0, 1, 1], [], []>} : vector<8x8xbf16>, vector<8x64xbf16>, vector<8x64xf32> -> vector<8x64xf32>
    %140 = arith.truncf %139 : vector<8x64xf32> to vector<8x64xbf16>
    %c0_89 = arith.constant 0 : index
    %c128 = arith.constant 128 : index
    %141 = vector.load %arg10[%c0_89, %c128] : memref<8x512xbf16, #tpu.memory_space<vmem>>, vector<8x64xbf16>
    tpu.vector_store %arg10[%c0_89, %c128], %140 {strides = array<i32>} : memref<8x512xbf16, #tpu.memory_space<vmem>>, vector<8x64xbf16>,
    %142 = vector.extract_strided_slice %8 {offsets = [0, 192], sizes = [8, 64], strides = [1, 1]} : vector<8x512xbf16> to vector<8x64xbf16>
    %143 = vector.extract_strided_slice %10 {offsets = [0, 192], sizes = [8, 64], strides = [1, 1]} : vector<8x512xbf16> to vector<8x64xbf16>
    %cst_90 = arith.constant dense<0.000000e+00> : vector<8x8xf32>
    %144 = tpu.matmul %142, %143, %cst_90 {dimension_numbers = #tpu.dot_dimension_numbers<[1], [1], [0], [0], [0, 0, 1, 0], [], []>} : vector<8x64xbf16>, vector<8x64xbf16>, vector<8x8xf32> -> vector<8x8xf32>
    %c3_91 = arith.constant 3 : index
    %c0_92 = arith.constant 0 : index
    %c0_93 = arith.constant 0 : index
    %145 = vector.load %arg3[%c3_91, %c0_92, %c0_93] : memref<8x15x64xbf16, #tpu.memory_space<vmem>>, vector<1x15x64xbf16>
    %146 = vector.shape_cast %145 : vector<1x15x64xbf16> to vector<15x64xbf16>
    %cst_94 = arith.constant dense<0.000000e+00> : vector<8x15xf32>
    %147 = tpu.matmul %142, %146, %cst_94 {dimension_numbers = #tpu.dot_dimension_numbers<[1], [1], [0], [0], [0, 0, 1, 0], [], []>} : vector<8x64xbf16>, vector<15x64xbf16>, vector<8x15xf32> -> vector<8x15xf32>
    %c3_95 = arith.constant 3 : index
    %c0_96 = arith.constant 0 : index
    %c0_97 = arith.constant 0 : index
    %148 = vector.load %arg5[%c3_95, %c0_96, %c0_97] : memref<8x1x15xf32, #tpu.memory_space<vmem>>, vector<1x1x15xf32>
    %149 = vector.shape_cast %148 : vector<1x1x15xf32> to vector<1x15xf32>
    %150 = vector.broadcast %149 : vector<1x15xf32> to vector<8x15xf32>
    %151 = arith.addf %147, %150 : vector<8x15xf32>
    %152 = vector.extract_strided_slice %151 {offsets = [0, 7], sizes = [1, 8], strides = [1, 1]} : vector<8x15xf32> to vector<1x8xf32>
    %c0_98 = arith.constant 0 : index
    %c0_99 = arith.constant 0 : index
    %153 = vector.load %arg9[%c0_98, %c0_99] : memref<8x8xf32, #tpu.memory_space<vmem>>, vector<1x8xf32>
    tpu.vector_store %arg9[%c0_98, %c0_99], %152 {strides = array<i32>} : memref<8x8xf32, #tpu.memory_space<vmem>>, vector<1x8xf32>,
    %154 = vector.extract_strided_slice %151 {offsets = [1, 6], sizes = [1, 8], strides = [1, 1]} : vector<8x15xf32> to vector<1x8xf32>
    %c1_100 = arith.constant 1 : index
    %c0_101 = arith.constant 0 : index
    %155 = vector.load %arg9[%c1_100, %c0_101] : memref<8x8xf32, #tpu.memory_space<vmem>>, vector<1x8xf32>
    tpu.vector_store %arg9[%c1_100, %c0_101], %154 {strides = array<i32>} : memref<8x8xf32, #tpu.memory_space<vmem>>, vector<1x8xf32>,
    %156 = vector.extract_strided_slice %151 {offsets = [2, 5], sizes = [1, 8], strides = [1, 1]} : vector<8x15xf32> to vector<1x8xf32>
    %c2_102 = arith.constant 2 : index
    %c0_103 = arith.constant 0 : index
    %157 = vector.load %arg9[%c2_102, %c0_103] : memref<8x8xf32, #tpu.memory_space<vmem>>, vector<1x8xf32>
    tpu.vector_store %arg9[%c2_102, %c0_103], %156 {strides = array<i32>} : memref<8x8xf32, #tpu.memory_space<vmem>>, vector<1x8xf32>,
    %158 = vector.extract_strided_slice %151 {offsets = [3, 4], sizes = [1, 8], strides = [1, 1]} : vector<8x15xf32> to vector<1x8xf32>
    %c3_104 = arith.constant 3 : index
    %c0_105 = arith.constant 0 : index
    %159 = vector.load %arg9[%c3_104, %c0_105] : memref<8x8xf32, #tpu.memory_space<vmem>>, vector<1x8xf32>
    tpu.vector_store %arg9[%c3_104, %c0_105], %158 {strides = array<i32>} : memref<8x8xf32, #tpu.memory_space<vmem>>, vector<1x8xf32>,
    %160 = vector.extract_strided_slice %151 {offsets = [4, 3], sizes = [1, 8], strides = [1, 1]} : vector<8x15xf32> to vector<1x8xf32>
    %c4_106 = arith.constant 4 : index
    %c0_107 = arith.constant 0 : index
    %161 = vector.load %arg9[%c4_106, %c0_107] : memref<8x8xf32, #tpu.memory_space<vmem>>, vector<1x8xf32>
    tpu.vector_store %arg9[%c4_106, %c0_107], %160 {strides = array<i32>} : memref<8x8xf32, #tpu.memory_space<vmem>>, vector<1x8xf32>,
    %162 = vector.extract_strided_slice %151 {offsets = [5, 2], sizes = [1, 8], strides = [1, 1]} : vector<8x15xf32> to vector<1x8xf32>
    %c5_108 = arith.constant 5 : index
    %c0_109 = arith.constant 0 : index
    %163 = vector.load %arg9[%c5_108, %c0_109] : memref<8x8xf32, #tpu.memory_space<vmem>>, vector<1x8xf32>
    tpu.vector_store %arg9[%c5_108, %c0_109], %162 {strides = array<i32>} : memref<8x8xf32, #tpu.memory_space<vmem>>, vector<1x8xf32>,
    %164 = vector.extract_strided_slice %151 {offsets = [6, 1], sizes = [1, 8], strides = [1, 1]} : vector<8x15xf32> to vector<1x8xf32>
    %c6_110 = arith.constant 6 : index
    %c0_111 = arith.constant 0 : index
    %165 = vector.load %arg9[%c6_110, %c0_111] : memref<8x8xf32, #tpu.memory_space<vmem>>, vector<1x8xf32>
    tpu.vector_store %arg9[%c6_110, %c0_111], %164 {strides = array<i32>} : memref<8x8xf32, #tpu.memory_space<vmem>>, vector<1x8xf32>,
    %166 = vector.extract_strided_slice %151 {offsets = [7, 0], sizes = [1, 8], strides = [1, 1]} : vector<8x15xf32> to vector<1x8xf32>
    %c7_112 = arith.constant 7 : index
    %c0_113 = arith.constant 0 : index
    %167 = vector.load %arg9[%c7_112, %c0_113] : memref<8x8xf32, #tpu.memory_space<vmem>>, vector<1x8xf32>
    tpu.vector_store %arg9[%c7_112, %c0_113], %166 {strides = array<i32>} : memref<8x8xf32, #tpu.memory_space<vmem>>, vector<1x8xf32>,
    %c0_114 = arith.constant 0 : index
    %c0_115 = arith.constant 0 : index
    %168 = vector.load %arg9[%c0_114, %c0_115] : memref<8x8xf32, #tpu.memory_space<vmem>>, vector<8x8xf32>
    %169 = arith.addf %144, %168 : vector<8x8xf32>
    %cst_116 = arith.constant dense<0xFF800000> : vector<8xf32>
    %170 = vector.multi_reduction <maximumf>, %169, %cst_116 [1] : vector<8x8xf32> to vector<8xf32>
    %171 = vector.shape_cast %170 : vector<8xf32> to vector<8x1xf32>
    %172 = vector.broadcast %171 : vector<8x1xf32> to vector<8x8xf32>
    %173 = arith.subf %169, %172 : vector<8x8xf32>
    %174 = math.exp %173 : vector<8x8xf32>
    %cst_117 = arith.constant dense<0.000000e+00> : vector<8xf32>
    %175 = vector.multi_reduction <add>, %174, %cst_117 [1] : vector<8x8xf32> to vector<8xf32>
    %176 = vector.shape_cast %175 : vector<8xf32> to vector<8x1xf32>
    %177 = tpu.reciprocal %176 {approx = true} : vector<8x1xf32> -> vector<8x1xf32>
    %178 = vector.broadcast %177 : vector<8x1xf32> to vector<8x8xf32>
    %179 = arith.mulf %174, %178 : vector<8x8xf32>
    %180 = arith.truncf %179 : vector<8x8xf32> to vector<8x8xbf16>
    %181 = vector.extract_strided_slice %12 {offsets = [0, 192], sizes = [8, 64], strides = [1, 1]} : vector<8x512xbf16> to vector<8x64xbf16>
    %cst_118 = arith.constant dense<0.000000e+00> : vector<8x64xf32>
    %182 = tpu.matmul %180, %181, %cst_118 {dimension_numbers = #tpu.dot_dimension_numbers<[1], [0], [0], [1], [0, 0, 1, 1], [], []>} : vector<8x8xbf16>, vector<8x64xbf16>, vector<8x64xf32> -> vector<8x64xf32>
    %183 = arith.truncf %182 : vector<8x64xf32> to vector<8x64xbf16>
    %c0_119 = arith.constant 0 : index
    %c192 = arith.constant 192 : index
    %184 = vector.load %arg10[%c0_119, %c192] : memref<8x512xbf16, #tpu.memory_space<vmem>>, vector<8x64xbf16>
    tpu.vector_store %arg10[%c0_119, %c192], %183 {strides = array<i32>} : memref<8x512xbf16, #tpu.memory_space<vmem>>, vector<8x64xbf16>,
    %185 = vector.extract_strided_slice %8 {offsets = [0, 256], sizes = [8, 64], strides = [1, 1]} : vector<8x512xbf16> to vector<8x64xbf16>
    %186 = vector.extract_strided_slice %10 {offsets = [0, 256], sizes = [8, 64], strides = [1, 1]} : vector<8x512xbf16> to vector<8x64xbf16>
    %cst_120 = arith.constant dense<0.000000e+00> : vector<8x8xf32>
    %187 = tpu.matmul %185, %186, %cst_120 {dimension_numbers = #tpu.dot_dimension_numbers<[1], [1], [0], [0], [0, 0, 1, 0], [], []>} : vector<8x64xbf16>, vector<8x64xbf16>, vector<8x8xf32> -> vector<8x8xf32>
    %c4_121 = arith.constant 4 : index
    %c0_122 = arith.constant 0 : index
    %c0_123 = arith.constant 0 : index
    %188 = vector.load %arg3[%c4_121, %c0_122, %c0_123] : memref<8x15x64xbf16, #tpu.memory_space<vmem>>, vector<1x15x64xbf16>
    %189 = vector.shape_cast %188 : vector<1x15x64xbf16> to vector<15x64xbf16>
    %cst_124 = arith.constant dense<0.000000e+00> : vector<8x15xf32>
    %190 = tpu.matmul %185, %189, %cst_124 {dimension_numbers = #tpu.dot_dimension_numbers<[1], [1], [0], [0], [0, 0, 1, 0], [], []>} : vector<8x64xbf16>, vector<15x64xbf16>, vector<8x15xf32> -> vector<8x15xf32>
    %c4_125 = arith.constant 4 : index
    %c0_126 = arith.constant 0 : index
    %c0_127 = arith.constant 0 : index
    %191 = vector.load %arg5[%c4_125, %c0_126, %c0_127] : memref<8x1x15xf32, #tpu.memory_space<vmem>>, vector<1x1x15xf32>
    %192 = vector.shape_cast %191 : vector<1x1x15xf32> to vector<1x15xf32>
    %193 = vector.broadcast %192 : vector<1x15xf32> to vector<8x15xf32>
    %194 = arith.addf %190, %193 : vector<8x15xf32>
    %195 = vector.extract_strided_slice %194 {offsets = [0, 7], sizes = [1, 8], strides = [1, 1]} : vector<8x15xf32> to vector<1x8xf32>
    %c0_128 = arith.constant 0 : index
    %c0_129 = arith.constant 0 : index
    %196 = vector.load %arg9[%c0_128, %c0_129] : memref<8x8xf32, #tpu.memory_space<vmem>>, vector<1x8xf32>
    tpu.vector_store %arg9[%c0_128, %c0_129], %195 {strides = array<i32>} : memref<8x8xf32, #tpu.memory_space<vmem>>, vector<1x8xf32>,
    %197 = vector.extract_strided_slice %194 {offsets = [1, 6], sizes = [1, 8], strides = [1, 1]} : vector<8x15xf32> to vector<1x8xf32>
    %c1_130 = arith.constant 1 : index
    %c0_131 = arith.constant 0 : index
    %198 = vector.load %arg9[%c1_130, %c0_131] : memref<8x8xf32, #tpu.memory_space<vmem>>, vector<1x8xf32>
    tpu.vector_store %arg9[%c1_130, %c0_131], %197 {strides = array<i32>} : memref<8x8xf32, #tpu.memory_space<vmem>>, vector<1x8xf32>,
    %199 = vector.extract_strided_slice %194 {offsets = [2, 5], sizes = [1, 8], strides = [1, 1]} : vector<8x15xf32> to vector<1x8xf32>
    %c2_132 = arith.constant 2 : index
    %c0_133 = arith.constant 0 : index
    %200 = vector.load %arg9[%c2_132, %c0_133] : memref<8x8xf32, #tpu.memory_space<vmem>>, vector<1x8xf32>
    tpu.vector_store %arg9[%c2_132, %c0_133], %199 {strides = array<i32>} : memref<8x8xf32, #tpu.memory_space<vmem>>, vector<1x8xf32>,
    %201 = vector.extract_strided_slice %194 {offsets = [3, 4], sizes = [1, 8], strides = [1, 1]} : vector<8x15xf32> to vector<1x8xf32>
    %c3_134 = arith.constant 3 : index
    %c0_135 = arith.constant 0 : index
    %202 = vector.load %arg9[%c3_134, %c0_135] : memref<8x8xf32, #tpu.memory_space<vmem>>, vector<1x8xf32>
    tpu.vector_store %arg9[%c3_134, %c0_135], %201 {strides = array<i32>} : memref<8x8xf32, #tpu.memory_space<vmem>>, vector<1x8xf32>,
    %203 = vector.extract_strided_slice %194 {offsets = [4, 3], sizes = [1, 8], strides = [1, 1]} : vector<8x15xf32> to vector<1x8xf32>
    %c4_136 = arith.constant 4 : index
    %c0_137 = arith.constant 0 : index
    %204 = vector.load %arg9[%c4_136, %c0_137] : memref<8x8xf32, #tpu.memory_space<vmem>>, vector<1x8xf32>
    tpu.vector_store %arg9[%c4_136, %c0_137], %203 {strides = array<i32>} : memref<8x8xf32, #tpu.memory_space<vmem>>, vector<1x8xf32>,
    %205 = vector.extract_strided_slice %194 {offsets = [5, 2], sizes = [1, 8], strides = [1, 1]} : vector<8x15xf32> to vector<1x8xf32>
    %c5_138 = arith.constant 5 : index
    %c0_139 = arith.constant 0 : index
    %206 = vector.load %arg9[%c5_138, %c0_139] : memref<8x8xf32, #tpu.memory_space<vmem>>, vector<1x8xf32>
    tpu.vector_store %arg9[%c5_138, %c0_139], %205 {strides = array<i32>} : memref<8x8xf32, #tpu.memory_space<vmem>>, vector<1x8xf32>,
    %207 = vector.extract_strided_slice %194 {offsets = [6, 1], sizes = [1, 8], strides = [1, 1]} : vector<8x15xf32> to vector<1x8xf32>
    %c6_140 = arith.constant 6 : index
    %c0_141 = arith.constant 0 : index
    %208 = vector.load %arg9[%c6_140, %c0_141] : memref<8x8xf32, #tpu.memory_space<vmem>>, vector<1x8xf32>
    tpu.vector_store %arg9[%c6_140, %c0_141], %207 {strides = array<i32>} : memref<8x8xf32, #tpu.memory_space<vmem>>, vector<1x8xf32>,
    %209 = vector.extract_strided_slice %194 {offsets = [7, 0], sizes = [1, 8], strides = [1, 1]} : vector<8x15xf32> to vector<1x8xf32>
    %c7_142 = arith.constant 7 : index
    %c0_143 = arith.constant 0 : index
    %210 = vector.load %arg9[%c7_142, %c0_143] : memref<8x8xf32, #tpu.memory_space<vmem>>, vector<1x8xf32>
    tpu.vector_store %arg9[%c7_142, %c0_143], %209 {strides = array<i32>} : memref<8x8xf32, #tpu.memory_space<vmem>>, vector<1x8xf32>,
    %c0_144 = arith.constant 0 : index
    %c0_145 = arith.constant 0 : index
    %211 = vector.load %arg9[%c0_144, %c0_145] : memref<8x8xf32, #tpu.memory_space<vmem>>, vector<8x8xf32>
    %212 = arith.addf %187, %211 : vector<8x8xf32>
    %cst_146 = arith.constant dense<0xFF800000> : vector<8xf32>
    %213 = vector.multi_reduction <maximumf>, %212, %cst_146 [1] : vector<8x8xf32> to vector<8xf32>
    %214 = vector.shape_cast %213 : vector<8xf32> to vector<8x1xf32>
    %215 = vector.broadcast %214 : vector<8x1xf32> to vector<8x8xf32>
    %216 = arith.subf %212, %215 : vector<8x8xf32>
    %217 = math.exp %216 : vector<8x8xf32>
    %cst_147 = arith.constant dense<0.000000e+00> : vector<8xf32>
    %218 = vector.multi_reduction <add>, %217, %cst_147 [1] : vector<8x8xf32> to vector<8xf32>
    %219 = vector.shape_cast %218 : vector<8xf32> to vector<8x1xf32>
    %220 = tpu.reciprocal %219 {approx = true} : vector<8x1xf32> -> vector<8x1xf32>
    %221 = vector.broadcast %220 : vector<8x1xf32> to vector<8x8xf32>
    %222 = arith.mulf %217, %221 : vector<8x8xf32>
    %223 = arith.truncf %222 : vector<8x8xf32> to vector<8x8xbf16>
    %224 = vector.extract_strided_slice %12 {offsets = [0, 256], sizes = [8, 64], strides = [1, 1]} : vector<8x512xbf16> to vector<8x64xbf16>
    %cst_148 = arith.constant dense<0.000000e+00> : vector<8x64xf32>
    %225 = tpu.matmul %223, %224, %cst_148 {dimension_numbers = #tpu.dot_dimension_numbers<[1], [0], [0], [1], [0, 0, 1, 1], [], []>} : vector<8x8xbf16>, vector<8x64xbf16>, vector<8x64xf32> -> vector<8x64xf32>
    %226 = arith.truncf %225 : vector<8x64xf32> to vector<8x64xbf16>
    %c0_149 = arith.constant 0 : index
    %c256 = arith.constant 256 : index
    %227 = vector.load %arg10[%c0_149, %c256] : memref<8x512xbf16, #tpu.memory_space<vmem>>, vector<8x64xbf16>
    tpu.vector_store %arg10[%c0_149, %c256], %226 {strides = array<i32>} : memref<8x512xbf16, #tpu.memory_space<vmem>>, vector<8x64xbf16>,
    %228 = vector.extract_strided_slice %8 {offsets = [0, 320], sizes = [8, 64], strides = [1, 1]} : vector<8x512xbf16> to vector<8x64xbf16>
    %229 = vector.extract_strided_slice %10 {offsets = [0, 320], sizes = [8, 64], strides = [1, 1]} : vector<8x512xbf16> to vector<8x64xbf16>
    %cst_150 = arith.constant dense<0.000000e+00> : vector<8x8xf32>
    %230 = tpu.matmul %228, %229, %cst_150 {dimension_numbers = #tpu.dot_dimension_numbers<[1], [1], [0], [0], [0, 0, 1, 0], [], []>} : vector<8x64xbf16>, vector<8x64xbf16>, vector<8x8xf32> -> vector<8x8xf32>
    %c5_151 = arith.constant 5 : index
    %c0_152 = arith.constant 0 : index
    %c0_153 = arith.constant 0 : index
    %231 = vector.load %arg3[%c5_151, %c0_152, %c0_153] : memref<8x15x64xbf16, #tpu.memory_space<vmem>>, vector<1x15x64xbf16>
    %232 = vector.shape_cast %231 : vector<1x15x64xbf16> to vector<15x64xbf16>
    %cst_154 = arith.constant dense<0.000000e+00> : vector<8x15xf32>
    %233 = tpu.matmul %228, %232, %cst_154 {dimension_numbers = #tpu.dot_dimension_numbers<[1], [1], [0], [0], [0, 0, 1, 0], [], []>} : vector<8x64xbf16>, vector<15x64xbf16>, vector<8x15xf32> -> vector<8x15xf32>
    %c5_155 = arith.constant 5 : index
    %c0_156 = arith.constant 0 : index
    %c0_157 = arith.constant 0 : index
    %234 = vector.load %arg5[%c5_155, %c0_156, %c0_157] : memref<8x1x15xf32, #tpu.memory_space<vmem>>, vector<1x1x15xf32>
    %235 = vector.shape_cast %234 : vector<1x1x15xf32> to vector<1x15xf32>
    %236 = vector.broadcast %235 : vector<1x15xf32> to vector<8x15xf32>
    %237 = arith.addf %233, %236 : vector<8x15xf32>
    %238 = vector.extract_strided_slice %237 {offsets = [0, 7], sizes = [1, 8], strides = [1, 1]} : vector<8x15xf32> to vector<1x8xf32>
    %c0_158 = arith.constant 0 : index
    %c0_159 = arith.constant 0 : index
    %239 = vector.load %arg9[%c0_158, %c0_159] : memref<8x8xf32, #tpu.memory_space<vmem>>, vector<1x8xf32>
    tpu.vector_store %arg9[%c0_158, %c0_159], %238 {strides = array<i32>} : memref<8x8xf32, #tpu.memory_space<vmem>>, vector<1x8xf32>,
    %240 = vector.extract_strided_slice %237 {offsets = [1, 6], sizes = [1, 8], strides = [1, 1]} : vector<8x15xf32> to vector<1x8xf32>
    %c1_160 = arith.constant 1 : index
    %c0_161 = arith.constant 0 : index
    %241 = vector.load %arg9[%c1_160, %c0_161] : memref<8x8xf32, #tpu.memory_space<vmem>>, vector<1x8xf32>
    tpu.vector_store %arg9[%c1_160, %c0_161], %240 {strides = array<i32>} : memref<8x8xf32, #tpu.memory_space<vmem>>, vector<1x8xf32>,
    %242 = vector.extract_strided_slice %237 {offsets = [2, 5], sizes = [1, 8], strides = [1, 1]} : vector<8x15xf32> to vector<1x8xf32>
    %c2_162 = arith.constant 2 : index
    %c0_163 = arith.constant 0 : index
    %243 = vector.load %arg9[%c2_162, %c0_163] : memref<8x8xf32, #tpu.memory_space<vmem>>, vector<1x8xf32>
    tpu.vector_store %arg9[%c2_162, %c0_163], %242 {strides = array<i32>} : memref<8x8xf32, #tpu.memory_space<vmem>>, vector<1x8xf32>,
    %244 = vector.extract_strided_slice %237 {offsets = [3, 4], sizes = [1, 8], strides = [1, 1]} : vector<8x15xf32> to vector<1x8xf32>
    %c3_164 = arith.constant 3 : index
    %c0_165 = arith.constant 0 : index
    %245 = vector.load %arg9[%c3_164, %c0_165] : memref<8x8xf32, #tpu.memory_space<vmem>>, vector<1x8xf32>
    tpu.vector_store %arg9[%c3_164, %c0_165], %244 {strides = array<i32>} : memref<8x8xf32, #tpu.memory_space<vmem>>, vector<1x8xf32>,
    %246 = vector.extract_strided_slice %237 {offsets = [4, 3], sizes = [1, 8], strides = [1, 1]} : vector<8x15xf32> to vector<1x8xf32>
    %c4_166 = arith.constant 4 : index
    %c0_167 = arith.constant 0 : index
    %247 = vector.load %arg9[%c4_166, %c0_167] : memref<8x8xf32, #tpu.memory_space<vmem>>, vector<1x8xf32>
    tpu.vector_store %arg9[%c4_166, %c0_167], %246 {strides = array<i32>} : memref<8x8xf32, #tpu.memory_space<vmem>>, vector<1x8xf32>,
    %248 = vector.extract_strided_slice %237 {offsets = [5, 2], sizes = [1, 8], strides = [1, 1]} : vector<8x15xf32> to vector<1x8xf32>
    %c5_168 = arith.constant 5 : index
    %c0_169 = arith.constant 0 : index
    %249 = vector.load %arg9[%c5_168, %c0_169] : memref<8x8xf32, #tpu.memory_space<vmem>>, vector<1x8xf32>
    tpu.vector_store %arg9[%c5_168, %c0_169], %248 {strides = array<i32>} : memref<8x8xf32, #tpu.memory_space<vmem>>, vector<1x8xf32>,
    %250 = vector.extract_strided_slice %237 {offsets = [6, 1], sizes = [1, 8], strides = [1, 1]} : vector<8x15xf32> to vector<1x8xf32>
    %c6_170 = arith.constant 6 : index
    %c0_171 = arith.constant 0 : index
    %251 = vector.load %arg9[%c6_170, %c0_171] : memref<8x8xf32, #tpu.memory_space<vmem>>, vector<1x8xf32>
    tpu.vector_store %arg9[%c6_170, %c0_171], %250 {strides = array<i32>} : memref<8x8xf32, #tpu.memory_space<vmem>>, vector<1x8xf32>,
    %252 = vector.extract_strided_slice %237 {offsets = [7, 0], sizes = [1, 8], strides = [1, 1]} : vector<8x15xf32> to vector<1x8xf32>
    %c7_172 = arith.constant 7 : index
    %c0_173 = arith.constant 0 : index
    %253 = vector.load %arg9[%c7_172, %c0_173] : memref<8x8xf32, #tpu.memory_space<vmem>>, vector<1x8xf32>
    tpu.vector_store %arg9[%c7_172, %c0_173], %252 {strides = array<i32>} : memref<8x8xf32, #tpu.memory_space<vmem>>, vector<1x8xf32>,
    %c0_174 = arith.constant 0 : index
    %c0_175 = arith.constant 0 : index
    %254 = vector.load %arg9[%c0_174, %c0_175] : memref<8x8xf32, #tpu.memory_space<vmem>>, vector<8x8xf32>
    %255 = arith.addf %230, %254 : vector<8x8xf32>
    %cst_176 = arith.constant dense<0xFF800000> : vector<8xf32>
    %256 = vector.multi_reduction <maximumf>, %255, %cst_176 [1] : vector<8x8xf32> to vector<8xf32>
    %257 = vector.shape_cast %256 : vector<8xf32> to vector<8x1xf32>
    %258 = vector.broadcast %257 : vector<8x1xf32> to vector<8x8xf32>
    %259 = arith.subf %255, %258 : vector<8x8xf32>
    %260 = math.exp %259 : vector<8x8xf32>
    %cst_177 = arith.constant dense<0.000000e+00> : vector<8xf32>
    %261 = vector.multi_reduction <add>, %260, %cst_177 [1] : vector<8x8xf32> to vector<8xf32>
    %262 = vector.shape_cast %261 : vector<8xf32> to vector<8x1xf32>
    %263 = tpu.reciprocal %262 {approx = true} : vector<8x1xf32> -> vector<8x1xf32>
    %264 = vector.broadcast %263 : vector<8x1xf32> to vector<8x8xf32>
    %265 = arith.mulf %260, %264 : vector<8x8xf32>
    %266 = arith.truncf %265 : vector<8x8xf32> to vector<8x8xbf16>
    %267 = vector.extract_strided_slice %12 {offsets = [0, 320], sizes = [8, 64], strides = [1, 1]} : vector<8x512xbf16> to vector<8x64xbf16>
    %cst_178 = arith.constant dense<0.000000e+00> : vector<8x64xf32>
    %268 = tpu.matmul %266, %267, %cst_178 {dimension_numbers = #tpu.dot_dimension_numbers<[1], [0], [0], [1], [0, 0, 1, 1], [], []>} : vector<8x8xbf16>, vector<8x64xbf16>, vector<8x64xf32> -> vector<8x64xf32>
    %269 = arith.truncf %268 : vector<8x64xf32> to vector<8x64xbf16>
    %c0_179 = arith.constant 0 : index
    %c320 = arith.constant 320 : index
    %270 = vector.load %arg10[%c0_179, %c320] : memref<8x512xbf16, #tpu.memory_space<vmem>>, vector<8x64xbf16>
    tpu.vector_store %arg10[%c0_179, %c320], %269 {strides = array<i32>} : memref<8x512xbf16, #tpu.memory_space<vmem>>, vector<8x64xbf16>,
    %271 = vector.extract_strided_slice %8 {offsets = [0, 384], sizes = [8, 64], strides = [1, 1]} : vector<8x512xbf16> to vector<8x64xbf16>
    %272 = vector.extract_strided_slice %10 {offsets = [0, 384], sizes = [8, 64], strides = [1, 1]} : vector<8x512xbf16> to vector<8x64xbf16>
    %cst_180 = arith.constant dense<0.000000e+00> : vector<8x8xf32>
    %273 = tpu.matmul %271, %272, %cst_180 {dimension_numbers = #tpu.dot_dimension_numbers<[1], [1], [0], [0], [0, 0, 1, 0], [], []>} : vector<8x64xbf16>, vector<8x64xbf16>, vector<8x8xf32> -> vector<8x8xf32>
    %c6_181 = arith.constant 6 : index
    %c0_182 = arith.constant 0 : index
    %c0_183 = arith.constant 0 : index
    %274 = vector.load %arg3[%c6_181, %c0_182, %c0_183] : memref<8x15x64xbf16, #tpu.memory_space<vmem>>, vector<1x15x64xbf16>
    %275 = vector.shape_cast %274 : vector<1x15x64xbf16> to vector<15x64xbf16>
    %cst_184 = arith.constant dense<0.000000e+00> : vector<8x15xf32>
    %276 = tpu.matmul %271, %275, %cst_184 {dimension_numbers = #tpu.dot_dimension_numbers<[1], [1], [0], [0], [0, 0, 1, 0], [], []>} : vector<8x64xbf16>, vector<15x64xbf16>, vector<8x15xf32> -> vector<8x15xf32>
    %c6_185 = arith.constant 6 : index
    %c0_186 = arith.constant 0 : index
    %c0_187 = arith.constant 0 : index
    %277 = vector.load %arg5[%c6_185, %c0_186, %c0_187] : memref<8x1x15xf32, #tpu.memory_space<vmem>>, vector<1x1x15xf32>
    %278 = vector.shape_cast %277 : vector<1x1x15xf32> to vector<1x15xf32>
    %279 = vector.broadcast %278 : vector<1x15xf32> to vector<8x15xf32>
    %280 = arith.addf %276, %279 : vector<8x15xf32>
    %281 = vector.extract_strided_slice %280 {offsets = [0, 7], sizes = [1, 8], strides = [1, 1]} : vector<8x15xf32> to vector<1x8xf32>
    %c0_188 = arith.constant 0 : index
    %c0_189 = arith.constant 0 : index
    %282 = vector.load %arg9[%c0_188, %c0_189] : memref<8x8xf32, #tpu.memory_space<vmem>>, vector<1x8xf32>
    tpu.vector_store %arg9[%c0_188, %c0_189], %281 {strides = array<i32>} : memref<8x8xf32, #tpu.memory_space<vmem>>, vector<1x8xf32>,
    %283 = vector.extract_strided_slice %280 {offsets = [1, 6], sizes = [1, 8], strides = [1, 1]} : vector<8x15xf32> to vector<1x8xf32>
    %c1_190 = arith.constant 1 : index
    %c0_191 = arith.constant 0 : index
    %284 = vector.load %arg9[%c1_190, %c0_191] : memref<8x8xf32, #tpu.memory_space<vmem>>, vector<1x8xf32>
    tpu.vector_store %arg9[%c1_190, %c0_191], %283 {strides = array<i32>} : memref<8x8xf32, #tpu.memory_space<vmem>>, vector<1x8xf32>,
    %285 = vector.extract_strided_slice %280 {offsets = [2, 5], sizes = [1, 8], strides = [1, 1]} : vector<8x15xf32> to vector<1x8xf32>
    %c2_192 = arith.constant 2 : index
    %c0_193 = arith.constant 0 : index
    %286 = vector.load %arg9[%c2_192, %c0_193] : memref<8x8xf32, #tpu.memory_space<vmem>>, vector<1x8xf32>
    tpu.vector_store %arg9[%c2_192, %c0_193], %285 {strides = array<i32>} : memref<8x8xf32, #tpu.memory_space<vmem>>, vector<1x8xf32>,
    %287 = vector.extract_strided_slice %280 {offsets = [3, 4], sizes = [1, 8], strides = [1, 1]} : vector<8x15xf32> to vector<1x8xf32>
    %c3_194 = arith.constant 3 : index
    %c0_195 = arith.constant 0 : index
    %288 = vector.load %arg9[%c3_194, %c0_195] : memref<8x8xf32, #tpu.memory_space<vmem>>, vector<1x8xf32>
    tpu.vector_store %arg9[%c3_194, %c0_195], %287 {strides = array<i32>} : memref<8x8xf32, #tpu.memory_space<vmem>>, vector<1x8xf32>,
    %289 = vector.extract_strided_slice %280 {offsets = [4, 3], sizes = [1, 8], strides = [1, 1]} : vector<8x15xf32> to vector<1x8xf32>
    %c4_196 = arith.constant 4 : index
    %c0_197 = arith.constant 0 : index
    %290 = vector.load %arg9[%c4_196, %c0_197] : memref<8x8xf32, #tpu.memory_space<vmem>>, vector<1x8xf32>
    tpu.vector_store %arg9[%c4_196, %c0_197], %289 {strides = array<i32>} : memref<8x8xf32, #tpu.memory_space<vmem>>, vector<1x8xf32>,
    %291 = vector.extract_strided_slice %280 {offsets = [5, 2], sizes = [1, 8], strides = [1, 1]} : vector<8x15xf32> to vector<1x8xf32>
    %c5_198 = arith.constant 5 : index
    %c0_199 = arith.constant 0 : index
    %292 = vector.load %arg9[%c5_198, %c0_199] : memref<8x8xf32, #tpu.memory_space<vmem>>, vector<1x8xf32>
    tpu.vector_store %arg9[%c5_198, %c0_199], %291 {strides = array<i32>} : memref<8x8xf32, #tpu.memory_space<vmem>>, vector<1x8xf32>,
    %293 = vector.extract_strided_slice %280 {offsets = [6, 1], sizes = [1, 8], strides = [1, 1]} : vector<8x15xf32> to vector<1x8xf32>
    %c6_200 = arith.constant 6 : index
    %c0_201 = arith.constant 0 : index
    %294 = vector.load %arg9[%c6_200, %c0_201] : memref<8x8xf32, #tpu.memory_space<vmem>>, vector<1x8xf32>
    tpu.vector_store %arg9[%c6_200, %c0_201], %293 {strides = array<i32>} : memref<8x8xf32, #tpu.memory_space<vmem>>, vector<1x8xf32>,
    %295 = vector.extract_strided_slice %280 {offsets = [7, 0], sizes = [1, 8], strides = [1, 1]} : vector<8x15xf32> to vector<1x8xf32>
    %c7_202 = arith.constant 7 : index
    %c0_203 = arith.constant 0 : index
    %296 = vector.load %arg9[%c7_202, %c0_203] : memref<8x8xf32, #tpu.memory_space<vmem>>, vector<1x8xf32>
    tpu.vector_store %arg9[%c7_202, %c0_203], %295 {strides = array<i32>} : memref<8x8xf32, #tpu.memory_space<vmem>>, vector<1x8xf32>,
    %c0_204 = arith.constant 0 : index
    %c0_205 = arith.constant 0 : index
    %297 = vector.load %arg9[%c0_204, %c0_205] : memref<8x8xf32, #tpu.memory_space<vmem>>, vector<8x8xf32>
    %298 = arith.addf %273, %297 : vector<8x8xf32>
    %cst_206 = arith.constant dense<0xFF800000> : vector<8xf32>
    %299 = vector.multi_reduction <maximumf>, %298, %cst_206 [1] : vector<8x8xf32> to vector<8xf32>
    %300 = vector.shape_cast %299 : vector<8xf32> to vector<8x1xf32>
    %301 = vector.broadcast %300 : vector<8x1xf32> to vector<8x8xf32>
    %302 = arith.subf %298, %301 : vector<8x8xf32>
    %303 = math.exp %302 : vector<8x8xf32>
    %cst_207 = arith.constant dense<0.000000e+00> : vector<8xf32>
    %304 = vector.multi_reduction <add>, %303, %cst_207 [1] : vector<8x8xf32> to vector<8xf32>
    %305 = vector.shape_cast %304 : vector<8xf32> to vector<8x1xf32>
    %306 = tpu.reciprocal %305 {approx = true} : vector<8x1xf32> -> vector<8x1xf32>
    %307 = vector.broadcast %306 : vector<8x1xf32> to vector<8x8xf32>
    %308 = arith.mulf %303, %307 : vector<8x8xf32>
    %309 = arith.truncf %308 : vector<8x8xf32> to vector<8x8xbf16>
    %310 = vector.extract_strided_slice %12 {offsets = [0, 384], sizes = [8, 64], strides = [1, 1]} : vector<8x512xbf16> to vector<8x64xbf16>
    %cst_208 = arith.constant dense<0.000000e+00> : vector<8x64xf32>
    %311 = tpu.matmul %309, %310, %cst_208 {dimension_numbers = #tpu.dot_dimension_numbers<[1], [0], [0], [1], [0, 0, 1, 1], [], []>} : vector<8x8xbf16>, vector<8x64xbf16>, vector<8x64xf32> -> vector<8x64xf32>
    %312 = arith.truncf %311 : vector<8x64xf32> to vector<8x64xbf16>
    %c0_209 = arith.constant 0 : index
    %c384 = arith.constant 384 : index
    %313 = vector.load %arg10[%c0_209, %c384] : memref<8x512xbf16, #tpu.memory_space<vmem>>, vector<8x64xbf16>
    tpu.vector_store %arg10[%c0_209, %c384], %312 {strides = array<i32>} : memref<8x512xbf16, #tpu.memory_space<vmem>>, vector<8x64xbf16>,
    %314 = vector.extract_strided_slice %8 {offsets = [0, 448], sizes = [8, 64], strides = [1, 1]} : vector<8x512xbf16> to vector<8x64xbf16>
    %315 = vector.extract_strided_slice %10 {offsets = [0, 448], sizes = [8, 64], strides = [1, 1]} : vector<8x512xbf16> to vector<8x64xbf16>
    %cst_210 = arith.constant dense<0.000000e+00> : vector<8x8xf32>
    %316 = tpu.matmul %314, %315, %cst_210 {dimension_numbers = #tpu.dot_dimension_numbers<[1], [1], [0], [0], [0, 0, 1, 0], [], []>} : vector<8x64xbf16>, vector<8x64xbf16>, vector<8x8xf32> -> vector<8x8xf32>
    %c7_211 = arith.constant 7 : index
    %c0_212 = arith.constant 0 : index
    %c0_213 = arith.constant 0 : index
    %317 = vector.load %arg3[%c7_211, %c0_212, %c0_213] : memref<8x15x64xbf16, #tpu.memory_space<vmem>>, vector<1x15x64xbf16>
    %318 = vector.shape_cast %317 : vector<1x15x64xbf16> to vector<15x64xbf16>
    %cst_214 = arith.constant dense<0.000000e+00> : vector<8x15xf32>
    %319 = tpu.matmul %314, %318, %cst_214 {dimension_numbers = #tpu.dot_dimension_numbers<[1], [1], [0], [0], [0, 0, 1, 0], [], []>} : vector<8x64xbf16>, vector<15x64xbf16>, vector<8x15xf32> -> vector<8x15xf32>
    %c7_215 = arith.constant 7 : index
    %c0_216 = arith.constant 0 : index
    %c0_217 = arith.constant 0 : index
    %320 = vector.load %arg5[%c7_215, %c0_216, %c0_217] : memref<8x1x15xf32, #tpu.memory_space<vmem>>, vector<1x1x15xf32>
    %321 = vector.shape_cast %320 : vector<1x1x15xf32> to vector<1x15xf32>
    %322 = vector.broadcast %321 : vector<1x15xf32> to vector<8x15xf32>
    %323 = arith.addf %319, %322 : vector<8x15xf32>
    %324 = vector.extract_strided_slice %323 {offsets = [0, 7], sizes = [1, 8], strides = [1, 1]} : vector<8x15xf32> to vector<1x8xf32>
    %c0_218 = arith.constant 0 : index
    %c0_219 = arith.constant 0 : index
    %325 = vector.load %arg9[%c0_218, %c0_219] : memref<8x8xf32, #tpu.memory_space<vmem>>, vector<1x8xf32>
    tpu.vector_store %arg9[%c0_218, %c0_219], %324 {strides = array<i32>} : memref<8x8xf32, #tpu.memory_space<vmem>>, vector<1x8xf32>,
    %326 = vector.extract_strided_slice %323 {offsets = [1, 6], sizes = [1, 8], strides = [1, 1]} : vector<8x15xf32> to vector<1x8xf32>
    %c1_220 = arith.constant 1 : index
    %c0_221 = arith.constant 0 : index
    %327 = vector.load %arg9[%c1_220, %c0_221] : memref<8x8xf32, #tpu.memory_space<vmem>>, vector<1x8xf32>
    tpu.vector_store %arg9[%c1_220, %c0_221], %326 {strides = array<i32>} : memref<8x8xf32, #tpu.memory_space<vmem>>, vector<1x8xf32>,
    %328 = vector.extract_strided_slice %323 {offsets = [2, 5], sizes = [1, 8], strides = [1, 1]} : vector<8x15xf32> to vector<1x8xf32>
    %c2_222 = arith.constant 2 : index
    %c0_223 = arith.constant 0 : index
    %329 = vector.load %arg9[%c2_222, %c0_223] : memref<8x8xf32, #tpu.memory_space<vmem>>, vector<1x8xf32>
    tpu.vector_store %arg9[%c2_222, %c0_223], %328 {strides = array<i32>} : memref<8x8xf32, #tpu.memory_space<vmem>>, vector<1x8xf32>,
    %330 = vector.extract_strided_slice %323 {offsets = [3, 4], sizes = [1, 8], strides = [1, 1]} : vector<8x15xf32> to vector<1x8xf32>
    %c3_224 = arith.constant 3 : index
    %c0_225 = arith.constant 0 : index
    %331 = vector.load %arg9[%c3_224, %c0_225] : memref<8x8xf32, #tpu.memory_space<vmem>>, vector<1x8xf32>
    tpu.vector_store %arg9[%c3_224, %c0_225], %330 {strides = array<i32>} : memref<8x8xf32, #tpu.memory_space<vmem>>, vector<1x8xf32>,
    %332 = vector.extract_strided_slice %323 {offsets = [4, 3], sizes = [1, 8], strides = [1, 1]} : vector<8x15xf32> to vector<1x8xf32>
    %c4_226 = arith.constant 4 : index
    %c0_227 = arith.constant 0 : index
    %333 = vector.load %arg9[%c4_226, %c0_227] : memref<8x8xf32, #tpu.memory_space<vmem>>, vector<1x8xf32>
    tpu.vector_store %arg9[%c4_226, %c0_227], %332 {strides = array<i32>} : memref<8x8xf32, #tpu.memory_space<vmem>>, vector<1x8xf32>,
    %334 = vector.extract_strided_slice %323 {offsets = [5, 2], sizes = [1, 8], strides = [1, 1]} : vector<8x15xf32> to vector<1x8xf32>
    %c5_228 = arith.constant 5 : index
    %c0_229 = arith.constant 0 : index
    %335 = vector.load %arg9[%c5_228, %c0_229] : memref<8x8xf32, #tpu.memory_space<vmem>>, vector<1x8xf32>
    tpu.vector_store %arg9[%c5_228, %c0_229], %334 {strides = array<i32>} : memref<8x8xf32, #tpu.memory_space<vmem>>, vector<1x8xf32>,
    %336 = vector.extract_strided_slice %323 {offsets = [6, 1], sizes = [1, 8], strides = [1, 1]} : vector<8x15xf32> to vector<1x8xf32>
    %c6_230 = arith.constant 6 : index
    %c0_231 = arith.constant 0 : index
    %337 = vector.load %arg9[%c6_230, %c0_231] : memref<8x8xf32, #tpu.memory_space<vmem>>, vector<1x8xf32>
    tpu.vector_store %arg9[%c6_230, %c0_231], %336 {strides = array<i32>} : memref<8x8xf32, #tpu.memory_space<vmem>>, vector<1x8xf32>,
    %338 = vector.extract_strided_slice %323 {offsets = [7, 0], sizes = [1, 8], strides = [1, 1]} : vector<8x15xf32> to vector<1x8xf32>
    %c7_232 = arith.constant 7 : index
    %c0_233 = arith.constant 0 : index
    %339 = vector.load %arg9[%c7_232, %c0_233] : memref<8x8xf32, #tpu.memory_space<vmem>>, vector<1x8xf32>
    tpu.vector_store %arg9[%c7_232, %c0_233], %338 {strides = array<i32>} : memref<8x8xf32, #tpu.memory_space<vmem>>, vector<1x8xf32>,
    %c0_234 = arith.constant 0 : index
    %c0_235 = arith.constant 0 : index
    %340 = vector.load %arg9[%c0_234, %c0_235] : memref<8x8xf32, #tpu.memory_space<vmem>>, vector<8x8xf32>
    %341 = arith.addf %316, %340 : vector<8x8xf32>
    %cst_236 = arith.constant dense<0xFF800000> : vector<8xf32>
    %342 = vector.multi_reduction <maximumf>, %341, %cst_236 [1] : vector<8x8xf32> to vector<8xf32>
    %343 = vector.shape_cast %342 : vector<8xf32> to vector<8x1xf32>
    %344 = vector.broadcast %343 : vector<8x1xf32> to vector<8x8xf32>
    %345 = arith.subf %341, %344 : vector<8x8xf32>
    %346 = math.exp %345 : vector<8x8xf32>
    %cst_237 = arith.constant dense<0.000000e+00> : vector<8xf32>
    %347 = vector.multi_reduction <add>, %346, %cst_237 [1] : vector<8x8xf32> to vector<8xf32>
    %348 = vector.shape_cast %347 : vector<8xf32> to vector<8x1xf32>
    %349 = tpu.reciprocal %348 {approx = true} : vector<8x1xf32> -> vector<8x1xf32>
    %350 = vector.broadcast %349 : vector<8x1xf32> to vector<8x8xf32>
    %351 = arith.mulf %346, %350 : vector<8x8xf32>
    %352 = arith.truncf %351 : vector<8x8xf32> to vector<8x8xbf16>
    %353 = vector.extract_strided_slice %12 {offsets = [0, 448], sizes = [8, 64], strides = [1, 1]} : vector<8x512xbf16> to vector<8x64xbf16>
    %cst_238 = arith.constant dense<0.000000e+00> : vector<8x64xf32>
    %354 = tpu.matmul %352, %353, %cst_238 {dimension_numbers = #tpu.dot_dimension_numbers<[1], [0], [0], [1], [0, 0, 1, 1], [], []>} : vector<8x8xbf16>, vector<8x64xbf16>, vector<8x64xf32> -> vector<8x64xf32>
    %355 = arith.truncf %354 : vector<8x64xf32> to vector<8x64xbf16>
    %c0_239 = arith.constant 0 : index
    %c448 = arith.constant 448 : index
    %356 = vector.load %arg10[%c0_239, %c448] : memref<8x512xbf16, #tpu.memory_space<vmem>>, vector<8x64xbf16>
    tpu.vector_store %arg10[%c0_239, %c448], %355 {strides = array<i32>} : memref<8x512xbf16, #tpu.memory_space<vmem>>, vector<8x64xbf16>,
    %c0_240 = arith.constant 0 : index
    %c0_241 = arith.constant 0 : index
    %357 = vector.load %arg10[%c0_240, %c0_241] : memref<8x512xbf16, #tpu.memory_space<vmem>>, vector<8x512xbf16>
    %c0_242 = arith.constant 0 : index
    %c0_243 = arith.constant 0 : index
    %358 = vector.load %arg6[%c0_242, %c0_243] : memref<512x32xbf16, #tpu.memory_space<vmem>>, vector<512x32xbf16>
    %cst_244 = arith.constant dense<0.000000e+00> : vector<8x32xf32>
    %359 = tpu.matmul %357, %358, %cst_244 {dimension_numbers = #tpu.dot_dimension_numbers<[1], [0], [0], [1], [0, 0, 1, 1], [], []>} : vector<8x512xbf16>, vector<512x32xbf16>, vector<8x32xf32> -> vector<8x32xf32>
    %c0_245 = arith.constant 0 : index
    %c0_246 = arith.constant 0 : index
    %360 = vector.load %arg7[%c0_245, %c0_246] : memref<1x32xf32, #tpu.memory_space<vmem>>, vector<1x32xf32>
    %361 = vector.broadcast %360 : vector<1x32xf32> to vector<8x32xf32>
    %362 = arith.addf %359, %361 : vector<8x32xf32>
    %c0_247 = arith.constant 0 : index
    %c0_248 = arith.constant 0 : index
    %c0_249 = arith.constant 0 : index
    %363 = vector.load %arg8[%c0_247, %c0_248, %c0_249] : memref<1x8x32xf32, #tpu.memory_space<vmem>>, vector<1x8x32xf32>
    %364 = vector.shape_cast %363 : vector<1x8x32xf32> to vector<8x32xf32>
    %365 = vector.shape_cast %362 : vector<8x32xf32> to vector<1x8x32xf32>
    tpu.vector_store %arg8[%c0_247, %c0_248, %c0_249], %365 {strides = array<i32>} : memref<1x8x32xf32, #tpu.memory_space<vmem>>, vector<1x8x32xf32>,
    return
  }
  func.func @transform_0(%arg0: i32) -> (i32, i32, i32) {
    %c0_i32 = arith.constant 0 : i32
    %c0_i32_0 = arith.constant 0 : i32
    %c0_i32_1 = arith.constant 0 : i32
    return %arg0, %c0_i32, %c0_i32_0 : i32, i32, i32
  }
  func.func @transform_1(%arg0: i32) -> (i32, i32) {
    %c0_i32 = arith.constant 0 : i32
    %c0_i32_0 = arith.constant 0 : i32
    %c0_i32_1 = arith.constant 0 : i32
    return %c0_i32, %c0_i32_0 : i32, i32
  }
  func.func @transform_2(%arg0: i32) -> (i32, i32, i32) {
    %c0_i32 = arith.constant 0 : i32
    %c0_i32_0 = arith.constant 0 : i32
    %c0_i32_1 = arith.constant 0 : i32
    %c0_i32_2 = arith.constant 0 : i32
    return %c0_i32, %c0_i32_0, %c0_i32_1 : i32, i32, i32
  }
  func.func @transform_3(%arg0: i32) -> (i32, i32) {
    %c0_i32 = arith.constant 0 : i32
    %c0_i32_0 = arith.constant 0 : i32
    %c0_i32_1 = arith.constant 0 : i32
    return %c0_i32, %c0_i32_0 : i32, i32
  }
  func.func @transform_4(%arg0: i32) -> (i32, i32, i32) {
    %c0_i32 = arith.constant 0 : i32
    %c0_i32_0 = arith.constant 0 : i32
    %c0_i32_1 = arith.constant 0 : i32
    %c0_i32_2 = arith.constant 0 : i32
    return %c0_i32, %c0_i32_0, %c0_i32_1 : i32, i32, i32
  }
  func.func @transform_5(%arg0: i32) -> (i32, i32) {
    %c0_i32 = arith.constant 0 : i32
    %c0_i32_0 = arith.constant 0 : i32
    %c0_i32_1 = arith.constant 0 : i32
    return %c0_i32, %c0_i32_0 : i32, i32
  }
  func.func @transform_6(%arg0: i32) -> (i32, i32) {
    %c0_i32 = arith.constant 0 : i32
    %c0_i32_0 = arith.constant 0 : i32
    %c0_i32_1 = arith.constant 0 : i32
    return %c0_i32, %c0_i32_0 : i32, i32
  }
  func.func @transform_7(%arg0: i32) -> (i32, i32, i32) {
    %c0_i32 = arith.constant 0 : i32
    %c0_i32_0 = arith.constant 0 : i32
    %c0_i32_1 = arith.constant 0 : i32
    return %arg0, %c0_i32, %c0_i32_0 : i32, i32, i32
  }
}

</mosaic_0001>

<bundles_post_ra>
// kernel: tpu_custom_call.1
= control target key start
LH: loop header
LB: loop body
LE: loop exit
PB: predicated region body
PF: predicated region fallthrough
CT: control target
= control target key end

     0   :  { %s4614_s0 = inlined_call_operand.hbm [shape: bf16[2,8,32], index: 0, kind: input, shape index: {}]   ;;  %s4615_s1 = inlined_call_operand.hbm [shape: bf16[32,1536], index: 1, kind: input, shape index: {}]   ;;  %s4616_s2 = inlined_call_operand.hbm [shape: bf16[8,15,64], index: 2, kind: input, shape index: {}]   ;;  %s4617_s3 = inlined_call_operand.hbm [shape: f32[1,512], index: 3, kind: input, shape index: {}]   ;;  %s4618_s4 = inlined_call_operand.hbm [shape: f32[8,1,15], index: 4, kind: input, shape index: {}]   ;;  %s4619_s5 = inlined_call_operand.hbm [shape: bf16[512,32], index: 5, kind: input, shape index: {}]   ;;  %s4620_s6 = inlined_call_operand.hbm [shape: f32[1,32], index: 6, kind: input, shape index: {}]   ;;  %s4621_s7 = inlined_call_operand.hbm [shape: f32[2,8,32], index: 7, kind: output, shape index: {}]  }
   0x1   :  { %4625 = sst [smem:[#allocation22_spill]] %s4615_s1 }
   0x2   :  { %12 = vsyncpa [#allocation5], 0 }
   0x3   :  { %14 = vsyncpa [#allocation5 + $0x1], 0 }
   0x4   :  { %15 = vsyncpa [#allocation8], 0 }
   0x5   :  { %16 = vsyncpa [#allocation11], 0 }
   0x6   :  { %17 = vsyncpa [#allocation14], 0 }
   0x7   :  { %18 = vsyncpa [#allocation6], 0 }
   0x8   :  { %20 = vsyncpa [#allocation6 + $0x1], 0  ;;  %s3905_s24 = smov 0   ;;  %s3907_s25 = smov 0  }
   0x9   :  { %s3909_s26 = smov 0   ;;  %s3911_s27 = smov 0  }
   0xa LB: > { %s3840_s28 = smov [#allocation7]   ;;  %s3926_s30 = sadd.s32 4294967295, %s3838_s27   ;;  %s3838_s27 = sphi %s3911_s27, %s4649_s27   ;;  %s3834_s26 = sphi %s3909_s26, %s4648_s26   ;;  %s3830_s25 = sphi %s3907_s25, %s4647_s25   ;;  %s3826_s24 = sphi %s3905_s24, %s4646_s24  }
   0xb   : > { %s221_s29 = sshll.u32 %s3840_s28, 4  ;;  %p2952_p0 = scmp.ge.s32.totalorder %s3838_s27, 1  ;;  %s3931_s29 = int_to_ptr.vmem [resolvable:$true] %s221_s29 }
   0xc   : > { %p4622_p1 = scmp.eq.s32.totalorder %s3926_s30, 0  ;;  %p209_p2 = scmp.lt.s32.totalorder %s3838_s27, 3 }
   0xd   : > { %s3841_s9 = smov [#allocation10]   ;;  %s3842_s12 = smov [#allocation13]  }
   0xe   : > { %p3933_p3 = pnand %p2952_p0, %p209_p2  ;;  %s248_s10 = sshll.u32 %s3841_s9, 4  ;;  %s3946_s10 = int_to_ptr.vmem [resolvable:$true] %s248_s10 }
   0xf   : > { %s3948_s13 = sshll.u32 %s3842_s12, 4  ;;  %s4628_s1 = sld [smem:[#allocation22_spill]]  ;;  %s272_s13 = int_to_ptr.vmem [resolvable:$true] %s3948_s13 }
  0x10   : > { %s4626_s8 = scalar_select %p3933_p3, 1, 0 }
  0x11   : > { %p3354_p5 = pneg %p3933_p3 }
  0x13   : > { %p3942_p6 = pnand %p3354_p5, %p4622_p1 }
  0x15   : > { %s3562_s16 = scalar_lea.hbm %s4628_s1, 3072  ;;  %p3958_p8 = pneg %p3942_p6 }
  0x16   : > { %p3563_p7 = scmp.ne.s32.totalorder %s4628_s1, %s3562_s16  ;;  %p3569_p11 = scmp.lt.u32.totalorder %s3562_s16, %s4628_s1 }
  0x18   : > { %p3565_p9 = pnand %p3958_p8, %p3563_p7 }
  0x1a   : > { %p3566_p10 = pneg %p3565_p9 }
  0x1c   : > { %p3571_p12 = pnand %p3569_p11, %p3566_p10 }
  0x1e   : > { %3574 = shalt.err (!%p3571_p12)
}
  0x1f   : > { %s3575_s22 = scalar_lea.vmem %s3931_s29, 3072  ;;  %p3583_p5 = scmp.lt.s32.totalorder %s3931_s29, %s3931_s29 }
  0x20   : > { %p3576_p13 = scmp.ne.s32.totalorder %s3931_s29, %s3575_s22  ;;  %p3584_p4 = scmp.lt.s32.totalorder %s3575_s22, %s3575_s22 }
  0x22   : > { %p3578_p0 = pnand %p3576_p13, %p3958_p8  ;;  %p3585_p7 = por %p3584_p4, %p3583_p5 }
  0x24   : > { %p3579_p2 = pneg %p3578_p0 }
  0x26   : > { %p3586_p9 = pnand %p3585_p7, %p3579_p2 }
  0x28   : > { %3589 = shalt.err (!%p3586_p9)
}
  0x29   : > { %s3843_s23 = smov 768   ;;  %s3844_s28 = smov 48  }
  0x2a   : > { %3357 = dma.hbm_to_vmem [thread:$0]  (!%p3942_p6), %s4628_s1, 3072, %s3931_s29, [#allocation8], %s3843_s23, %s3843_s23, %s3844_s28  }
  0x2b   : > { %s3590_s16 = scalar_lea.hbm %s4617_s3, 64 }
  0x2c   : > { %p3591_p4 = scmp.ne.s32.totalorder %s4617_s3, %s3590_s16  ;;  %p3597_p12 = scmp.lt.u32.totalorder %s3590_s16, %s4617_s3 }
  0x2e   : > { %p3593_p10 = pnand %p3591_p4, %p3958_p8 }
  0x30   : > { %p3594_p11 = pneg %p3593_p10 }
  0x32   : > { %p3599_p13 = pnand %p3597_p12, %p3594_p11 }
  0x34   : > { %3602 = shalt.err (!%p3599_p13)
}
  0x35   : > { %s3603_s29 = scalar_lea.vmem %s3946_s10, 64  ;;  %p3611_p7 = scmp.lt.s32.totalorder %s3946_s10, %s3946_s10 }
  0x36   : > { %p3604_p0 = scmp.ne.s32.totalorder %s3946_s10, %s3603_s29  ;;  %p3612_p9 = scmp.lt.s32.totalorder %s3603_s29, %s3603_s29 }
  0x38   : > { %p3606_p2 = pnand %p3604_p0, %p3958_p8  ;;  %p3613_p4 = por %p3612_p9, %p3611_p7 }
  0x3a   : > { %p3607_p5 = pneg %p3606_p2 }
  0x3c   : > { %p3614_p10 = pnand %p3613_p4, %p3607_p5 }
  0x3e   : > { %3617 = shalt.err (!%p3614_p10)
}
  0x3f   : > { %3363 = dma.hbm_to_vmem [thread:$0]  (!%p3942_p6), %s4617_s3, 64, %s3946_s10, [#allocation11]  }
  0x40   : > { %s3618_s12 = scalar_lea.hbm %s4619_s5, 4096 }
  0x41   : > { %p3619_p11 = scmp.ne.s32.totalorder %s4619_s5, %s3618_s12  ;;  %p3625_p0 = scmp.lt.u32.totalorder %s3618_s12, %s4619_s5 }
  0x43   : > { %p3621_p12 = pnand %p3619_p11, %p3958_p8 }
  0x45   : > { %p3622_p13 = pneg %p3621_p12 }
  0x47   : > { %p3627_p2 = pnand %p3625_p0, %p3622_p13 }
  0x49   : > { %3630 = shalt.err (!%p3627_p2)
}
  0x4a   : > { %s3631_s18 = scalar_lea.vmem %s272_s13, 4096  ;;  %p3639_p4 = scmp.lt.s32.totalorder %s272_s13, %s272_s13 }
  0x4b   : > { %p3632_p5 = scmp.ne.s32.totalorder %s272_s13, %s3631_s18  ;;  %p3640_p10 = scmp.lt.s32.totalorder %s3631_s18, %s3631_s18 }
  0x4d   : > { %p3634_p7 = pnand %p3632_p5, %p3958_p8  ;;  %p3641_p1 = por %p3640_p10, %p3639_p4 }
  0x4f   : > { %p3635_p9 = pneg %p3634_p7 }
  0x51   : > { %p3642_p3 = pnand %p3641_p1, %p3635_p9 }
  0x53   : > { %3645 = shalt.err (!%p3642_p3)
}
  0x54   : > { %s3845_s10 = smov 64   ;;  %s3846_s20 = smov 4  }
  0x55   : > { %3369 = dma.hbm_to_vmem [thread:$0]  (!%p3942_p6), %s4619_s5, 4096, %s272_s13, [#allocation14], %s3845_s10, %s3845_s10, %s3846_s20  }
  0x56   : > { %s3847_s22 = smov [#allocation9]   ;;  %s3848_s28 = smov [#allocation12]  }
  0x57   : > { %s234_s23 = sshll.u32 %s3847_s22, 4  ;;  %s258_s9 = sshll.u32 %s3848_s28, 4  ;;  %s235_s23 = int_to_ptr.vmem [resolvable:$true] %s234_s23  ;;  %s259_s9 = int_to_ptr.vmem [resolvable:$true] %s258_s9 }
  0x58   : > { %s3646_s15 = scalar_lea.hbm %s4616_s2, 1024 }
  0x59   : > { %p3647_p1 = scmp.ne.s32.totalorder %s4616_s2, %s3646_s15  ;;  %p3653_p12 = scmp.lt.u32.totalorder %s3646_s15, %s4616_s2 }
  0x5b   : > { %p3649_p3 = pnand %p3647_p1, %p3958_p8 }
  0x5d   : > { %p3650_p11 = pneg %p3649_p3 }
  0x5f   : > { %p3655_p13 = pnand %p3653_p12, %p3650_p11 }
  0x61   : > { %3658 = shalt.err (!%p3655_p13)
}
  0x62   : > { %s3659_s13 = scalar_lea.vmem %s235_s23, 1024  ;;  %p3667_p7 = scmp.lt.s32.totalorder %s235_s23, %s235_s23 }
  0x63   : > { %p3660_p0 = scmp.ne.s32.totalorder %s235_s23, %s3659_s13  ;;  %p3668_p9 = scmp.lt.s32.totalorder %s3659_s13, %s3659_s13 }
  0x65   : > { %p3662_p2 = pnand %p3660_p0, %p3958_p8  ;;  %p3669_p4 = por %p3668_p9, %p3667_p7 }
  0x67   : > { %p3663_p5 = pneg %p3662_p2 }
  0x69   : > { %p3670_p10 = pnand %p3669_p4, %p3663_p5 }
  0x6b   : > { %3673 = shalt.err (!%p3670_p10)
}
  0x6c   : > { %3360 = dma.hbm_to_vmem [thread:$0]  (!%p3942_p6), %s4616_s2, 1024, %s235_s23, [#allocation8], %s3845_s10, %s3845_s10, %s3846_s20  }
  0x6d   : > { %s3674_s28 = scalar_lea.hbm %s4618_s4, 128 }
  0x6e   : > { %p3675_p1 = scmp.ne.s32.totalorder %s4618_s4, %s3674_s28  ;;  %p3681_p12 = scmp.lt.u32.totalorder %s3674_s28, %s4618_s4 }
  0x70   : > { %p3677_p3 = pnand %p3675_p1, %p3958_p8 }
  0x72   : > { %p3678_p11 = pneg %p3677_p3 }
  0x74   : > { %p3683_p13 = pnand %p3681_p12, %p3678_p11 }
  0x76   : > { %3686 = shalt.err (!%p3683_p13)
}
  0x77   : > { %s3687_s17 = scalar_lea.vmem %s259_s9, 128  ;;  %p3695_p7 = scmp.lt.s32.totalorder %s259_s9, %s259_s9 }
  0x78   : > { %p3688_p0 = scmp.ne.s32.totalorder %s259_s9, %s3687_s17  ;;  %p3696_p9 = scmp.lt.s32.totalorder %s3687_s17, %s3687_s17 }
  0x7a   : > { %p3690_p2 = pnand %p3688_p0, %p3958_p8  ;;  %p3697_p4 = por %p3696_p9, %p3695_p7 }
  0x7c   : > { %p3691_p5 = pneg %p3690_p2 }
  0x7e   : > { %p3698_p10 = pnand %p3697_p4, %p3691_p5 }
  0x80   : > { %3701 = shalt.err (!%p3698_p10)
}
  0x81   : > { %s3849_s10 = smov 16   ;;  %s3850_s20 = smov 1  }
  0x82   : > { %3366 = dma.hbm_to_vmem [thread:$0]  (!%p3942_p6), %s4618_s4, 128, %s259_s9, [#allocation11], %s3849_s10, %s3849_s10, %s3850_s20  }
  0x83   : > { %s3851_s13 = smov [#allocation15]   ;;  %s3702_s22 = scalar_lea.hbm %s4620_s6, 16 }
  0x84   : > { %s285_s21 = sshll.u32 %s3851_s13, 4  ;;  %p3703_p1 = scmp.ne.s32.totalorder %s4620_s6, %s3702_s22  ;;  %s286_s21 = int_to_ptr.vmem [resolvable:$true] %s285_s21 }
  0x85   : > { %p3709_p12 = scmp.lt.u32.totalorder %s3702_s22, %s4620_s6 }
  0x86   : > { %p3705_p3 = pnand %p3703_p1, %p3958_p8 }
  0x88   : > { %p3706_p11 = pneg %p3705_p3 }
  0x8a   : > { %p3711_p13 = pnand %p3709_p12, %p3706_p11 }
  0x8c   : > { %3714 = shalt.err (!%p3711_p13)
}
  0x8d   : > { %s3715_s9 = scalar_lea.vmem %s286_s21, 16  ;;  %s3722_s16 = scalar_lea.vmem %s286_s21, 32 }
  0x8e   : > { %p3716_p0 = scmp.ne.s32.totalorder %s286_s21, %s3715_s9  ;;  %p3723_p7 = scmp.lt.s32.totalorder %s286_s21, %s286_s21 }
  0x8f   : > { %p3724_p9 = scmp.lt.s32.totalorder %s3722_s16, %s3715_s9 }
  0x90   : > { %p3718_p2 = pnand %p3716_p0, %p3958_p8 }
  0x91   : > { %p3725_p4 = por %p3724_p9, %p3723_p7 }
  0x92   : > { %p3719_p5 = pneg %p3718_p2 }
  0x94   : > { %p3726_p10 = pnand %p3725_p4, %p3719_p5 }
  0x96   : > { %3729 = shalt.err (!%p3726_p10)
}
  0x97   : > { %3372 = dma.hbm_to_vmem [thread:$0]  (!%p3942_p6), %s4620_s6, 16, %s286_s21, [#allocation14]  }
  0x98   : > { %s2951_s19 = sadd.s32 4294967294, %s3838_s27   ;;  %s4077_s11 = sadd.s32 1, %s3838_s27  }
  0x99   : > { %s30_s20 = ssub.s32 %s3838_s27, %s4077_s11  ;;  %s33_s23 = sadd.s32 1, %s3834_s26 }
  0x9a   : > { %p31_p8 = scmp.eq.s32.totalorder %s30_s20, 0  ;;  %p40_p1 = scmp.ne.s32.totalorder %s3834_s26, %s3830_s25 }
  0x9b   : > { %p41_p3 = scmp.eq.s32.totalorder %s3838_s27, 0  ;;  %p46_p11 = scmp.ne.s32.totalorder %s3830_s25, %s3826_s24 }
  0x9c   : > { %s4088_s18 = scalar_select %p31_p8, %s3834_s26, %s33_s23  }
  0x9d   : > { %p4090_p12 = por %p41_p3, %p40_p1  ;;  %p4631_p13 = scmp.eq.s32.totalorder %s3926_s30, 0 }
  0x9e   : > { %p196_p0 = scmp.eq.s32.totalorder %s3926_s30, 1  ;;  %p202_p2 = scmp.eq.s32.totalorder %s2951_s19, 1 }
  0x9f   : > { %p4096_p6 = por %p4631_p13, %p46_p11  ;;  %p3387_p5 = scmp.lt.s32.totalorder %s3838_s27, 2 }
  0xa0   : > { %s296_s29 = sand.u32 1, %s3834_s26   ;;  %p4103_p7 = por %p196_p0, %p40_p1 }
  0xa1   : > { %p4107_p9 = por %p202_p2, %p46_p11  ;;  %s2960_s28 = sshll.u32 %s296_s29, 2 }
  0xa2   : > { %s4633_s1 = scalar_select %p4103_p7, 1, 0 }
  0xa3   : > { %s4634_s22 = scalar_select %p4107_p9, 1, 0 }
  0xa4   : > { %s2961_s12 = sshll.u32 %s3838_s27, 6  ;;  %s300_s16 = scalar_lea.vmem [#allocation4], %s2960_s28 }
  0xa5   : > { %s4115_s9 = scalar_lea.hbm %s4614_s0, %s2961_s12  ;;  %s307_s17 = sshll.u32 %s300_s16, 4  ;;  %s4117_s17 = int_to_ptr.vmem [resolvable:$true] %s307_s17 }
  0xa6   : > { %p4121_p4 = pnand %p3387_p5, %p4090_p12  ;;  %s297_s19 = scalar_lea.sflag [#allocation5], %s296_s29 }
  0xa7   : > { %s3730_s20 = scalar_lea.hbm %s4115_s9, 64  ;;  %s3735_s12 = scalar_lea.hbm %s4614_s0, 128 }
  0xa8   : > { %p3731_p10 = scmp.ne.s32.totalorder %s4115_s9, %s3730_s20  ;;  %p3732_p8 = pneg %p4121_p4 }
  0xa9   : > { %p3736_p11 = scmp.lt.u32.totalorder %s4115_s9, %s4614_s0  ;;  %p3737_p12 = scmp.lt.u32.totalorder %s3735_s12, %s3730_s20 }
  0xaa   : > { %p3733_p1 = pnand %p3732_p8, %p3731_p10  ;;  %p3739_p0 = scmp.lt.u32.totalorder %s3730_s20, %s4115_s9 }
  0xab   : > { %p3738_p13 = por %p3737_p12, %p3736_p11 }
  0xac   : > { %p3734_p3 = pneg %p3733_p1 }
  0xad   : > { %p3740_p2 = por %p3739_p0, %p3738_p13 }
  0xaf   : > { %p3741_p5 = pnand %p3740_p2, %p3734_p3 }
  0xb1   : > { %3744 = shalt.err (!%p3741_p5)
}
  0xb2   : > { %s3745_s29 = scalar_lea.vmem %s4117_s17, 64  ;;  %s3852_s15 = smov [#allocation4]  }
  0xb3   : > { %p3746_p10 = scmp.ne.s32.totalorder %s4117_s17, %s3745_s29  ;;  %s3750_s16 = sshll.u32 %s3852_s15, 4  ;;  %s3751_s16 = int_to_ptr.vmem [resolvable:$false] %s3750_s16 }
  0xb4   : > { %s3752_s23 = scalar_lea.vmem %s3751_s16, 128  ;;  %p3753_p7 = scmp.lt.s32.totalorder %s4117_s17, %s3751_s16 }
  0xb5   : > { %p3748_p1 = pnand %p3746_p10, %p3732_p8  ;;  %p3754_p11 = scmp.lt.s32.totalorder %s3752_s23, %s3745_s29 }
  0xb7   : > { %p3749_p9 = pneg %p3748_p1  ;;  %p3755_p12 = por %p3754_p11, %p3753_p7 }
  0xb9   : > { %p3756_p13 = pnand %p3755_p12, %p3749_p9 }
  0xbb   : > { %3759 = shalt.err (!%p3756_p13)
}
  0xbc   : > { %3376 = dma.hbm_to_vmem [thread:$0]  (!%p4121_p4), %s4115_s9, 64, %s4117_s17, %s297_s19  }
  0xbd   : > { %p4636_p3 = scmp.ne.s32.totalorder %s4626_s8, 0 }
  0xbe   : > { %s4153_s20 = sand.u32 (!%p4636_p3), 1, %s3830_s25  }
  0xbf   : > { %316 = sbr.rel (%p4636_p3) target bundleno = 5438 (0x153e), region = 48  ;;  %s2963_s28 = sshll.u32 (!%p4636_p3), %s4153_s20, 2 }
  0xc0   : > { %s319_s12 = scalar_lea.sflag (!%p4636_p3), [#allocation5], %s4153_s20  ;;  %s322_s13 = scalar_lea.vmem (!%p4636_p3), [#allocation4], %s2963_s28 }
  0xc6   : > { %3805 = dma.done.wait (%p4096_p6), %s319_s12, 64  }
  0xc7   : > { %3807 = vsyncadd (%p4096_p6), %s319_s12, 4294967232  ;;  %p4637_p7 = scmp.eq.s32.totalorder %s3926_s30, 0 }
  0xc9   : > { %3809 = dma.done.wait (%p4637_p7), [#allocation8], 4096   ;;  %p4638_p9 = pmov %p4637_p7 }
  0xca   : > { %p4639_p4 = pmov %p4637_p7 }
  0xcb   : > { %3811 = vsyncadd (%p4638_p9), [#allocation8], 4294963200 }
  0xcc   : > { %3813 = dma.done.wait (%p4639_p4), [#allocation11], 192   ;;  %p4640_p8 = pmov %p4639_p4 }
  0xcd   : > { %p4641_p0 = pmov %p4639_p4 }
  0xce   : > { %3815 = vsyncadd (%p4640_p8), [#allocation11], 4294967104 }
  0xcf   : > { %3817 = dma.done.wait (%p4641_p0), [#allocation14], 4112   ;;  %p4642_p2 = pmov %p4641_p0 }
  0xd0   : > { %v3853_v0 = vmov 0   ;;  %v3450_v1 = vld [vmem:[#allocation7 + $0x4] ss:$48 sps:$4 sm:$0xff]   ;;  %v3452_v2 = vld [vmem:[#allocation7] ss:$48 sps:$4 sm:$0xff]   ;;  %vm523_vm0 = vcmask 261120   ;;  %v775_v29 = vlaneseq }
  0xd1   : > { %3819 = vsyncadd (%p4642_p2), [#allocation14], 4294963184  ;;  %559 = vmatprep.mubr.bf16.mxu0 %v3853_v0  ;;  %600 = vmatprep.mubr.bf16.mxu1 %v3853_v0  ;;  %v3453_v3 = vld [vmem:[#allocation7 + $0x64] ss:$48 sps:$4 sm:$0xff]   ;;  %v3455_v4 = vld [vmem:[#allocation7 + $0x60] ss:$48 sps:$4 sm:$0xff]  }
  0xd2   : > { %527 = vmatprep.subr.bf16.mxu0 %v3450_v1  ;;  %v3458_v5 = vld [vmem:[#allocation7 + $0x14] ss:$48 sps:$4 sm:$0xff]   ;;  %v378_v6 = vld [vmem:[%s322_s13] sm:$0xf]  ;;  %v3456_v9 = vld [vmem:[#allocation7 + $0x10] ss:$48 sps:$4 sm:$0xff]  }
  0xd3   : > { %528 = vmatpush1.bf16.msra.mxu0 %v3452_v2  ;;  %v3462_v7 = vld [vmem:[#allocation7 + $0xc] ss:$48 sps:$4 sm:$0xff]   ;;  %v3464_v8 = vld [vmem:[#allocation7 + $0x8] ss:$48 sps:$4 sm:$0xff]   ;;  %v3461_v10 = vld [vmem:[#allocation7 + $0x74] ss:$48 sps:$4 sm:$0xff]  }
  0xd4   : > { %529 = vmatprep.subr.bf16.mxu0 %v3453_v3  ;;  %568 = vmatprep.subr.bf16.mxu1 %v3462_v7  ;;  %v3468_v11 = vld [vmem:[#allocation7 + $0x6c] ss:$48 sps:$4 sm:$0xff]   ;;  %v3470_v12 = vld [vmem:[#allocation7 + $0x68] ss:$48 sps:$4 sm:$0xff]   ;;  %v3459_v13 = vld [vmem:[#allocation7 + $0x70] ss:$48 sps:$4 sm:$0xff]  }
  0xd5   : > { %569 = vmatpush1.bf16.msra.mxu1 %v3464_v8  ;;  %v3467_v14 = vld [vmem:[#allocation7 + $0x24] ss:$48 sps:$4 sm:$0xff]   ;;  %v3476_v15 = vld [vmem:[#allocation7 + $0x1c] ss:$48 sps:$4 sm:$0xff]   ;;  %vm825_vm1 = vcmask 523264   ;;  %v3854_v26 = vmov 0.0  }
  0xd6   : > { %570 = vmatprep.subr.bf16.mxu1 %v3468_v11  ;;  %v3465_v16 = vld [vmem:[#allocation7 + $0x20] ss:$48 sps:$4 sm:$0xff]   ;;  %v3474_v17 = vld [vmem:[#allocation7 + $0x18] ss:$48 sps:$4 sm:$0xff]   ;;  %v3479_v18 = vld [vmem:[#allocation7 + $0x7c] ss:$48 sps:$4 sm:$0xff]  }
  0xd7   : > { %530 = vmatpush1.bf16.msra.mxu0 %v3455_v4  ;;  %v3480_v19 = vld [vmem:[#allocation9] sm:$0xff]   ;;  %v3477_v21 = vld [vmem:[#allocation7 + $0x78] ss:$48 sps:$4 sm:$0xff]   ;;  %v3483_v23 = vld [vmem:[#allocation7 + $0x2c] ss:$48 sps:$4 sm:$0xff]   ;;  %vm3855_vm2 = vmmov 0  }
  0xd8   : > { %609 = vmatprep.subr.bf16.mxu0 %v3458_v5  ;;  %v3473_v20 = vld [vmem:[#allocation7 + $0x84] ss:$48 sps:$4 sm:$0xff]   ;;  %v830_v22 = vsel %vm825_vm1, %v3480_v19, 0  ;;  %v3471_v24 = vld [vmem:[#allocation7 + $0x80] ss:$48 sps:$4 sm:$0xff]   ;;  %v4187_v30 = vshrl.u32 %v775_v29, 7 }
  0xd9   : > { %571 = vmatpush1.bf16.msra.mxu1 %v3470_v12  ;;  %v3481_v25 = vld [vmem:[#allocation7 + $0x28] ss:$48 sps:$4 sm:$0xff]   ;;  %v3486_v27 = vld [vmem:[#allocation7 + $0x8c] ss:$48 sps:$4 sm:$0xff]   ;;  %v4190_v32 = vld [vmem:[#allocation10] sm:$0xf] }
  0xda   : > { %2995 = vmatmul.mubr.msk.bf16.vlgmr.msra.gmra.mrb[0].mxu0 %vm523_vm0, %v378_v6  ;;  %650 = vmatprep.subr.bf16.mxu1 %v3476_v15  ;;  %v3484_v28 = vld [vmem:[#allocation7 + $0x88] ss:$48 sps:$4 sm:$0xff]   ;;  %v777_v31 = vsub.s32 0, %v4187_v30  ;;  %vm970_vm3 = vcmask 1043456   ;;  %v3001_v1 = vld [vmem:[#allocation12] ss:$0 sm:$0xff] }
  0xdb   : > { %610 = vmatpush1.bf16.msra.mxu0 %v3456_v9  ;;  %641 = vmatprep.mubr.bf16.mxu0 %v3853_v0  ;;  %vm908_vm4 = vcmask 64519   ;;  %s3856_s8 = smov 123   ;;  %s3857_s21 = smov 121   ;;  %vm886_vm5 = vcmask 59394   ;;  %vm876_vm6 = vcmask 57344   ;;  %vm891_vm7 = vcmask 60419  }
  0xdc   : > { %611 = vmatprep.subr.bf16.mxu0 %v3461_v10  ;;  %2996 = vmatmul.mubr.msk.bf16.vlgmr.msra.gmra.mrb[0].mxu1 %vm523_vm0, %v378_v6  ;;  %v778_v33 = vrot.slane %v4190_v32, %v777_v31  ;;  %s3858_s9 = smov 124   ;;  %s3859_s17 = smov 122   ;;  %vm881_vm8 = vcmask 58369   ;;  %vm901_vm9 = vcmask 62469   ;;  %vm896_vm10 = vcmask 61444  }
  0xdd   : > { %651 = vmatpush1.bf16.msra.mxu1 %v3474_v17  ;;  %682 = vmatprep.mubr.bf16.mxu1 %v3853_v0  ;;  %s3860_s10 = smov 126   ;;  %s3861_s19 = smov 125   ;;  %vm906_vm11 = vcmask 63494   ;;  %vm954_vm12 = vcmask 64512   ;;  %v3006_v29 = vld [vmem:[#allocation12 + $0x1] ss:$0 sm:$0xff] }
  0xde   : > { %652 = vmatprep.subr.bf16.mxu1 %v3479_v18  ;;  %s3862_s14 = smov 127   ;;  %s3863_s29 = smov 64   ;;  %vm1015_vm13 = vcmask 519168   ;;  %vm1227_vm14 = vcmask 1043968  }
  0xdf   : > { %612 = vmatpush1.bf16.msra.mxu0 %v3459_v13  ;;  %s2970_s15 = sshll.u32 %s4153_s20, 3  ;;  %s3083_s16 = sshll.u32 %s3926_s30, 7 }
  0xe0   : > { %691 = vmatprep.subr.bf16.mxu0 %v3467_v14  ;;  %s376_s23 = scalar_lea.vmem [#allocation16], %s2970_s15  ;;  %s2811_s30 = scalar_lea.sflag [#allocation6], %s4153_s20 }
  0xe1   : > { %653 = vmatpush1.bf16.msra.mxu1 %v3477_v21  ;;  %s2824_s28 = sshll.u32 %s376_s23, 4  ;;  %p4643_p5 = scmp.ne.s32.totalorder %s4633_s1, 0  ;;  %s4571_s28 = int_to_ptr.vmem [resolvable:$true] %s2824_s28 }
  0xe2   : > { %2997 = vmatmul.mubr.msk.bf16.vlgmr.msra.gmra.mrb[4].mxu0 %vm523_vm0, %v378_v6  ;;  %732 = vmatprep.subr.bf16.mxu1 %v3483_v23 }
  0xe3   : > { %692 = vmatpush1.bf16.msra.mxu0 %v3465_v16  ;;  %723 = vmatprep.mubr.bf16.mxu0 %v3853_v0 }
  0xe4   : > { %693 = vmatprep.subr.bf16.mxu0 %v3473_v20  ;;  %2998 = vmatmul.mubr.msk.bf16.vlgmr.msra.gmra.mrb[4].mxu1 %vm523_vm0, %v378_v6 }
  0xe5   : > { %733 = vmatpush1.bf16.msra.mxu1 %v3481_v25  ;;  %764 = vmatprep.mubr.bf16.mxu1 %v3853_v0  ;;  %v3487_v0 = vld [vmem:[#allocation9 + $0x8] sm:$0xff]  }
  0xe6   : > { %734 = vmatprep.subr.bf16.mxu1 %v3486_v27  ;;  %v1040_v2 = vsel %vm825_vm1, %v3487_v0, 0 }
  0xe7   : > { %694 = vmatpush1.bf16.msra.mxu0 %v3471_v24 }
  0xe8   : > { %3182 = vmatprep.subr.bf16.mxu0 %v3854_v26 }
  0xe9   : > { %735 = vmatpush1.bf16.msra.mxu1 %v3484_v28 }
  0xea   : > { %2999 = vmatmul.mubr.msk.bf16.vlgmr.msra.gmra.mrb[8].mxu0 %vm523_vm0, %v378_v6  ;;  %3188 = vmatprep.subr.bf16.mxu1 %v3854_v26 }
  0xeb   : > { %3184 = vmatprep.mubr.msk.bf16.mxu0 %vm3855_vm2, %v3854_v26 }
  0xec   : > { %3000 = vmatmul.mubr.msk.bf16.vlgmr.msra.gmra.mrb[8].mxu1 %vm523_vm0, %v378_v6 }
  0xed   : > { %3190 = vmatprep.mubr.msk.bf16.mxu1 %vm3855_vm2, %v3854_v26 }
  0xf0   : > { %3183 = vmatpush3.bf16.xpose.msra.mxu0 %v830_v22 }
  0xf1   : > { %3194 = vmatprep.subr.bf16.mxu0 %v3854_v26 }
 0x1ad   : > { %v561_v34 = vpop.f32.mrb[0].mxu0 }
 0x1ae   : > { %v795_v35 = vadd.f32 %v778_v33, %v561_v34  ;;  %v4193_v36 = vpop.f32.mrb[1].mxu0 }
 0x1af   : > { %v565_v37 = vpop.f32.mrb[2].mxu0  ;;  %v4219_v52 = vpop.f32.mrb[0].mxu1 }
 0x1b0   : > { %v4195_v38 = vpack.c.bf16 %v795_v35, %v795_v35  ;;  %v566_v39 = vpop.f32.mrb[3].mxu0  ;;  %v4221_v53 = vpop.f32.mrb[1].mxu1 }
 0x1b1   : > { %v606_v54 = vpop.f32.mrb[2].mxu1 }
 0x1b2   : > { %3185 = vmatmul.mubr.msk.bf16.vlgmr.msra.gmra.mrb[12].mxu0 %vm825_vm1, %v4195_v38  ;;  %v607_v55 = vpop.f32.mrb[3].mxu1 }
 0x1b3   : > { %3196 = vmatprep.mubr.msk.bf16.mxu0 %vm3855_vm2, %v3854_v26 }
 0x1b5   : > { %v643_v40 = vpop.f32.mrb[4].mxu0 }
 0x1b6   : > { %v4201_v41 = vpack.c.bf16 %v643_v40, %v643_v40  ;;  %v4203_v42 = vpop.f32.mrb[5].mxu0 }
 0x1b7   : > { %v647_v43 = vpop.f32.mrb[6].mxu0  ;;  %v4223_v56 = vpop.f32.mrb[4].mxu1 }
 0x1b8   : > { %v912_v44 = vsel %vm825_vm1, %v4201_v41, 0  ;;  %v648_v45 = vpop.f32.mrb[7].mxu0  ;;  %v4225_v57 = vpop.f32.mrb[5].mxu1 }
 0x1b9   : > { %3189 = vmatpush3.bf16.xpose.msra.mxu1 %v912_v44  ;;  %v688_v58 = vpop.f32.mrb[6].mxu1  ;;  %v781_v45 = vsub.s32 1, %v4187_v30 }
 0x1ba   : > { %3200 = vmatprep.subr.bf16.mxu1 %v3854_v26  ;;  %v689_v59 = vpop.f32.mrb[7].mxu1 }
 0x1bd   : > { %v725_v46 = vpop.f32.mrb[8].mxu0 }
 0x1be   : > { %v4208_v47 = vpack.c.bf16 %v725_v46, %v725_v46  ;;  %v4210_v48 = vpop.f32.mrb[9].mxu0  ;;  %v3488_v46 = vld [vmem:[#allocation9 + $0x10] sm:$0xff]  }
 0x1bf   : > { %v729_v49 = vpop.f32.mrb[10].mxu0  ;;  %v4227_v60 = vpop.f32.mrb[8].mxu1  ;;  %v1249_v54 = vsel %vm825_vm1, %v3488_v46, 0 }
 0x1c0   : > { %3191 = vmatmul.mubr.msk.bf16.vlgmr.msra.gmra.mrb[12].mxu1 %vm825_vm1, %v4195_v38  ;;  %v972_v50 = vsel %vm970_vm3, %v4208_v47, 0  ;;  %v730_v51 = vpop.f32.mrb[11].mxu0  ;;  %v4229_v61 = vpop.f32.mrb[9].mxu1  ;;  %v782_v49 = vrot.slane %v4190_v32, %v781_v45 }
 0x1c1   : > { %3195 = vmatpush3.bf16.msra.mxu0 %v972_v50  ;;  %3202 = vmatprep.mubr.msk.bf16.mxu1 %vm3855_vm2, %v3854_v26  ;;  %v770_v62 = vpop.f32.mrb[10].mxu1 }
 0x1c2   : > { %3206 = vmatprep.subr.bf16.mxu0 %v3854_v26  ;;  %v771_v63 = vpop.f32.mrb[11].mxu1  ;;  %3201 = vmatpush3.bf16.xpose.msra.mxu1 %v1040_v2  ;;  %v796_v55 = vadd.f32 %v782_v49, %v4193_v36  ;;  %v4284_v62 = vpack.c.bf16 %v4210_v48, %v4210_v48 }
 0x1c3   : > { %3212 = vmatprep.subr.bf16.mxu1 %v3854_v26 }
 0x1c4   : > { %v4286_v63 = vpack.c.bf16 %v796_v55, %v796_v55  ;;  %v1381_v36 = vsel %vm970_vm3, %v4284_v62, 0 }
 0x285   : > { %v866_v3 = vpop.f32.mrb[12].mxu0 }
 0x286   : > { %v867_v4 = vadd.f32 %v3001_v1, %v866_v3  ;;  %v3186_v5 = vpop.f32.mrb[13].mxu0 }
 0x287   : > { %v869_v6 = vpop.f32.mrb[14].mxu0 }
 0x288   : > { %909 = vst.msk [vmem:[#allocation2] sm:$0x80] %vm908_vm4, %v867_v4  ;;  %883 = vrot.lane.b32.xlu1 %v867_v4, %s3856_s8  ;;  %873 = vrot.lane.b32.xlu0 %v867_v4, %s3857_s21  ;;  %v3187_v7 = vpop.f32.mrb[15].mxu0 }
 0x28c   : > { %888 = vrot.lane.b32.xlu1 %v867_v4, %s3858_s9  ;;  %878 = vrot.lane.b32.xlu0 %v867_v4, %s3859_s17 }
 0x290   : > { %898 = vrot.lane.b32.xlu1 %v867_v4, %s3860_s10  ;;  %893 = vrot.lane.b32.xlu0 %v867_v4, %s3861_s19 }
 0x293   : > { %v948_v8 = vpop.f32.mrb[12].mxu1 }
 0x294   : > { %v3192_v9 = vpop.f32.mrb[13].mxu1  ;;  %903 = vrot.lane.b32.xlu0 %v867_v4, %s3862_s14 }
 0x295   : > { %v951_v10 = vpop.f32.mrb[14].mxu1 }
 0x296   : > { %v3193_v11 = vpop.f32.mrb[15].mxu1 }
 0x298   : > { %1029 = vrot.lane.b32.xlu0 %v4195_v38, %s3863_s29 }
 0x2fa   : > { %v884_v12 = vpop.permute.xlu1 %883  ;;  %v874_v13 = vpop.permute.xlu0 %873 }
 0x2fb   : > { %887 = vst.msk [vmem:[#allocation2] sm:$0x4] %vm886_vm5, %v884_v12 }
 0x2fc   : > { %877 = vst.msk [vmem:[#allocation2] sm:$0x1] %vm876_vm6, %v874_v13 }
 0x2fe   : > { %v889_v14 = vpop.permute.xlu1 %888  ;;  %v879_v15 = vpop.permute.xlu0 %878 }
 0x2ff   : > { %892 = vst.msk [vmem:[#allocation2] sm:$0x8] %vm891_vm7, %v889_v14  ;;  %v3012_v14 = vld [vmem:[#allocation12 + $0x2] ss:$0 sm:$0xff] }
 0x300   : > { %882 = vst.msk [vmem:[#allocation2] sm:$0x2] %vm881_vm8, %v879_v15 }
 0x302   : > { %v899_v16 = vpop.permute.xlu1 %898  ;;  %v894_v17 = vpop.permute.xlu0 %893 }
 0x303   : > { %902 = vst.msk [vmem:[#allocation2] sm:$0x20] %vm901_vm9, %v899_v16 }
 0x304   : > { %897 = vst.msk [vmem:[#allocation2] sm:$0x10] %vm896_vm10, %v894_v17 }
 0x306   : > { %v904_v18 = vpop.permute.xlu0 %903 }
 0x307   : > { %907 = vst.msk [vmem:[#allocation2] sm:$0x40] %vm906_vm11, %v904_v18 }
 0x30a   : > { %v1030_v19 = vpop.permute.xlu0 %1029 }
 0x30b   : > { %3203 = vmatmul.mubr.msk.bf16.vlgmr.msra.gmra.mrb[16].mxu1 %vm825_vm1, %v1030_v19 }
 0x30c   : > { %3214 = vmatprep.mubr.msk.bf16.mxu1 %vm3855_vm2, %v3854_v26 }
 0x30e   : > { %v910_v20 = vld [vmem:[#allocation2] sm:$0xff] }
 0x30f   : > { %v949_v21 = vadd.f32 %v948_v8, %v910_v20 }
 0x311   : > { %v955_v22 = vsel %vm954_vm12, %v949_v21, -inf }
 0x312   : > { %956 = vmax.xlane.f32.xlu1 %v955_v22 }
 0x323   : > { %1114 = vrot.lane.b32.xlu1 %v4201_v41, %s3863_s29 }
 0x39f   : > { %v957_v23 = vpop.xlane.xlu1 %956 }
 0x3a0   : > { %v958_v24 = vsub.f32 %v949_v21, %v957_v23 }
 0x3a2   : > { %v959_v25 = vmul.f32 1.442695, %v958_v24 }
 0x3a3   : > { %v1115_v41 = vpop.permute.xlu1 %1114 }
 0x3a4   : > { %3530 = vpow2.f32 %v959_v25  ;;  %v1117_v44 = vsel %vm825_vm1, %v1115_v41, 0 }
 0x3ae   : > { %v3531_v27 = vpop.eup %3530 }
 0x3af   : > { %v961_v28 = vsel %vm954_vm12, %v3531_v27, 0.0 }
 0x3b0   : > { %962 = vadd.xlane.f32.xlu0 %v961_v28 }
 0x3de   : > { %v1076_v31 = vpop.f32.mrb[16].mxu1 }
 0x3df   : > { %v1077_v33 = vadd.f32 %v3006_v29, %v1076_v31  ;;  %v3204_v34 = vpop.f32.mrb[17].mxu1 }
 0x3e0   : > { %v1079_v35 = vpop.f32.mrb[18].mxu1 }
 0x3e1   : > { %1111 = vst.msk [vmem:[#allocation2] sm:$0x80] %vm908_vm4, %v1077_v33  ;;  %v3205_v37 = vpop.f32.mrb[19].mxu1  ;;  %1087 = vrot.lane.b32.xlu1 %v1077_v33, %s3859_s17  ;;  %1083 = vrot.lane.b32.xlu0 %v1077_v33, %s3857_s21 }
 0x3e2   : > { %v804_v37 = vpack.c.bf16 %v4203_v42, %v4203_v42 }
 0x3e4   : > { %v1323_v41 = vsel %vm825_vm1, %v804_v37, 0 }
 0x3e5   : > { %1091 = vrot.lane.b32.xlu1 %v1077_v33, %s3856_s8  ;;  %1095 = vrot.lane.b32.xlu0 %v1077_v33, %s3858_s9 }
 0x3e9   : > { %1099 = vrot.lane.b32.xlu1 %v1077_v33, %s3861_s19  ;;  %1103 = vrot.lane.b32.xlu0 %v1077_v33, %s3860_s10 }
 0x3ed   : > { %1107 = vrot.lane.b32.xlu1 %v1077_v33, %s3862_s14 }
 0x43d   : > { %v963_v38 = vpop.xlane.xlu0 %962 }
 0x43e   : > { %3532 = vrcp.f32 %v963_v38 }
 0x448   : > { %v3533_v39 = vpop.eup %3532 }
 0x449   : > { %v965_v40 = vmul.f32 %v3533_v39, %v3531_v27 }
 0x44b   : > { %v966_v43 = vpack.c.bf16 %v965_v40, %v965_v40 }
 0x44d   : > { %3197 = vmatmul.mubr.msk.bf16.vlgmr.msra.gmra.mrb[16].mxu0 %vm954_vm12, %v966_v43 }
 0x44e   : > { %3207 = vmatpush3.bf16.xpose.msra.mxu0 %v1117_v44  ;;  %3208 = vmatprep.mubr.msk.bf16.mxu0 %vm3855_vm2, %v3854_v26  ;;  %v3489_v44 = vld [vmem:[#allocation9 + $0x18] sm:$0xff]  }
 0x44f   : > { %3218 = vmatprep.subr.bf16.mxu0 %v3854_v26  ;;  %v1448_v42 = vsel %vm825_vm1, %v3489_v44, 0 }
 0x453   : > { %v1084_v50 = vpop.permute.xlu0 %1083  ;;  %v1088_v51 = vpop.permute.xlu1 %1087 }
 0x454   : > { %1086 = vst.msk [vmem:[#allocation2] sm:$0x1] %vm876_vm6, %v1084_v50 }
 0x455   : > { %1090 = vst.msk [vmem:[#allocation2] sm:$0x2] %vm881_vm8, %v1088_v51  ;;  %3209 = vmatmul.mubr.msk.bf16.vlgmr.msra.gmra.mrb[20].mxu0 %vm825_vm1, %v1030_v19 }
 0x456   : > { %3219 = vmatpush3.bf16.xpose.msra.mxu0 %v1249_v54  ;;  %3220 = vmatprep.mubr.msk.bf16.mxu0 %vm3855_vm2, %v3854_v26 }
 0x457   : > { %v1096_v58 = vpop.permute.xlu0 %1095  ;;  %v1092_v59 = vpop.permute.xlu1 %1091  ;;  %3230 = vmatprep.subr.bf16.mxu0 %v3854_v26 }
 0x458   : > { %1098 = vst.msk [vmem:[#allocation2] sm:$0x8] %vm891_vm7, %v1096_v58 }
 0x459   : > { %1094 = vst.msk [vmem:[#allocation2] sm:$0x4] %vm886_vm5, %v1092_v59 }
 0x45b   : > { %v1104_v0 = vpop.permute.xlu0 %1103  ;;  %v1100_v1 = vpop.permute.xlu1 %1099 }
 0x45c   : > { %1106 = vst.msk [vmem:[#allocation2] sm:$0x20] %vm901_vm9, %v1104_v0 }
 0x45d   : > { %1102 = vst.msk [vmem:[#allocation2] sm:$0x10] %vm896_vm10, %v1100_v1  ;;  %3221 = vmatmul.mubr.msk.bf16.vlgmr.msra.gmra.mrb[24].mxu0 %vm825_vm1, %v4286_v63 }
 0x45e   : > { %3231 = vmatpush3.bf16.msra.mxu0 %v1381_v36  ;;  %3232 = vmatprep.mubr.msk.bf16.mxu0 %vm3855_vm2, %v3854_v26  ;;  %v3017_v36 = vld [vmem:[#allocation12 + $0x3] ss:$0 sm:$0xff] }
 0x45f   : > { %v1108_v48 = vpop.permute.xlu1 %1107  ;;  %3242 = vmatprep.subr.bf16.mxu0 %v3854_v26 }
 0x460   : > { %1110 = vst.msk [vmem:[#allocation2] sm:$0x40] %vm906_vm11, %v1108_v48 }
 0x467   : > { %v1112_v7 = vld [vmem:[#allocation2] sm:$0xff] }
 0x520   : > { %v1008_v2 = vpop.f32.mrb[16].mxu0 }
 0x521   : > { %v1014_v3 = vpack.c.bf16 %v1008_v2, %v1008_v2  ;;  %v3198_v4 = vpop.f32.mrb[17].mxu0 }
 0x522   : > { %v1011_v5 = vpop.f32.mrb[18].mxu0 }
 0x523   : > { %1016 = vst.msk [vmem:[#allocation3] sm:$0xf] %vm1015_vm13, %v1014_v3  ;;  %v3199_v6 = vpop.f32.mrb[19].mxu0 }
 0x528   : > { %v1153_v8 = vpop.f32.mrb[20].mxu0 }
 0x529   : > { %v1154_v9 = vadd.f32 %v1153_v8, %v1112_v7  ;;  %v3210_v10 = vpop.f32.mrb[21].mxu0 }
 0x52a   : > { %v1156_v11 = vpop.f32.mrb[22].mxu0 }
 0x52b   : > { %v3211_v12 = vpop.f32.mrb[23].mxu0  ;;  %v1159_v13 = vsel %vm954_vm12, %v1154_v9, -inf }
 0x52c   : > { %1160 = vmax.xlane.f32.xlu0 %v1159_v13 }
 0x530   : > { %v1285_v15 = vpop.f32.mrb[24].mxu0 }
 0x531   : > { %v1286_v16 = vadd.f32 %v3012_v14, %v1285_v15  ;;  %v3222_v17 = vpop.f32.mrb[25].mxu0 }
 0x532   : > { %v1288_v18 = vpop.f32.mrb[26].mxu0 }
 0x533   : > { %1320 = vst.msk [vmem:[#allocation2] sm:$0x80] %vm908_vm4, %v1286_v16  ;;  %v3223_v19 = vpop.f32.mrb[27].mxu0 }
 0x542   : > { %1172 = vrot.lane.b32.xlu0 %v4208_v47, %s3863_s29 }
 0x546   : > { %1296 = vrot.lane.b32.xlu0 %v1286_v16, %s3859_s17 }
 0x54a   : > { %1304 = vrot.lane.b32.xlu0 %v1286_v16, %s3858_s9 }
 0x54e   : > { %1312 = vrot.lane.b32.xlu0 %v1286_v16, %s3860_s10 }
 0x5b9   : > { %v1161_v20 = vpop.xlane.xlu0 %1160 }
 0x5ba   : > { %v1162_v21 = vsub.f32 %v1154_v9, %v1161_v20 }
 0x5bc   : > { %v1163_v22 = vmul.f32 1.442695, %v1162_v21 }
 0x5bd   : > { %v1173_v23 = vpop.permute.xlu0 %1172 }
 0x5be   : > { %3534 = vpow2.f32 %v1163_v22  ;;  %v1178_v24 = vsel %vm970_vm3, %v1173_v23, 0 }
 0x5bf   : > { %3213 = vmatpush3.bf16.msra.mxu1 %v1178_v24  ;;  %v785_v24 = vsub.s32 2, %v4187_v30 }
 0x5c0   : > { %3224 = vmatprep.subr.bf16.mxu1 %v3854_v26 }
 0x5c1   : > { %v1297_v25 = vpop.permute.xlu0 %1296 }
 0x5c2   : > { %1299 = vst.msk [vmem:[#allocation2] sm:$0x2] %vm881_vm8, %v1297_v25  ;;  %v3490_v25 = vld [vmem:[#allocation9 + $0x20] sm:$0xff]  }
 0x5c5   : > { %v1305_v47 = vpop.permute.xlu0 %1304 }
 0x5c6   : > { %1307 = vst.msk [vmem:[#allocation2] sm:$0x8] %vm891_vm7, %v1305_v47  ;;  %v786_v47 = vrot.slane %v4190_v32, %v785_v24 }
 0x5c8   : > { %v3535_v27 = vpop.eup %3534 }
 0x5c9   : > { %v1313_v28 = vpop.permute.xlu0 %1312  ;;  %v1165_v29 = vsel %vm954_vm12, %v3535_v27, 0.0 }
 0x5ca   : > { %1315 = vst.msk [vmem:[#allocation2] sm:$0x20] %vm901_vm9, %v1313_v28  ;;  %1166 = vadd.xlane.f32.xlu1 %v1165_v29  ;;  %v797_v28 = vadd.f32 %v786_v47, %v4219_v52  ;;  %v4377_v29 = vpack.c.bf16 %v4227_v60, %v4227_v60 }
 0x5db   : > { %1292 = vrot.lane.b32.xlu1 %v1286_v16, %s3857_s21 }
 0x5df   : > { %1300 = vrot.lane.b32.xlu1 %v1286_v16, %s3856_s8 }
 0x5e3   : > { %1308 = vrot.lane.b32.xlu1 %v1286_v16, %s3861_s19 }
 0x5e7   : > { %1316 = vrot.lane.b32.xlu1 %v1286_v16, %s3862_s14 }
 0x5eb   : > { %1437 = vrot.lane.b32.xlu1 %v4286_v63, %s3863_s29 }
 0x657   : > { %v1167_v31 = vpop.xlane.xlu1 %1166 }
 0x658   : > { %3536 = vrcp.f32 %v1167_v31  ;;  %v4379_v31 = vpack.c.bf16 %v797_v28, %v797_v28 }
 0x65b   : > { %v1293_v33 = vpop.permute.xlu1 %1292 }
 0x65c   : > { %1295 = vst.msk [vmem:[#allocation2] sm:$0x1] %vm876_vm6, %v1293_v33  ;;  %v1788_v33 = vsel %vm970_vm3, %v4377_v29, 0 }
 0x65f   : > { %v1301_v34 = vpop.permute.xlu1 %1300 }
 0x660   : > { %1303 = vst.msk [vmem:[#allocation2] sm:$0x4] %vm886_vm5, %v1301_v34 }
 0x662   : > { %v3537_v35 = vpop.eup %3536 }
 0x663   : > { %v1169_v38 = vmul.f32 %v3537_v35, %v3535_v27  ;;  %v1309_v39 = vpop.permute.xlu1 %1308  ;;  %v1656_v27 = vsel %vm825_vm1, %v3490_v25, 0 }
 0x664   : > { %1311 = vst.msk [vmem:[#allocation2] sm:$0x10] %vm896_vm10, %v1309_v39 }
 0x665   : > { %v1170_v40 = vpack.c.bf16 %v1169_v38, %v1169_v38 }
 0x667   : > { %3215 = vmatmul.mubr.msk.bf16.vlgmr.msra.gmra.mrb[20].mxu1 %vm954_vm12, %v1170_v40  ;;  %v1317_v43 = vpop.permute.xlu1 %1316 }
 0x668   : > { %3225 = vmatpush3.bf16.xpose.msra.mxu1 %v1323_v41  ;;  %1319 = vst.msk [vmem:[#allocation2] sm:$0x40] %vm906_vm11, %v1317_v43  ;;  %3226 = vmatprep.mubr.msk.bf16.mxu1 %vm3855_vm2, %v3854_v26 }
 0x669   : > { %3236 = vmatprep.subr.bf16.mxu1 %v3854_v26 }
 0x66b   : > { %v4335_v45 = vpop.permute.xlu1 %1437 }
 0x66f   : > { %3227 = vmatmul.mubr.msk.bf16.vlgmr.msra.gmra.mrb[24].mxu1 %vm825_vm1, %v4286_v63  ;;  %v1321_v54 = vld [vmem:[#allocation2] sm:$0xff] }
 0x670   : > { %3237 = vmatpush3.bf16.xpose.msra.mxu1 %v1448_v42  ;;  %3238 = vmatprep.mubr.msk.bf16.mxu1 %vm3855_vm2, %v3854_v26 }
 0x671   : > { %3248 = vmatprep.subr.bf16.mxu1 %v3854_v26 }
 0x677   : > { %3239 = vmatmul.mubr.msk.bf16.vlgmr.msra.gmra.mrb[28].mxu1 %vm825_vm1, %v4335_v45 }
 0x678   : > { %3250 = vmatprep.mubr.msk.bf16.mxu1 %vm3855_vm2, %v3854_v26 }
 0x73a   : > { %v4341_v46 = vpop.f32.mrb[20].mxu1 }
 0x73b   : > { %v3216_v49 = vpop.f32.mrb[21].mxu1 }
 0x73c   : > { %v1217_v50 = vpop.f32.mrb[22].mxu1 }
 0x73d   : > { %v3217_v51 = vpop.f32.mrb[23].mxu1 }
 0x742   : > { %v1359_v55 = vpop.f32.mrb[24].mxu1 }
 0x743   : > { %v1360_v58 = vadd.f32 %v1359_v55, %v1321_v54  ;;  %v3228_v59 = vpop.f32.mrb[25].mxu1 }
 0x744   : > { %v1362_v63 = vpop.f32.mrb[26].mxu1 }
 0x745   : > { %v3229_v0 = vpop.f32.mrb[27].mxu1  ;;  %v1365_v1 = vsel %vm954_vm12, %v1360_v58, -inf }
 0x746   : > { %1366 = vmax.xlane.f32.xlu0 %v1365_v1 }
 0x74a   : > { %v1484_v48 = vpop.f32.mrb[28].mxu1 }
 0x74b   : > { %v1485_v2 = vadd.f32 %v3017_v36, %v1484_v48  ;;  %v3240_v3 = vpop.f32.mrb[29].mxu1 }
 0x74c   : > { %v1487_v4 = vpop.f32.mrb[30].mxu1 }
 0x74d   : > { %1519 = vst.msk [vmem:[#allocation2] sm:$0x80] %vm908_vm4, %v1485_v2  ;;  %v3241_v5 = vpop.f32.mrb[31].mxu1 }
 0x75c   : > { %1522 = vrot.lane.b32.xlu0 %v804_v37, %s3863_s29 }
 0x760   : > { %1495 = vrot.lane.b32.xlu0 %v1485_v2, %s3859_s17 }
 0x764   : > { %1499 = vrot.lane.b32.xlu0 %v1485_v2, %s3856_s8 }
 0x768   : > { %1507 = vrot.lane.b32.xlu0 %v1485_v2, %s3861_s19 }
 0x76c   : > { %1515 = vrot.lane.b32.xlu0 %v1485_v2, %s3862_s14 }
 0x7d3   : > { %v1367_v6 = vpop.xlane.xlu0 %1366 }
 0x7d4   : > { %v1368_v7 = vsub.f32 %v1360_v58, %v1367_v6 }
 0x7d6   : > { %v1369_v8 = vmul.f32 1.442695, %v1368_v7 }
 0x7d7   : > { %v1523_v9 = vpop.permute.xlu0 %1522 }
 0x7d8   : > { %3538 = vpow2.f32 %v1369_v8  ;;  %v1525_v23 = vsel %vm825_vm1, %v1523_v9, 0  ;;  %v805_v8 = vpack.c.bf16 %v4223_v56, %v4223_v56 }
 0x7db   : > { %v1496_v10 = vpop.permute.xlu0 %1495 }
 0x7dc   : > { %1498 = vst.msk [vmem:[#allocation2] sm:$0x2] %vm881_vm8, %v1496_v10 }
 0x7df   : > { %v1500_v11 = vpop.permute.xlu0 %1499 }
 0x7e0   : > { %1502 = vst.msk [vmem:[#allocation2] sm:$0x4] %vm886_vm5, %v1500_v11 }
 0x7e2   : > { %v3539_v12 = vpop.eup %3538 }
 0x7e3   : > { %v1508_v13 = vpop.permute.xlu0 %1507  ;;  %v1371_v14 = vsel %vm954_vm12, %v3539_v12, 0.0 }
 0x7e4   : > { %1510 = vst.msk [vmem:[#allocation2] sm:$0x10] %vm896_vm10, %v1508_v13  ;;  %1372 = vadd.xlane.f32.xlu1 %v1371_v14  ;;  %v3491_v14 = vld [vmem:[#allocation9 + $0x28] sm:$0xff]  }
 0x7e5   : > { %v1855_v56 = vsel %vm825_vm1, %v3491_v14, 0 }
 0x7e7   : > { %v1516_v15 = vpop.permute.xlu0 %1515 }
 0x7e8   : > { %1518 = vst.msk [vmem:[#allocation2] sm:$0x40] %vm906_vm11, %v1516_v15 }
 0x7f5   : > { %1491 = vrot.lane.b32.xlu1 %v1485_v2, %s3857_s21 }
 0x7f9   : > { %1503 = vrot.lane.b32.xlu1 %v1485_v2, %s3858_s9 }
 0x7fd   : > { %1511 = vrot.lane.b32.xlu1 %v1485_v2, %s3860_s10 }
 0x871   : > { %v1373_v16 = vpop.xlane.xlu1 %1372 }
 0x872   : > { %3540 = vrcp.f32 %v1373_v16 }
 0x875   : > { %v1492_v17 = vpop.permute.xlu1 %1491 }
 0x876   : > { %1494 = vst.msk [vmem:[#allocation2] sm:$0x1] %vm876_vm6, %v1492_v17 }
 0x879   : > { %v1504_v18 = vpop.permute.xlu1 %1503 }
 0x87a   : > { %1506 = vst.msk [vmem:[#allocation2] sm:$0x8] %vm891_vm7, %v1504_v18 }
 0x87c   : > { %v3541_v19 = vpop.eup %3540 }
 0x87d   : > { %v1375_v20 = vmul.f32 %v3541_v19, %v3539_v12  ;;  %v1512_v21 = vpop.permute.xlu1 %1511  ;;  %v1730_v12 = vsel %vm825_vm1, %v805_v8, 0 }
 0x87e   : > { %1514 = vst.msk [vmem:[#allocation2] sm:$0x20] %vm901_vm9, %v1512_v21 }
 0x87f   : > { %v1376_v22 = vpack.c.bf16 %v1375_v20, %v1375_v20 }
 0x881   : > { %3233 = vmatmul.mubr.msk.bf16.vlgmr.msra.gmra.mrb[28].mxu0 %vm954_vm12, %v1376_v22 }
 0x882   : > { %3243 = vmatpush3.bf16.xpose.msra.mxu0 %v1525_v23  ;;  %3244 = vmatprep.mubr.msk.bf16.mxu0 %vm3855_vm2, %v3854_v26 }
 0x883   : > { %3254 = vmatprep.subr.bf16.mxu0 %v3854_v26 }
 0x885   : > { %v1520_v38 = vld [vmem:[#allocation2] sm:$0xff] }
 0x889   : > { %3245 = vmatmul.mubr.msk.bf16.vlgmr.msra.gmra.mrb[32].mxu0 %vm825_vm1, %v4335_v45  ;;  %v3023_v45 = vld [vmem:[#allocation12 + $0x4] ss:$0 sm:$0xff] }
 0x88a   : > { %3255 = vmatpush3.bf16.xpose.msra.mxu0 %v1656_v27  ;;  %3256 = vmatprep.mubr.msk.bf16.mxu0 %vm3855_vm2, %v3854_v26  ;;  %v3028_v27 = vld [vmem:[#allocation12 + $0x5] ss:$0 sm:$0xff] }
 0x88b   : > { %3266 = vmatprep.subr.bf16.mxu0 %v3854_v26 }
 0x891   : > { %3257 = vmatmul.mubr.msk.bf16.vlgmr.msra.gmra.mrb[36].mxu0 %vm825_vm1, %v4379_v31 }
 0x892   : > { %3267 = vmatpush3.bf16.msra.mxu0 %v1788_v33  ;;  %3268 = vmatprep.mubr.msk.bf16.mxu0 %vm3855_vm2, %v3854_v26 }
 0x893   : > { %3278 = vmatprep.subr.bf16.mxu0 %v3854_v26 }
 0x954   : > { %v1417_v52 = vpop.f32.mrb[28].mxu0 }
 0x955   : > { %v1423_v34 = vpack.c.bf16 %v1417_v52, %v1417_v52  ;;  %v3234_v35 = vpop.f32.mrb[29].mxu0 }
 0x956   : > { %v1420_v37 = vpop.f32.mrb[30].mxu0 }
 0x957   : > { %1424 = vst.msk [vmem:[#allocation3 + $0x4] sm:$0xf] %vm1015_vm13, %v1423_v34  ;;  %v3235_v60 = vpop.f32.mrb[31].mxu0 }
 0x95c   : > { %v1561_v39 = vpop.f32.mrb[32].mxu0 }
 0x95d   : > { %v1562_v40 = vadd.f32 %v1561_v39, %v1520_v38  ;;  %v3246_v41 = vpop.f32.mrb[33].mxu0 }
 0x95e   : > { %v1564_v43 = vpop.f32.mrb[34].mxu0 }
 0x95f   : > { %v3247_v44 = vpop.f32.mrb[35].mxu0  ;;  %v1567_v42 = vsel %vm954_vm12, %v1562_v40, -inf }
 0x960   : > { %1568 = vmax.xlane.f32.xlu1 %v1567_v42 }
 0x964   : > { %v1692_v49 = vpop.f32.mrb[36].mxu0 }
 0x965   : > { %v1693_v50 = vadd.f32 %v3023_v45, %v1692_v49  ;;  %v3258_v51 = vpop.f32.mrb[37].mxu0 }
 0x966   : > { %v1695_v54 = vpop.f32.mrb[38].mxu0 }
 0x967   : > { %1727 = vst.msk [vmem:[#allocation2] sm:$0x80] %vm908_vm4, %v1693_v50  ;;  %v3259_v55 = vpop.f32.mrb[39].mxu0 }
 0x971   : > { %1699 = vrot.lane.b32.xlu1 %v1693_v50, %s3857_s21 }
 0x975   : > { %1703 = vrot.lane.b32.xlu1 %v1693_v50, %s3859_s17 }
 0x979   : > { %1711 = vrot.lane.b32.xlu1 %v1693_v50, %s3858_s9 }
 0x97d   : > { %1719 = vrot.lane.b32.xlu1 %v1693_v50, %s3860_s10 }
 0x9ed   : > { %v1569_v58 = vpop.xlane.xlu1 %1568 }
 0x9ee   : > { %v1570_v59 = vsub.f32 %v1562_v40, %v1569_v58 }
 0x9f0   : > { %v1571_v63 = vmul.f32 1.442695, %v1570_v59 }
 0x9f1   : > { %v1700_v0 = vpop.permute.xlu1 %1699 }
 0x9f2   : > { %3542 = vpow2.f32 %v1571_v63  ;;  %1702 = vst.msk [vmem:[#allocation2] sm:$0x1] %vm876_vm6, %v1700_v0  ;;  %v789_v63 = vsub.s32 3, %v4187_v30  ;;  %v3492_v0 = vld [vmem:[#allocation9 + $0x30] sm:$0xff]   ;;  %v4467_v30 = vpack.c.bf16 %v4229_v61, %v4229_v61 }
 0x9f5   : > { %v1704_v1 = vpop.permute.xlu1 %1703 }
 0x9f6   : > { %1706 = vst.msk [vmem:[#allocation2] sm:$0x2] %vm881_vm8, %v1704_v1  ;;  %v790_v1 = vrot.slane %v4190_v32, %v789_v63  ;;  %v2195_v32 = vsel %vm970_vm3, %v4467_v30, 0 }
 0x9f9   : > { %v1712_v36 = vpop.permute.xlu1 %1711 }
 0x9fa   : > { %1714 = vst.msk [vmem:[#allocation2] sm:$0x8] %vm891_vm7, %v1712_v36  ;;  %v2063_v36 = vsel %vm825_vm1, %v3492_v0, 0 }
 0x9fc   : > { %v3543_v48 = vpop.eup %3542 }
 0x9fd   : > { %v1720_v2 = vpop.permute.xlu1 %1719  ;;  %v1573_v3 = vsel %vm954_vm12, %v3543_v48, 0.0 }
 0x9fe   : > { %1722 = vst.msk [vmem:[#allocation2] sm:$0x20] %vm901_vm9, %v1720_v2  ;;  %1574 = vadd.xlane.f32.xlu0 %v1573_v3 }
 0xa14   : > { %1580 = vrot.lane.b32.xlu0 %v4284_v62, %s3863_s29 }
 0xa18   : > { %1707 = vrot.lane.b32.xlu0 %v1693_v50, %s3856_s8 }
 0xa1c   : > { %1715 = vrot.lane.b32.xlu0 %v1693_v50, %s3861_s19 }
 0xa20   : > { %1723 = vrot.lane.b32.xlu0 %v1693_v50, %s3862_s14 }
 0xa24   : > { %1844 = vrot.lane.b32.xlu0 %v4379_v31, %s3863_s29 }
 0xa8b   : > { %v1575_v4 = vpop.xlane.xlu0 %1574 }
 0xa8c   : > { %3544 = vrcp.f32 %v1575_v4 }
 0xa8f   : > { %v1581_v5 = vpop.permute.xlu0 %1580 }
 0xa90   : > { %v1586_v6 = vsel %vm970_vm3, %v1581_v5, 0 }
 0xa91   : > { %3249 = vmatpush3.bf16.msra.mxu1 %v1586_v6 }
 0xa92   : > { %3260 = vmatprep.subr.bf16.mxu1 %v3854_v26 }
 0xa93   : > { %v1708_v7 = vpop.permute.xlu0 %1707 }
 0xa94   : > { %1710 = vst.msk [vmem:[#allocation2] sm:$0x4] %vm886_vm5, %v1708_v7 }
 0xa96   : > { %v3545_v62 = vpop.eup %3544 }
 0xa97   : > { %v1577_v9 = vmul.f32 %v3545_v62, %v3543_v48  ;;  %v1716_v10 = vpop.permute.xlu0 %1715  ;;  %v798_v48 = vadd.f32 %v790_v1, %v4221_v53 }
 0xa98   : > { %1718 = vst.msk [vmem:[#allocation2] sm:$0x10] %vm896_vm10, %v1716_v10 }
 0xa99   : > { %v1578_v11 = vpack.c.bf16 %v1577_v9, %v1577_v9  ;;  %v4469_v2 = vpack.c.bf16 %v798_v48, %v798_v48 }
 0xa9b   : > { %3251 = vmatmul.mubr.msk.bf16.vlgmr.msra.gmra.mrb[32].mxu1 %vm954_vm12, %v1578_v11  ;;  %v1724_v13 = vpop.permute.xlu0 %1723 }
 0xa9c   : > { %3261 = vmatpush3.bf16.xpose.msra.mxu1 %v1730_v12  ;;  %1726 = vst.msk [vmem:[#allocation2] sm:$0x40] %vm906_vm11, %v1724_v13  ;;  %3262 = vmatprep.mubr.msk.bf16.mxu1 %vm3855_vm2, %v3854_v26  ;;  %v3034_v12 = vld [vmem:[#allocation12 + $0x6] ss:$0 sm:$0xff] }
 0xa9d   : > { %3272 = vmatprep.subr.bf16.mxu1 %v3854_v26 }
 0xa9f   : > { %v4425_v15 = vpop.permute.xlu0 %1844 }
 0xaa3   : > { %3263 = vmatmul.mubr.msk.bf16.vlgmr.msra.gmra.mrb[36].mxu1 %vm825_vm1, %v4379_v31  ;;  %v1728_v20 = vld [vmem:[#allocation2] sm:$0xff] }
 0xaa4   : > { %3273 = vmatpush3.bf16.xpose.msra.mxu1 %v1855_v56  ;;  %3274 = vmatprep.mubr.msk.bf16.mxu1 %vm3855_vm2, %v3854_v26 }
 0xaa5   : > { %3284 = vmatprep.subr.bf16.mxu1 %v3854_v26 }
 0xaab   : > { %3275 = vmatmul.mubr.msk.bf16.vlgmr.msra.gmra.mrb[40].mxu1 %vm825_vm1, %v4425_v15 }
 0xaac   : > { %3286 = vmatprep.mubr.msk.bf16.mxu1 %vm3855_vm2, %v3854_v26 }
 0xb6e   : > { %v4431_v16 = vpop.f32.mrb[32].mxu1 }
 0xb6f   : > { %v3252_v17 = vpop.f32.mrb[33].mxu1 }
 0xb70   : > { %v1625_v18 = vpop.f32.mrb[34].mxu1 }
 0xb71   : > { %v3253_v19 = vpop.f32.mrb[35].mxu1 }
 0xb76   : > { %v1766_v21 = vpop.f32.mrb[36].mxu1 }
 0xb77   : > { %v1767_v22 = vadd.f32 %v1766_v21, %v1728_v20  ;;  %v3264_v23 = vpop.f32.mrb[37].mxu1 }
 0xb78   : > { %v1769_v24 = vpop.f32.mrb[38].mxu1 }
 0xb79   : > { %v3265_v25 = vpop.f32.mrb[39].mxu1  ;;  %v1772_v47 = vsel %vm954_vm12, %v1767_v22, -inf }
 0xb7a   : > { %1773 = vmax.xlane.f32.xlu1 %v1772_v47 }
 0xb7e   : > { %v1891_v28 = vpop.f32.mrb[40].mxu1 }
 0xb7f   : > { %v1892_v31 = vadd.f32 %v3028_v27, %v1891_v28  ;;  %v3276_v33 = vpop.f32.mrb[41].mxu1 }
 0xb80   : > { %v1894_v52 = vpop.f32.mrb[42].mxu1 }
 0xb81   : > { %1926 = vst.msk [vmem:[#allocation2] sm:$0x80] %vm908_vm4, %v1892_v31  ;;  %v3277_v34 = vpop.f32.mrb[43].mxu1  ;;  %v806_v52 = vpack.c.bf16 %v4225_v57, %v4225_v57 }
 0xb8b   : > { %1929 = vrot.lane.b32.xlu1 %v805_v8, %s3863_s29 }
 0xb8f   : > { %1902 = vrot.lane.b32.xlu1 %v1892_v31, %s3859_s17 }
 0xb93   : > { %1906 = vrot.lane.b32.xlu1 %v1892_v31, %s3856_s8 }
 0xb97   : > { %1914 = vrot.lane.b32.xlu1 %v1892_v31, %s3861_s19 }
 0xb9b   : > { %1922 = vrot.lane.b32.xlu1 %v1892_v31, %s3862_s14 }
 0xc07   : > { %v1774_v35 = vpop.xlane.xlu1 %1773 }
 0xc08   : > { %v1775_v37 = vsub.f32 %v1767_v22, %v1774_v35 }
 0xc0a   : > { %v1776_v60 = vmul.f32 1.442695, %v1775_v37 }
 0xc0b   : > { %v1930_v38 = vpop.permute.xlu1 %1929 }
 0xc0c   : > { %3546 = vpow2.f32 %v1776_v60  ;;  %v1932_v59 = vsel %vm825_vm1, %v1930_v38, 0  ;;  %v2137_v60 = vsel %vm825_vm1, %v806_v52, 0 }
 0xc0f   : > { %v1903_v39 = vpop.permute.xlu1 %1902 }
 0xc10   : > { %1905 = vst.msk [vmem:[#allocation2] sm:$0x2] %vm881_vm8, %v1903_v39  ;;  %v3493_v39 = vld [vmem:[#allocation9 + $0x38] sm:$0xff]  }
 0xc11   : > { %v2262_v57 = vsel %vm825_vm1, %v3493_v39, 0  ;;  %v3504_v39 = vld [vmem:[#allocation13 + $0x68] sm:$0xff]  }
 0xc13   : > { %v1907_v40 = vpop.permute.xlu1 %1906 }
 0xc14   : > { %1909 = vst.msk [vmem:[#allocation2] sm:$0x4] %vm886_vm5, %v1907_v40 }
 0xc16   : > { %v3547_v41 = vpop.eup %3546 }
 0xc17   : > { %v1915_v43 = vpop.permute.xlu1 %1914  ;;  %v1778_v44 = vsel %vm954_vm12, %v3547_v41, 0.0 }
 0xc18   : > { %1917 = vst.msk [vmem:[#allocation2] sm:$0x10] %vm896_vm10, %v1915_v43  ;;  %1779 = vadd.xlane.f32.xlu0 %v1778_v44 }
 0xc1b   : > { %v1923_v42 = vpop.permute.xlu1 %1922 }
 0xc1c   : > { %1925 = vst.msk [vmem:[#allocation2] sm:$0x40] %vm906_vm11, %v1923_v42 }
 0xc2e   : > { %1898 = vrot.lane.b32.xlu0 %v1892_v31, %s3857_s21 }
 0xc32   : > { %1910 = vrot.lane.b32.xlu0 %v1892_v31, %s3858_s9 }
 0xc36   : > { %1918 = vrot.lane.b32.xlu0 %v1892_v31, %s3860_s10 }
 0xca5   : > { %v1780_v45 = vpop.xlane.xlu0 %1779 }
 0xca6   : > { %3548 = vrcp.f32 %v1780_v45 }
 0xca9   : > { %v1899_v49 = vpop.permute.xlu0 %1898 }
 0xcaa   : > { %1901 = vst.msk [vmem:[#allocation2] sm:$0x1] %vm876_vm6, %v1899_v49 }
 0xcad   : > { %v1911_v50 = vpop.permute.xlu0 %1910 }
 0xcae   : > { %1913 = vst.msk [vmem:[#allocation2] sm:$0x8] %vm891_vm7, %v1911_v50 }
 0xcb0   : > { %v3549_v51 = vpop.eup %3548 }
 0xcb1   : > { %v1782_v54 = vmul.f32 %v3549_v51, %v3547_v41  ;;  %v1919_v55 = vpop.permute.xlu0 %1918 }
 0xcb2   : > { %1921 = vst.msk [vmem:[#allocation2] sm:$0x20] %vm901_vm9, %v1919_v55 }
 0xcb3   : > { %v1783_v58 = vpack.c.bf16 %v1782_v54, %v1782_v54 }
 0xcb5   : > { %3269 = vmatmul.mubr.msk.bf16.vlgmr.msra.gmra.mrb[40].mxu0 %vm954_vm12, %v1783_v58 }
 0xcb6   : > { %3279 = vmatpush3.bf16.xpose.msra.mxu0 %v1932_v59  ;;  %3280 = vmatprep.mubr.msk.bf16.mxu0 %vm3855_vm2, %v3854_v26  ;;  %v3039_v59 = vld [vmem:[#allocation12 + $0x7] ss:$0 sm:$0xff] }
 0xcb7   : > { %3290 = vmatprep.subr.bf16.mxu0 %v3854_v26 }
 0xcb9   : > { %v1927_v6 = vld [vmem:[#allocation2] sm:$0xff] }
 0xcbd   : > { %3281 = vmatmul.mubr.msk.bf16.vlgmr.msra.gmra.mrb[44].mxu0 %vm825_vm1, %v4425_v15 }
 0xcbe   : > { %3291 = vmatpush3.bf16.xpose.msra.mxu0 %v2063_v36  ;;  %3292 = vmatprep.mubr.msk.bf16.mxu0 %vm3855_vm2, %v3854_v26 }
 0xcbf   : > { %3302 = vmatprep.subr.bf16.mxu0 %v3854_v26 }
 0xcc5   : > { %3293 = vmatmul.mubr.msk.bf16.vlgmr.msra.gmra.mrb[48].mxu0 %vm825_vm1, %v4469_v2 }
 0xcc6   : > { %3303 = vmatpush3.bf16.msra.mxu0 %v2195_v32  ;;  %3304 = vmatprep.mubr.msk.bf16.mxu0 %vm3855_vm2, %v3854_v26 }
 0xcc7   : > { %3314 = vmatprep.subr.bf16.mxu0 %v3854_v26 }
 0xd88   : > { %v1824_v53 = vpop.f32.mrb[40].mxu0 }
 0xd89   : > { %v1830_v3 = vpack.c.bf16 %v1824_v53, %v1824_v53  ;;  %v3270_v4 = vpop.f32.mrb[41].mxu0 }
 0xd8a   : > { %v1827_v5 = vpop.f32.mrb[42].mxu0 }
 0xd8b   : > { %1831 = vst.msk [vmem:[#allocation3 + $0x8] sm:$0xf] %vm1015_vm13, %v1830_v3  ;;  %v3271_v61 = vpop.f32.mrb[43].mxu0 }
 0xd90   : > { %v1968_v7 = vpop.f32.mrb[44].mxu0 }
 0xd91   : > { %v1969_v62 = vadd.f32 %v1968_v7, %v1927_v6  ;;  %v3282_v8 = vpop.f32.mrb[45].mxu0 }
 0xd92   : > { %v1971_v9 = vpop.f32.mrb[46].mxu0 }
 0xd93   : > { %v3283_v10 = vpop.f32.mrb[47].mxu0  ;;  %v1974_v11 = vsel %vm954_vm12, %v1969_v62, -inf }
 0xd94   : > { %1975 = vmax.xlane.f32.xlu0 %v1974_v11 }
 0xd98   : > { %v2099_v13 = vpop.f32.mrb[48].mxu0 }
 0xd99   : > { %v2100_v14 = vadd.f32 %v3034_v12, %v2099_v13  ;;  %v3294_v56 = vpop.f32.mrb[49].mxu0 }
 0xd9a   : > { %v2102_v15 = vpop.f32.mrb[50].mxu0 }
 0xd9b   : > { %2134 = vst.msk [vmem:[#allocation2] sm:$0x80] %vm908_vm4, %v2100_v14  ;;  %v3295_v17 = vpop.f32.mrb[51].mxu0  ;;  %v3494_v15 = vld [vmem:[#allocation13 + $0x40] sm:$0xff]  }
 0xd9c   : > { %v3495_v17 = vld [vmem:[#allocation13] sm:$0xff]  }
 0xdaa   : > { %1987 = vrot.lane.b32.xlu0 %v4377_v29, %s3863_s29 }
 0xdae   : > { %2110 = vrot.lane.b32.xlu0 %v2100_v14, %s3859_s17 }
 0xdb2   : > { %2118 = vrot.lane.b32.xlu0 %v2100_v14, %s3858_s9 }
 0xdb6   : > { %2126 = vrot.lane.b32.xlu0 %v2100_v14, %s3860_s10 }
 0xe21   : > { %v1976_v18 = vpop.xlane.xlu0 %1975 }
 0xe22   : > { %v1977_v19 = vsub.f32 %v1969_v62, %v1976_v18  ;;  %v3496_v18 = vld [vmem:[#allocation13 + $0x48] sm:$0xff]  }
 0xe24   : > { %v1978_v20 = vmul.f32 1.442695, %v1977_v19  ;;  %v3497_v19 = vld [vmem:[#allocation13 + $0x8] sm:$0xff]  }
 0xe25   : > { %v1988_v21 = vpop.permute.xlu0 %1987 }
 0xe26   : > { %3550 = vpow2.f32 %v1978_v20  ;;  %v1993_v22 = vsel %vm970_vm3, %v1988_v21, 0  ;;  %v3498_v20 = vld [vmem:[#allocation13 + $0x50] sm:$0xff]  }
 0xe27   : > { %3285 = vmatpush3.bf16.msra.mxu1 %v1993_v22  ;;  %v3499_v21 = vld [vmem:[#allocation13 + $0x10] sm:$0xff]   ;;  %v3500_v22 = vld [vmem:[#allocation13 + $0x58] sm:$0xff]  }
 0xe28   : > { %3296 = vmatprep.subr.bf16.mxu1 %v3854_v26 }
 0xe29   : > { %v2111_v23 = vpop.permute.xlu0 %2110 }
 0xe2a   : > { %2113 = vst.msk [vmem:[#allocation2] sm:$0x2] %vm881_vm8, %v2111_v23 }
 0xe2d   : > { %v2119_v29 = vpop.permute.xlu0 %2118 }
 0xe2e   : > { %2121 = vst.msk [vmem:[#allocation2] sm:$0x8] %vm891_vm7, %v2119_v29 }
 0xe30   : > { %v3551_v24 = vpop.eup %3550 }
 0xe31   : > { %v2127_v25 = vpop.permute.xlu0 %2126  ;;  %v1980_v47 = vsel %vm954_vm12, %v3551_v24, 0.0 }
 0xe32   : > { %2129 = vst.msk [vmem:[#allocation2] sm:$0x20] %vm901_vm9, %v2127_v25  ;;  %1981 = vadd.xlane.f32.xlu1 %v1980_v47 }
 0xe43   : > { %2106 = vrot.lane.b32.xlu1 %v2100_v14, %s3857_s21 }
 0xe47   : > { %2114 = vrot.lane.b32.xlu1 %v2100_v14, %s3856_s8 }
 0xe4b   : > { %2122 = vrot.lane.b32.xlu1 %v2100_v14, %s3861_s19 }
 0xe4f   : > { %2130 = vrot.lane.b32.xlu1 %v2100_v14, %s3862_s14 }
 0xe53   : > { %2251 = vrot.lane.b32.xlu1 %v4469_v2, %s3863_s29 }
 0xebf   : > { %v1982_v27 = vpop.xlane.xlu1 %1981 }
 0xec0   : > { %3552 = vrcp.f32 %v1982_v27 }
 0xec3   : > { %v2107_v28 = vpop.permute.xlu1 %2106 }
 0xec4   : > { %2109 = vst.msk [vmem:[#allocation2] sm:$0x1] %vm876_vm6, %v2107_v28 }
 0xec7   : > { %v2115_v31 = vpop.permute.xlu1 %2114 }
 0xec8   : > { %2117 = vst.msk [vmem:[#allocation2] sm:$0x4] %vm886_vm5, %v2115_v31 }
 0xeca   : > { %v3553_v33 = vpop.eup %3552 }
 0xecb   : > { %v1984_v34 = vmul.f32 %v3553_v33, %v3551_v24  ;;  %v2123_v35 = vpop.permute.xlu1 %2122 }
 0xecc   : > { %2125 = vst.msk [vmem:[#allocation2] sm:$0x10] %vm896_vm10, %v2123_v35  ;;  %v3501_v35 = vld [vmem:[#allocation13 + $0x18] sm:$0xff]  }
 0xecd   : > { %v1985_v37 = vpack.c.bf16 %v1984_v34, %v1984_v34 }
 0xecf   : > { %3287 = vmatmul.mubr.msk.bf16.vlgmr.msra.gmra.mrb[44].mxu1 %vm954_vm12, %v1985_v37  ;;  %v2131_v38 = vpop.permute.xlu1 %2130  ;;  %v3086_v37 = vpack.c.bf16 %v4341_v46, %v4341_v46  ;;  %v3508_v46 = vld [vmem:[#allocation13 + $0x78] sm:$0xff]  }
 0xed0   : > { %3297 = vmatpush3.bf16.xpose.msra.mxu1 %v2137_v60  ;;  %2133 = vst.msk [vmem:[#allocation2] sm:$0x40] %vm906_vm11, %v2131_v38  ;;  %3298 = vmatprep.mubr.msk.bf16.mxu1 %vm3855_vm2, %v3854_v26  ;;  %v3502_v60 = vld [vmem:[#allocation13 + $0x60] sm:$0xff]  }
 0xed1   : > { %3308 = vmatprep.subr.bf16.mxu1 %v3854_v26  ;;  %v3503_v38 = vld [vmem:[#allocation13 + $0x20] sm:$0xff]  }
 0xed3   : > { %v2252_v40 = vpop.permute.xlu1 %2251 }
 0xed7   : > { %3299 = vmatmul.mubr.msk.bf16.vlgmr.msra.gmra.mrb[48].mxu1 %vm825_vm1, %v4469_v2  ;;  %v2135_v45 = vld [vmem:[#allocation2] sm:$0xff] }
 0xed8   : > { %3309 = vmatpush3.bf16.xpose.msra.mxu1 %v2262_v57  ;;  %3310 = vmatprep.mubr.msk.bf16.mxu1 %vm3855_vm2, %v3854_v26  ;;  %v3087_v57 = vpack.c.bf16 %v4431_v16, %v4431_v16 }
 0xed9   : > { %3320 = vmatprep.subr.bf16.mxu1 %v3854_v26 }
 0xedf   : > { %3311 = vmatmul.mubr.msk.bf16.vlgmr.msra.gmra.mrb[52].mxu1 %vm825_vm1, %v2252_v40 }
 0xee0   : > { %3322 = vmatprep.mubr.msk.bf16.mxu1 %vm3855_vm2, %v3854_v26 }
 0xfa2   : > { %v4518_v41 = vpop.f32.mrb[44].mxu1 }
 0xfa3   : > { %v3288_v43 = vpop.f32.mrb[45].mxu1 }
 0xfa4   : > { %v2032_v44 = vpop.f32.mrb[46].mxu1  ;;  %v3506_v43 = vld [vmem:[#allocation13 + $0x70] sm:$0xff]  }
 0xfa5   : > { %v3289_v42 = vpop.f32.mrb[47].mxu1  ;;  %v3507_v44 = vld [vmem:[#allocation13 + $0x30] sm:$0xff]  }
 0xfa6   : > { %v3509_v42 = vld [vmem:[#allocation13 + $0x38] sm:$0xff]  }
 0xfaa   : > { %v2173_v49 = vpop.f32.mrb[48].mxu1 }
 0xfab   : > { %v2174_v50 = vadd.f32 %v2173_v49, %v2135_v45  ;;  %v3300_v51 = vpop.f32.mrb[49].mxu1 }
 0xfac   : > { %v2176_v54 = vpop.f32.mrb[50].mxu1 }
 0xfad   : > { %v3301_v55 = vpop.f32.mrb[51].mxu1  ;;  %v2179_v58 = vsel %vm954_vm12, %v2174_v50, -inf }
 0xfae   : > { %2180 = vmax.xlane.f32.xlu0 %v2179_v58 }
 0xfb2   : > { %v2298_v63 = vpop.f32.mrb[52].mxu1 }
 0xfb3   : > { %v2299_v0 = vadd.f32 %v3039_v59, %v2298_v63  ;;  %v3312_v1 = vpop.f32.mrb[53].mxu1 }
 0xfb4   : > { %v2301_v36 = vpop.f32.mrb[54].mxu1 }
 0xfb5   : > { %2333 = vst.msk [vmem:[#allocation2] sm:$0x80] %vm908_vm4, %v2299_v0  ;;  %v3313_v48 = vpop.f32.mrb[55].mxu1 }
 0xfc4   : > { %2336 = vrot.lane.b32.xlu0 %v806_v52, %s3863_s29 }
 0xfc8   : > { %2309 = vrot.lane.b32.xlu0 %v2299_v0, %s3859_s17 }
 0xfcc   : > { %2313 = vrot.lane.b32.xlu0 %v2299_v0, %s3856_s8  ;;  %s4569_s8 = scalar_lea.hbm %s4621_s7, %s3083_s16 }
 0xfd0   : > { %2321 = vrot.lane.b32.xlu0 %v2299_v0, %s3861_s19 }
 0xfd4   : > { %2329 = vrot.lane.b32.xlu0 %v2299_v0, %s3862_s14 }
0x103b   : > { %v2181_v2 = vpop.xlane.xlu0 %2180 }
0x103c   : > { %v2182_v32 = vsub.f32 %v2174_v50, %v2181_v2 }
0x103e   : > { %v2183_v53 = vmul.f32 1.442695, %v2182_v32 }
0x103f   : > { %v2337_v3 = vpop.permute.xlu0 %2336 }
0x1040   : > { %3554 = vpow2.f32 %v2183_v53  ;;  %v2339_v56 = vsel %vm825_vm1, %v2337_v3, 0 }
0x1043   : > { %v2310_v4 = vpop.permute.xlu0 %2309 }
0x1044   : > { %2312 = vst.msk [vmem:[#allocation2] sm:$0x2] %vm881_vm8, %v2310_v4 }
0x1047   : > { %v2314_v5 = vpop.permute.xlu0 %2313 }
0x1048   : > { %2316 = vst.msk [vmem:[#allocation2] sm:$0x4] %vm886_vm5, %v2314_v5 }
0x104a   : > { %v3555_v61 = vpop.eup %3554 }
0x104b   : > { %v2322_v6 = vpop.permute.xlu0 %2321  ;;  %v2185_v7 = vsel %vm954_vm12, %v3555_v61, 0.0 }
0x104c   : > { %2324 = vst.msk [vmem:[#allocation2] sm:$0x10] %vm896_vm10, %v2322_v6  ;;  %2186 = vadd.xlane.f32.xlu1 %v2185_v7  ;;  %v3512_v6 = vld [vmem:[#allocation13 + $0xc0] sm:$0xff]  }
0x104d   : > { %v3513_v7 = vld [vmem:[#allocation13 + $0x80] sm:$0xff]  }
0x104f   : > { %v2330_v62 = vpop.permute.xlu0 %2329 }
0x1050   : > { %2332 = vst.msk [vmem:[#allocation2] sm:$0x40] %vm906_vm11, %v2330_v62  ;;  %v3514_v62 = vld [vmem:[#allocation13 + $0xc8] sm:$0xff]  }
0x105d   : > { %2305 = vrot.lane.b32.xlu1 %v2299_v0, %s3857_s21  ;;  %s3760_s21 = scalar_lea.vmem %s4571_s28, 128 }
0x105e   : > { %p3761_p6 = scmp.ne.s32.totalorder %s4571_s28, %s3760_s21 }
0x1060   : > { %p3762_p10 = pnand %p3761_p6, %p4643_p5 }
0x1061   : > { %2317 = vrot.lane.b32.xlu1 %v2299_v0, %s3858_s9  ;;  %s3864_s9 = smov [#allocation16]  }
0x1062   : > { %p3763_p1 = pneg %p3762_p10  ;;  %s3764_s17 = sshll.u32 %s3864_s9, 4  ;;  %s3765_s17 = int_to_ptr.vmem [resolvable:$false] %s3764_s17 }
0x1063   : > { %p3767_p11 = scmp.lt.s32.totalorder %s4571_s28, %s3765_s17 }
0x1065   : > { %2325 = vrot.lane.b32.xlu1 %v2299_v0, %s3860_s10  ;;  %v3088_v0 = vpack.c.bf16 %v4518_v41, %v4518_v41  ;;  %s3766_s10 = scalar_lea.vmem %s3765_s17, 256 }
0x1066   : > { %p3768_p12 = scmp.lt.s32.totalorder %s3766_s10, %s3760_s21 }
0x1068   : > { %p3769_p13 = por %p3768_p12, %p3767_p11 }
0x106a   : > { %p3770_p3 = pnand %p3769_p13, %p3763_p1 }
0x10d9   : > { %v2187_v8 = vpop.xlane.xlu1 %2186 }
0x10da   : > { %3556 = vrcp.f32 %v2187_v8  ;;  %v3515_v8 = vld [vmem:[#allocation13 + $0x88] sm:$0xff]  }
0x10dd   : > { %v2306_v9 = vpop.permute.xlu1 %2305 }
0x10de   : > { %2308 = vst.msk [vmem:[#allocation2] sm:$0x1] %vm876_vm6, %v2306_v9  ;;  %v3516_v9 = vld [vmem:[#allocation13 + $0xd0] sm:$0xff]  }
0x10e1   : > { %v2318_v10 = vpop.permute.xlu1 %2317 }
0x10e2   : > { %2320 = vst.msk [vmem:[#allocation2] sm:$0x8] %vm891_vm7, %v2318_v10  ;;  %v3517_v10 = vld [vmem:[#allocation13 + $0x90] sm:$0xff]  }
0x10e4   : > { %v3557_v11 = vpop.eup %3556 }
0x10e5   : > { %v2189_v12 = vmul.f32 %v3557_v11, %v3555_v61  ;;  %v2326_v13 = vpop.permute.xlu1 %2325  ;;  %v3518_v11 = vld [vmem:[#allocation13 + $0xd8] sm:$0xff]  }
0x10e6   : > { %2328 = vst.msk [vmem:[#allocation2] sm:$0x20] %vm901_vm9, %v2326_v13  ;;  %v3520_v13 = vld [vmem:[#allocation13 + $0xe0] sm:$0xff]  }
0x10e7   : > { %v2190_v14 = vpack.c.bf16 %v2189_v12, %v2189_v12  ;;  %v3519_v12 = vld [vmem:[#allocation13 + $0x98] sm:$0xff]  }
0x10e9   : > { %3305 = vmatmul.mubr.msk.bf16.vlgmr.msra.gmra.mrb[52].mxu0 %vm954_vm12, %v2190_v14  ;;  %v3521_v14 = vld [vmem:[#allocation13 + $0xa0] sm:$0xff]  }
0x10ea   : > { %3315 = vmatpush3.bf16.xpose.msra.mxu0 %v2339_v56  ;;  %3316 = vmatprep.mubr.msk.bf16.mxu0 %vm3855_vm2, %v3854_v26  ;;  %v3522_v56 = vld [vmem:[#allocation13 + $0xe8] sm:$0xff]  }
0x10eb   : > { %3138 = vmatprep.subr.bf16.mxu0 %v3494_v15  ;;  %v3523_v15 = vld [vmem:[#allocation13 + $0xa8] sm:$0xff]  }
0x10ed   : > { %v2334_v47 = vld [vmem:[#allocation2] sm:$0xff] }
0x10f1   : > { %3317 = vmatmul.mubr.msk.bf16.vlgmr.msra.gmra.mrb[56].mxu0 %vm825_vm1, %v2252_v40  ;;  %v3505_v40 = vld [vmem:[#allocation13 + $0x28] sm:$0xff]  }
0x10f2   : > { %3139 = vmatpush3.bf16.msra.mxu0 %v3495_v17  ;;  %v3524_v17 = vld [vmem:[#allocation13 + $0xf0] sm:$0xff]  }
0x10f3   : > { %3140 = vmatprep.subr.bf16.mxu0 %v3496_v18  ;;  %v3525_v18 = vld [vmem:[#allocation13 + $0xb0] sm:$0xff]  }
0x10f6   : > { %3141 = vmatpush3.bf16.msra.mxu0 %v3497_v19  ;;  %v3526_v19 = vld [vmem:[#allocation13 + $0xf8] sm:$0xff]  }
0x10f7   : > { %3142 = vmatprep.subr.bf16.mxu0 %v3498_v20  ;;  %v3527_v20 = vld [vmem:[#allocation13 + $0xb8] sm:$0xff]  }
0x10fa   : > { %3143 = vmatpush3.bf16.msra.mxu0 %v3499_v21 }
0x10fb   : > { %3144 = vmatprep.subr.bf16.mxu0 %v3500_v22 }
0x10fe   : > { %3145 = vmatpush3.bf16.msra.mxu0 %v3501_v35 }
0x10ff   : > { %3146 = vmatprep.subr.bf16.mxu0 %v3502_v60 }
0x1102   : > { %3147 = vmatpush3.bf16.msra.mxu0 %v3503_v38 }
0x1103   : > { %3148 = vmatprep.subr.bf16.mxu0 %v3504_v39 }
0x1106   : > { %3149 = vmatpush3.bf16.msra.mxu0 %v3505_v40 }
0x1107   : > { %3150 = vmatprep.subr.bf16.mxu0 %v3506_v43 }
0x110a   : > { %3151 = vmatpush3.bf16.msra.mxu0 %v3507_v44 }
0x110b   : > { %3152 = vmatprep.subr.bf16.mxu0 %v3508_v46 }
0x110e   : > { %3153 = vmatpush3.bf16.msra.mxu0 %v3509_v42 }
0x11bc   : > { %v2231_v23 = vpop.f32.mrb[52].mxu0 }
0x11bd   : > { %v2237_v29 = vpack.c.bf16 %v2231_v23, %v2231_v23  ;;  %v3306_v24 = vpop.f32.mrb[53].mxu0 }
0x11be   : > { %v2234_v26 = vpop.f32.mrb[54].mxu0 }
0x11bf   : > { %2238 = vst.msk [vmem:[#allocation3 + $0xc] sm:$0xf] %vm1015_vm13, %v2237_v29  ;;  %v3307_v25 = vpop.f32.mrb[55].mxu0 }
0x11c4   : > { %v2375_v27 = vpop.f32.mrb[56].mxu0 }
0x11c5   : > { %v2376_v28 = vadd.f32 %v2375_v27, %v2334_v47  ;;  %v3318_v31 = vpop.f32.mrb[57].mxu0 }
0x11c6   : > { %v2378_v33 = vpop.f32.mrb[58].mxu0 }
0x11c7   : > { %v3319_v52 = vpop.f32.mrb[59].mxu0  ;;  %v2381_v34 = vsel %vm954_vm12, %v2376_v28, -inf }
0x11c8   : > { %2382 = vmax.xlane.f32.xlu1 %v2381_v34 }
0x11d9   : > { %1224 = vrot.lane.b32.xlu1 %v3086_v37, %s3863_s29 }
0x11dd   : > { %1632 = vrot.lane.b32.xlu1 %v3087_v57, %s3863_s29 }
0x1255   : > { %v2383_v45 = vpop.xlane.xlu1 %2382 }
0x1256   : > { %v2384_v49 = vsub.f32 %v2376_v28, %v2383_v45  ;;  %v3045_v28 = vld [vmem:[#allocation15] ss:$0 sm:$0xff] }
0x1258   : > { %v2385_v50 = vmul.f32 1.442695, %v2384_v49 }
0x1259   : > { %v1225_v51 = vpop.permute.xlu1 %1224 }
0x125a   : > { %3558 = vpow2.f32 %v2385_v50  ;;  %1228 = vst.msk [vmem:[#allocation3] sm:$0xf] %vm1227_vm14, %v1225_v51 }
0x125d   : > { %v1633_v16 = vpop.permute.xlu1 %1632 }
0x125e   : > { %1635 = vst.msk [vmem:[#allocation3 + $0x4] sm:$0xf] %vm1227_vm14, %v1633_v16 }
0x1264   : > { %v3559_v54 = vpop.eup %3558 }
0x1265   : > { %v2387_v55 = vsel %vm954_vm12, %v3559_v54, 0.0  ;;  %v2450_v58 = vld [vmem:[#allocation3] sm:$0xff] }
0x1266   : > { %2388 = vadd.xlane.f32.xlu0 %v2387_v55  ;;  %v3046_v59 = vcombine.low %v2450_v58, %v2450_v58  ;;  %v3047_v63 = vcombine.high %v2450_v58, %v2450_v58 }
0x1268   : > { %2761 = vmatprep.mubr.bf16.mxu0 %v3047_v63 }
0x1269   : > { %2762 = vmatmul.mubr.bf16.vlgmr.msra.gmra.mrb[60].mxu0 %v3046_v59 }
0x127c   : > { %2394 = vrot.lane.b32.xlu0 %v4467_v30, %s3863_s29 }
0x1280   : > { %2039 = vrot.lane.b32.xlu0 %v3088_v0, %s3863_s29 }
0x12f3   : > { %v2389_v1 = vpop.xlane.xlu0 %2388 }
0x12f4   : > { %3560 = vrcp.f32 %v2389_v1 }
0x12f7   : > { %v2395_v36 = vpop.permute.xlu0 %2394 }
0x12f8   : > { %v2400_v48 = vsel %vm970_vm3, %v2395_v36, 0 }
0x12f9   : > { %3321 = vmatpush3.bf16.msra.mxu1 %v2400_v48 }
0x12fa   : > { %3160 = vmatprep.subr.bf16.mxu1 %v3512_v6 }
0x12fb   : > { %v2040_v2 = vpop.permute.xlu0 %2039 }
0x12fc   : > { %2042 = vst.msk [vmem:[#allocation3 + $0x8] sm:$0xf] %vm1227_vm14, %v2040_v2 }
0x12fe   : > { %v3561_v32 = vpop.eup %3560 }
0x12ff   : > { %v2391_v53 = vmul.f32 %v3561_v32, %v3559_v54 }
0x1301   : > { %v2392_v3 = vpack.c.bf16 %v2391_v53, %v2391_v53 }
0x1303   : > { %3323 = vmatmul.mubr.msk.bf16.vlgmr.msra.gmra.mrb[56].mxu1 %vm954_vm12, %v2392_v3 }
0x1304   : > { %3161 = vmatpush3.bf16.msra.mxu1 %v3513_v7 }
0x1305   : > { %3162 = vmatprep.subr.bf16.mxu1 %v3514_v62 }
0x1308   : > { %3163 = vmatpush3.bf16.msra.mxu1 %v3515_v8 }
0x1309   : > { %3164 = vmatprep.subr.bf16.mxu1 %v3516_v9 }
0x130c   : > { %3165 = vmatpush3.bf16.msra.mxu1 %v3517_v10 }
0x130d   : > { %3166 = vmatprep.subr.bf16.mxu1 %v3518_v11 }
0x1310   : > { %3167 = vmatpush3.bf16.msra.mxu1 %v3519_v12 }
0x1311   : > { %3168 = vmatprep.subr.bf16.mxu1 %v3520_v13 }
0x1314   : > { %3169 = vmatpush3.bf16.msra.mxu1 %v3521_v14 }
0x1315   : > { %3170 = vmatprep.subr.bf16.mxu1 %v3522_v56 }
0x1318   : > { %3171 = vmatpush3.bf16.msra.mxu1 %v3523_v15 }
0x1319   : > { %3172 = vmatprep.subr.bf16.mxu1 %v3524_v17 }
0x131c   : > { %3173 = vmatpush3.bf16.msra.mxu1 %v3525_v18 }
0x131d   : > { %3174 = vmatprep.subr.bf16.mxu1 %v3526_v19 }
0x1320   : > { %3175 = vmatpush3.bf16.msra.mxu1 %v3527_v20 }
0x133c   : > { %v3154_v30 = vpop.f32.mrb[60].mxu0 }
0x133d   : > { %v3155_v4 = vpop.f32.mrb[61].mxu0 }
0x133e   : > { %v3156_v5 = vadd.f32 %v3155_v4, %v3154_v30  ;;  %v3157_v41 = vpop.f32.mrb[62].mxu0 }
0x133f   : > { %v3158_v61 = vpop.f32.mrb[63].mxu0 }
0x1340   : > { %v2764_v52 = vadd.f32 %v3156_v5, %v3045_v28 }
0x13d6   : > { %v2436_v21 = vpop.f32.mrb[56].mxu1 }
0x13d7   : > { %v3089_v22 = vpack.c.bf16 %v2436_v21, %v2436_v21  ;;  %v3324_v23 = vpop.f32.mrb[57].mxu1 }
0x13d8   : > { %v2439_v29 = vpop.f32.mrb[58].mxu1 }
0x13d9   : > { %2446 = vrot.lane.b32.xlu1 %v3089_v22, %s3863_s29  ;;  %v3325_v24 = vpop.f32.mrb[59].mxu1 }
0x144b   : > { %v2447_v26 = vpop.permute.xlu1 %2446 }
0x144c   : > { %2449 = vst.msk [vmem:[#allocation3 + $0xc] sm:$0xf] %vm1227_vm14, %v2447_v26 }
0x1453   : > { %v2451_v25 = vld [vmem:[#allocation3 + $0x8] sm:$0xff] }
0x1454   : > { %v3048_v47 = vcombine.low %v2451_v25, %v2451_v25  ;;  %v3049_v27 = vcombine.high %v2451_v25, %v2451_v25 }
0x1456   : > { %2801 = vmatprep.mubr.bf16.mxu1 %v3049_v27 }
0x1457   : > { %2802 = vmatmul.mubr.bf16.vlgmr.msra.gmra.mrb[60].mxu1 %v3048_v47 }
0x152a   : > { %v3176_v31 = vpop.f32.mrb[60].mxu1 }
0x152b   : > { %v3177_v33 = vpop.f32.mrb[61].mxu1 }
0x152c   : > { %v3178_v34 = vadd.f32 %v3177_v33, %v3176_v31  ;;  %v3179_v35 = vpop.f32.mrb[62].mxu1 }
0x152d   : > { %v3180_v37 = vpop.f32.mrb[63].mxu1 }
0x152e   : > { %v2804_v60 = vadd.f32 %v3178_v34, %v2764_v52 }
0x1530   : > { %2809 = vst.msk [vmem:[%s376_s23] sm:$0xff] %vm523_vm0, %v2804_v60 }
0x1531   : > { %3773 = shalt.err (!%p3770_p3)
}
0x1532   : > { %s3774_s20 = scalar_lea.hbm %s4569_s8, 128  ;;  %s3778_s29 = scalar_lea.hbm %s4621_s7, 256 }
0x1533   : > { %p3775_p7 = scmp.ne.s32.totalorder %s4569_s8, %s3774_s20  ;;  %p3779_p8 = scmp.lt.u32.totalorder %s4569_s8, %s4621_s7 }
0x1534   : > { %p3780_p0 = scmp.lt.u32.totalorder %s3778_s29, %s3774_s20  ;;  %p3782_p6 = scmp.lt.u32.totalorder %s3774_s20, %s4569_s8 }
0x1535   : > { %p3776_p9 = pnand %p3775_p7, %p4643_p5 }
0x1536   : > { %p3781_p2 = por %p3780_p0, %p3779_p8 }
0x1537   : > { %p3777_p4 = pneg %p3776_p9 }
0x1538   : > { %p3783_p10 = por %p3782_p6, %p3781_p2 }
0x153a   : > { %p3784_p1 = pnand %p3783_p10, %p3777_p4 }
0x153c   : > { %3787 = shalt.err (!%p3784_p1)
}
0x153d   : > { %3352 = dma.vmem_to_hbm [thread:$0]  (%p4643_p5), %s4571_s28, 128, %s4569_s8, %s2811_s30  }
0x153e PF: > { %s2836_s23 = sand.u32 1, %s3826_s24   ;;  %p4644_p11 = scmp.ne.s32.totalorder %s4634_s22, 0 }
0x153f   : > { %p4645_p12 = scmp.ge.s32.totalorder %s3838_s27, 2  ;;  %s2837_s12 = scalar_lea.sflag [#allocation6], %s2836_s23 }
0x1541   : > { %p3378_p13 = pnand %p4645_p12, %p4644_p11 }
0x1543   : > { %3821 = dma.done.wait (!%p3378_p13), %s2837_s12, 128  }
0x1544   : > { %3823 = vsyncadd (!%p3378_p13), %s2837_s12, 4294967168  ;;  %p23_p3 = scmp.ge.s32.totalorder %s4077_s11, 4   ;;  %s4646_s24 = smov %s3830_s25 }
0x1545   : > { %s4647_s25 = smov %s3834_s26  ;;  %s4648_s26 = smov %s4088_s18 }
0x1546   : > { %s4649_s27 = smov %s4077_s11  ;;  %25 = sbr.rel (!%p23_p3) target bundleno = 10 (0xa), region = 131 }
0x154d   :  { %2842 = vsyncpa [#allocation5], 1 }
0x154e   :  { %2844 = vsyncpa [#allocation5 + $0x1], 1 }
0x154f   :  { %2845 = vsyncpa [#allocation8], 1 }
0x1550   :  { %2846 = vsyncpa [#allocation11], 1 }
0x1551   :  { %2847 = vsyncpa [#allocation14], 1 }
0x1552   :  { %2848 = vsyncpa [#allocation6], 1 }
0x1553   :  { %2850 = vsyncpa [#allocation6 + $0x1], 1 }

</bundles_post_ra>
